<compile_context>
chip_gen: v7x
topology: tpu7x:2x2x1
jax: 0.10.0
libtpu: 0.0.40
codegen_flags: <defaults>
</compile_context>

<pallas_src>
import functools
import math

import jax
import jax.numpy as jnp
from jax.experimental import pallas as pl
from jax.experimental.pallas import tpu as pltpu  # noqa: F401  (kept for TPU-specific tweaks)

CONFIG = dict(
    image_size=16,
    patch_size=4,
    num_channels=4,
    hidden_size=32,
    num_attention_heads=4,
    intermediate_size=64,
    num_hidden_layers=2,
    num_classes=10,
    qkv_bias=True,
    initializer_range=0.02,
    hidden_dropout_prob=0.0,            # dropout == identity in this script
    attention_probs_dropout_prob=0.0,   # dropout == identity in this script
    use_faster_attention=True,
)

LN_EPS = 1e-5      # PyTorch nn.LayerNorm default
NC_PAD = 128       # classifier out-dim padded to a full lane tile
NEG_INF = -1e9     # additive cross-image attention mask value


# ----------------------------- shared math helpers ---------------------------


def _layer_norm(x, w, b):
    mu = jnp.mean(x, axis=-1, keepdims=True)
    var = jnp.mean((x - mu) ** 2, axis=-1, keepdims=True)
    return (x - mu) * jax.lax.rsqrt(var + LN_EPS) * w + b


def _new_gelu(x):
    # Matches NewGELUActivation (tanh approximation) exactly.
    return 0.5 * x * (1.0 + jnp.tanh(
        math.sqrt(2.0 / math.pi) * (x + 0.044715 * x ** 3)))


# ------------------------------- fused kernel -------------------------------


def vit_kernel(L, H, D, hd, I,
               patches_ref, emb_add_ref, mask_ref, patch_w_ref,
               wqkv_ref, wo_ref, w1_ref, w2_ref, vecs_ref, head_wb_ref,
               out_ref):
    """Full ViT forward for the WHOLE batch (activations are [B*S, ...])."""
    # Patch projection + cls/pos embedding.  The CLS rows of `patches` are
    # zero-padded on the host, so they become exactly cls_token + pos[0]
    # via the additive embedding table.
    x = jnp.dot(patches_ref[...], patch_w_ref[...],
                preferred_element_type=jnp.float32) + emb_add_ref[...]   # [BS, D]
    mask = mask_ref[...]                                                 # [BS, BS]

    for l in range(L):                       # tiny static L -> full unroll
        vecs = vecs_ref[l]                   # [8, 128] packed per-layer vectors
        ln1w, ln1b = vecs[0:1, 0:D], vecs[1:2, 0:D]
        bqkv       = vecs[2:3, 0:3 * D]
        bo         = vecs[3:4, 0:D]
        ln2w, ln2b = vecs[4:5, 0:D], vecs[5:6, 0:D]
        b1         = vecs[6:7, 0:I]
        b2         = vecs[7:8, 0:D]

        # ---------------- attention ----------------
        h = _layer_norm(x, ln1w, ln1b)
        # One fused QKV matmul for the whole batch (Q columns pre-scaled by
        # 1/sqrt(head_dim) on the host).
        qkv = jnp.dot(h, wqkv_ref[l],
                      preferred_element_type=jnp.float32) + bqkv         # [BS, 3D]

        wo_l = wo_ref[l]                                                 # [D, D]
        attn = None
        for hh in range(H):                 # per-head: static 8-lane slices
            q = qkv[:, hh * hd:(hh + 1) * hd]
            k = qkv[:, D + hh * hd:D + (hh + 1) * hd]
            v = qkv[:, 2 * D + hh * hd:2 * D + (hh + 1) * hd]
            # Block-diagonal over the batch: one wide score matmul + additive
            # mask instead of per-batch row slicing.
            s = jax.lax.dot_general(q, k, (((1,), (1,)), ((), ())),
                                    preferred_element_type=jnp.float32) + mask
            m = jnp.max(s, axis=-1, keepdims=True)
            p = jnp.exp(s - m)
            p = p * pl.reciprocal(jnp.sum(p, axis=-1, keepdims=True), approx=True)
            ctx = jnp.dot(p, v, preferred_element_type=jnp.float32)      # [BS, hd]
            # Accumulate the output projection per head (no ctx concat).
            part = jnp.dot(ctx, wo_l[hh * hd:(hh + 1) * hd, :],
                           preferred_element_type=jnp.float32)           # [BS, D]
            attn = part if attn is None else attn + part
        x = x + attn + bo

        # ---------------- MLP ----------------
        h2 = _layer_norm(x, ln2w, ln2b)
        f = _new_gelu(jnp.dot(h2, w1_ref[l],
                              preferred_element_type=jnp.float32) + b1)
        x = x + jnp.dot(f, w2_ref[l],
                        preferred_element_type=jnp.float32) + b2

    # Classifier on all rows (single lane-dense [BS,128] matmul + store);
    # the host keeps only the CLS rows.  No final LayerNorm in the reference.
    logits = jnp.dot(x, head_wb_ref[0:D, :],
                     preferred_element_type=jnp.float32) + head_wb_ref[D:D + 1, :]
    out_ref[...] = logits.astype(out_ref.dtype)


# ------------------------------ host wrapper --------------------------------


def prepare_kernel_params(params, config):
    """Stack / re-layout the logical parameters into kernel-resident arrays."""
    D = config["hidden_size"]
    H = config["num_attention_heads"]
    hd = D // H
    L = config["num_hidden_layers"]
    NC = config["num_classes"]
    scale = 1.0 / math.sqrt(hd)

    def stack(i):
        return jnp.stack([layer[i] for layer in params["layers"]], axis=0)

    ln1w, ln1b = stack(0), stack(1)            # [L, 1, D]
    qkvw, qkvb = stack(2), stack(3)            # [L, D, 3D], [L, 1, 3D]
    ow, ob = stack(4), stack(5)                # [L, D, D],  [L, 1, D]
    ln2w, ln2b = stack(6), stack(7)            # [L, 1, D]
    w1, b1 = stack(8), stack(9)                # [L, D, I],  [L, 1, I]
    w2, b2 = stack(10), stack(11)              # [L, I, D],  [L, 1, D]

    # Fold 1/sqrt(head_dim) into the Q columns of the fused QKV projection.
    scale_vec = jnp.concatenate([jnp.full((D,), scale, jnp.float32),
                                 jnp.ones((2 * D,), jnp.float32)])
    wqkv = qkvw * scale_vec[None, None, :]
    bqkv = qkvb * scale_vec[None, None, :]

    # Pack all per-layer [1,*] vectors into one [L, 8, 128] array (one input,
    # one DMA) -- rows: ln1w, ln1b, bqkv, bo, ln2w, ln2b, b1, b2.
    def row(v):
        r = jnp.zeros((1, 128), jnp.float32)
        return r.at[:, :v.shape[-1]].set(v)

    vecs = jnp.stack([
        jnp.concatenate([row(ln1w[l]), row(ln1b[l]), row(bqkv[l]), row(ob[l]),
                         row(ln2w[l]), row(ln2b[l]), row(b1[l]), row(b2[l])],
                        axis=0)
        for l in range(L)], axis=0)                                   # [L, 8, 128]

    # Additive embedding table: row 0 = cls + pos[0]; rows 1.. = pos + conv bias.
    emb_add = jnp.concatenate(
        [params["cls"] + params["pos"][0:1],
         params["pos"][1:] + params["patch_b"]], axis=0)              # [S, D]

    # Classifier weight + bias stacked into one lane-dense [D+1, 128] array.
    head_wb = jnp.zeros((D + 1, NC_PAD), jnp.float32)
    head_wb = head_wb.at[:D, :NC].set(params["head_w"])
    head_wb = head_wb.at[D:, :NC].set(params["head_b"])

    return dict(patch_w=params["patch_w"], emb_add=emb_add, vecs=vecs,
                wqkv=wqkv, wo=ow, w1=w1, w2=w2, head_wb=head_wb)


def vit_forward(x_nchw, kp, config):
    B, C, Himg, Wimg = x_nchw.shape
    P = config["patch_size"]
    D = config["hidden_size"]
    H = config["num_attention_heads"]
    hd = D // H
    L = config["num_hidden_layers"]
    I = config["intermediate_size"]
    NC = config["num_classes"]
    nP = Himg // P
    N = nP * nP
    S = N + 1
    BS = B * S
    CPP = C * P * P

    # im2col for the stride==kernel conv (pure layout glue) + a zero CLS row per
    # image, flattened to [B*S, CPP] so the kernel runs the whole batch at once.
    patches = (x_nchw.reshape(B, C, nP, P, nP, P)
               .transpose(0, 2, 4, 1, 3, 5)
               .reshape(B, N, CPP))
    patches = jnp.concatenate(
        [jnp.zeros((B, 1, CPP), patches.dtype), patches], axis=1).reshape(BS, CPP)

    emb_add = jnp.tile(kp["emb_add"], (B, 1))                         # [BS, D]

    # Block-diagonal additive mask: tokens only attend within their own image.
    seg = jnp.repeat(jnp.arange(B, dtype=jnp.int32), S)
    mask = jnp.where(seg[:, None] == seg[None, :], 0.0, NEG_INF).astype(jnp.float32)

    kernel = functools.partial(vit_kernel, L, H, D, hd, I)

    # Single invocation, no grid: every input is a whole-array VMEM block
    # (total resident footprint << 1 MiB on all TPU generations).
    out = pl.pallas_call(
        kernel,
        out_shape=jax.ShapeDtypeStruct((BS, NC_PAD), jnp.float32),
    )(patches, emb_add, mask, kp["patch_w"], kp["wqkv"], kp["wo"],
      kp["w1"], kp["w2"], kp["vecs"], kp["head_wb"])

    return out.reshape(B, S, NC_PAD)[:, 0, :NC]


# ------------------------------ parameter init ------------------------------


def init_params(key, config):
    std = config["initializer_range"]
    D = config["hidden_size"]
    C = config["num_channels"]
    P = config["patch_size"]
    I = config["intermediate_size"]
    NC = config["num_classes"]
    N = (config["image_size"] // P) ** 2

    n_keys = 4 + 4 * config["num_hidden_layers"]
    keys = iter(jax.random.split(key, n_keys))

    def w(shape):
        return jax.random.normal(next(keys), shape, jnp.float32) * std

    params = {
        "patch_w": w((C * P * P, D)),          # Conv2d as matmul, [in, out]
        "patch_b": jnp.zeros((1, D), jnp.float32),
        "cls": w((1, D)),
        # TODO(synk): PyTorch uses trunc_normal_ for cls/pos; plain normal here.
        "pos": w((N + 1, D)),
        "head_w": w((D, NC)),
        "head_b": jnp.zeros((1, NC), jnp.float32),
        "layers": [],
    }
    for _ in range(config["num_hidden_layers"]):
        layer = [
            jnp.ones((1, D), jnp.float32), jnp.zeros((1, D), jnp.float32),   # ln1
            w((D, 3 * D)), jnp.zeros((1, 3 * D), jnp.float32),               # qkv
            w((D, D)), jnp.zeros((1, D), jnp.float32),                       # attn out proj
            jnp.ones((1, D), jnp.float32), jnp.zeros((1, D), jnp.float32),   # ln2
            w((D, I)), jnp.zeros((1, I), jnp.float32),                       # mlp fc1
            w((I, D)), jnp.zeros((1, D), jnp.float32),                       # mlp fc2
        ]
        params["layers"].append(layer)
    return params


# --------------------------- pure-JAX reference ------------------------------


def vit_reference(x_nchw, params, config):
    """Straightforward JAX transcription of the PyTorch forward (f32)."""
    B, C, Himg, _ = x_nchw.shape
    P = config["patch_size"]
    D = config["hidden_size"]
    H = config["num_attention_heads"]
    hd = D // H
    nP = Himg // P
    N = nP * nP
    S = N + 1
    CPP = C * P * P

    patches = (x_nchw.reshape(B, C, nP, P, nP, P)
               .transpose(0, 2, 4, 1, 3, 5).reshape(B, N, CPP))
    x = patches @ params["patch_w"] + params["patch_b"]
    cls = jnp.broadcast_to(params["cls"], (B, 1, D))
    x = jnp.concatenate([cls, x], axis=1) + params["pos"][None]

    for layer in params["layers"]:
        ln1w, ln1b, qkvw, qkvb, ow, ob, ln2w, ln2b, w1, b1, w2, b2 = layer
        h = _layer_norm(x, ln1w, ln1b)
        qkv = h @ qkvw + qkvb
        q, k, v = jnp.split(qkv, 3, axis=-1)

        def split_heads(t):
            return t.reshape(B, S, H, hd).transpose(0, 2, 1, 3)

        q, k, v = split_heads(q), split_heads(k), split_heads(v)
        s = jnp.einsum("bhqd,bhkd->bhqk", q, k) / math.sqrt(hd)
        p = jax.nn.softmax(s, axis=-1)
        ctx = jnp.einsum("bhqk,bhkd->bhqd", p, v)
        ctx = ctx.transpose(0, 2, 1, 3).reshape(B, S, D)
        x = x + ctx @ ow + ob

        h2 = _layer_norm(x, ln2w, ln2b)
        f = _new_gelu(h2 @ w1 + b1)
        x = x + f @ w2 + b2

    return x[:, 0, :] @ params["head_w"] + params["head_b"]


# ---------------------------------- main ------------------------------------


if __name__ == "__main__":
    root = jax.random.PRNGKey(0)
    pkey, xkey = jax.random.split(root)
    params = init_params(pkey, CONFIG)
    kparams = prepare_kernel_params(params, CONFIG)   # one-time re-layout

    x = jax.random.normal(
        xkey,
        (2, CONFIG["num_channels"], CONFIG["image_size"], CONFIG["image_size"]),
        jnp.float32,
    )

    fwd = jax.jit(functools.partial(vit_forward, config=CONFIG))
    logits = fwd(x, kparams)
    jax.block_until_ready(logits)

    assert logits.shape == (2, CONFIG["num_classes"])
    assert logits.dtype == jnp.float32

    # Numerical check against the pure-JAX reference of the PyTorch forward
    # (generous tolerance: the kernel uses the EUP approximate reciprocal in
    # softmax and folds the attention scale / conv bias, all f32 otherwise).
    ref = jax.jit(functools.partial(vit_reference, config=CONFIG))(x, params)
    jax.block_until_ready(ref)
    max_err = float(jnp.max(jnp.abs(logits - ref)))
    assert max_err < 1e-3, f"max abs error vs reference: {max_err}"

    print("KERNEL_OK")
</pallas_src>

<mosaic_0001>
module attributes {stable_mosaic.version = 11 : i64} {
  func.func @vit_kernel(%arg0: memref<34x64xf32, #tpu.memory_space<vmem>>, %arg1: memref<34x32xf32, #tpu.memory_space<vmem>>, %arg2: memref<34x34xf32, #tpu.memory_space<vmem>>, %arg3: memref<64x32xf32, #tpu.memory_space<vmem>>, %arg4: memref<2x32x96xf32, #tpu.memory_space<vmem>>, %arg5: memref<2x32x32xf32, #tpu.memory_space<vmem>>, %arg6: memref<2x32x64xf32, #tpu.memory_space<vmem>>, %arg7: memref<2x64x32xf32, #tpu.memory_space<vmem>>, %arg8: memref<2x8x128xf32, #tpu.memory_space<vmem>>, %arg9: memref<33x128xf32, #tpu.memory_space<vmem>>, %arg10: memref<34x128xf32, #tpu.memory_space<vmem>>) attributes {dimension_semantics = [], scalar_prefetch = 0 : i64, scratch_operands = 0 : i64, tpu.core_type = #tpu.core_type<tc>} {
    %c0 = arith.constant 0 : index
    %c0_0 = arith.constant 0 : index
    %0 = vector.load %arg0[%c0, %c0_0] : memref<34x64xf32, #tpu.memory_space<vmem>>, vector<34x64xf32>
    %c0_1 = arith.constant 0 : index
    %c0_2 = arith.constant 0 : index
    %1 = vector.load %arg3[%c0_1, %c0_2] : memref<64x32xf32, #tpu.memory_space<vmem>>, vector<64x32xf32>
    %cst = arith.constant dense<0.000000e+00> : vector<34x32xf32>
    %2 = tpu.matmul %0, %1, %cst {dimension_numbers = #tpu.dot_dimension_numbers<[1], [0], [0], [1], [0, 0, 1, 1], [], []>} : vector<34x64xf32>, vector<64x32xf32>, vector<34x32xf32> -> vector<34x32xf32>
    %c0_3 = arith.constant 0 : index
    %c0_4 = arith.constant 0 : index
    %3 = vector.load %arg1[%c0_3, %c0_4] : memref<34x32xf32, #tpu.memory_space<vmem>>, vector<34x32xf32>
    %4 = arith.addf %2, %3 : vector<34x32xf32>
    %c0_5 = arith.constant 0 : index
    %c0_6 = arith.constant 0 : index
    %5 = vector.load %arg2[%c0_5, %c0_6] : memref<34x34xf32, #tpu.memory_space<vmem>>, vector<34x34xf32>
    %c0_7 = arith.constant 0 : index
    %c0_8 = arith.constant 0 : index
    %c0_9 = arith.constant 0 : index
    %6 = vector.load %arg8[%c0_7, %c0_8, %c0_9] : memref<2x8x128xf32, #tpu.memory_space<vmem>>, vector<1x8x128xf32>
    %7 = vector.shape_cast %6 : vector<1x8x128xf32> to vector<8x128xf32>
    %8 = vector.extract_strided_slice %7 {offsets = [0, 0], sizes = [1, 32], strides = [1, 1]} : vector<8x128xf32> to vector<1x32xf32>
    %9 = vector.extract_strided_slice %7 {offsets = [1, 0], sizes = [1, 32], strides = [1, 1]} : vector<8x128xf32> to vector<1x32xf32>
    %10 = vector.extract_strided_slice %7 {offsets = [2, 0], sizes = [1, 96], strides = [1, 1]} : vector<8x128xf32> to vector<1x96xf32>
    %11 = vector.extract_strided_slice %7 {offsets = [3, 0], sizes = [1, 32], strides = [1, 1]} : vector<8x128xf32> to vector<1x32xf32>
    %12 = vector.extract_strided_slice %7 {offsets = [4, 0], sizes = [1, 32], strides = [1, 1]} : vector<8x128xf32> to vector<1x32xf32>
    %13 = vector.extract_strided_slice %7 {offsets = [5, 0], sizes = [1, 32], strides = [1, 1]} : vector<8x128xf32> to vector<1x32xf32>
    %14 = vector.extract_strided_slice %7 {offsets = [6, 0], sizes = [1, 64], strides = [1, 1]} : vector<8x128xf32> to vector<1x64xf32>
    %15 = vector.extract_strided_slice %7 {offsets = [7, 0], sizes = [1, 32], strides = [1, 1]} : vector<8x128xf32> to vector<1x32xf32>
    %cst_10 = arith.constant dense<0.000000e+00> : vector<34xf32>
    %16 = vector.multi_reduction <add>, %4, %cst_10 [1] : vector<34x32xf32> to vector<34xf32>
    %17 = vector.shape_cast %16 : vector<34xf32> to vector<34x1xf32>
    %cst_11 = arith.constant 3.200000e+01 : f32
    %18 = vector.broadcast %cst_11 : f32 to vector<34x1xf32>
    %19 = arith.divf %17, %18 : vector<34x1xf32>
    %20 = vector.broadcast %19 : vector<34x1xf32> to vector<34x32xf32>
    %21 = arith.subf %4, %20 : vector<34x32xf32>
    %22 = arith.mulf %21, %21 : vector<34x32xf32>
    %cst_12 = arith.constant dense<0.000000e+00> : vector<34xf32>
    %23 = vector.multi_reduction <add>, %22, %cst_12 [1] : vector<34x32xf32> to vector<34xf32>
    %24 = vector.shape_cast %23 : vector<34xf32> to vector<34x1xf32>
    %cst_13 = arith.constant 3.200000e+01 : f32
    %25 = vector.broadcast %cst_13 : f32 to vector<34x1xf32>
    %26 = arith.divf %24, %25 : vector<34x1xf32>
    %27 = vector.broadcast %19 : vector<34x1xf32> to vector<34x32xf32>
    %28 = arith.subf %4, %27 : vector<34x32xf32>
    %cst_14 = arith.constant 9.99999974E-6 : f32
    %29 = vector.broadcast %cst_14 : f32 to vector<34x1xf32>
    %30 = arith.addf %26, %29 : vector<34x1xf32>
    %31 = math.rsqrt %30 : vector<34x1xf32>
    %32 = vector.broadcast %31 : vector<34x1xf32> to vector<34x32xf32>
    %33 = arith.mulf %28, %32 : vector<34x32xf32>
    %34 = vector.broadcast %8 : vector<1x32xf32> to vector<34x32xf32>
    %35 = arith.mulf %33, %34 : vector<34x32xf32>
    %36 = vector.broadcast %9 : vector<1x32xf32> to vector<34x32xf32>
    %37 = arith.addf %35, %36 : vector<34x32xf32>
    %c0_15 = arith.constant 0 : index
    %c0_16 = arith.constant 0 : index
    %c0_17 = arith.constant 0 : index
    %38 = vector.load %arg4[%c0_15, %c0_16, %c0_17] : memref<2x32x96xf32, #tpu.memory_space<vmem>>, vector<1x32x96xf32>
    %39 = vector.shape_cast %38 : vector<1x32x96xf32> to vector<32x96xf32>
    %cst_18 = arith.constant dense<0.000000e+00> : vector<34x96xf32>
    %40 = tpu.matmul %37, %39, %cst_18 {dimension_numbers = #tpu.dot_dimension_numbers<[1], [0], [0], [1], [0, 0, 1, 1], [], []>} : vector<34x32xf32>, vector<32x96xf32>, vector<34x96xf32> -> vector<34x96xf32>
    %41 = vector.broadcast %10 : vector<1x96xf32> to vector<34x96xf32>
    %42 = arith.addf %40, %41 : vector<34x96xf32>
    %c0_19 = arith.constant 0 : index
    %c0_20 = arith.constant 0 : index
    %c0_21 = arith.constant 0 : index
    %43 = vector.load %arg5[%c0_19, %c0_20, %c0_21] : memref<2x32x32xf32, #tpu.memory_space<vmem>>, vector<1x32x32xf32>
    %44 = vector.shape_cast %43 : vector<1x32x32xf32> to vector<32x32xf32>
    %45 = vector.extract_strided_slice %42 {offsets = [0, 0], sizes = [34, 8], strides = [1, 1]} : vector<34x96xf32> to vector<34x8xf32>
    %46 = vector.extract_strided_slice %42 {offsets = [0, 32], sizes = [34, 8], strides = [1, 1]} : vector<34x96xf32> to vector<34x8xf32>
    %47 = vector.extract_strided_slice %42 {offsets = [0, 64], sizes = [34, 8], strides = [1, 1]} : vector<34x96xf32> to vector<34x8xf32>
    %cst_22 = arith.constant dense<0.000000e+00> : vector<34x34xf32>
    %48 = tpu.matmul %45, %46, %cst_22 {dimension_numbers = #tpu.dot_dimension_numbers<[1], [1], [0], [0], [0, 0, 1, 0], [], []>} : vector<34x8xf32>, vector<34x8xf32>, vector<34x34xf32> -> vector<34x34xf32>
    %49 = arith.addf %48, %5 : vector<34x34xf32>
    %cst_23 = arith.constant dense<0xFF800000> : vector<34xf32>
    %50 = vector.multi_reduction <maximumf>, %49, %cst_23 [1] : vector<34x34xf32> to vector<34xf32>
    %51 = vector.shape_cast %50 : vector<34xf32> to vector<34x1xf32>
    %52 = vector.broadcast %51 : vector<34x1xf32> to vector<34x34xf32>
    %53 = arith.subf %49, %52 : vector<34x34xf32>
    %54 = math.exp %53 : vector<34x34xf32>
    %cst_24 = arith.constant dense<0.000000e+00> : vector<34xf32>
    %55 = vector.multi_reduction <add>, %54, %cst_24 [1] : vector<34x34xf32> to vector<34xf32>
    %56 = vector.shape_cast %55 : vector<34xf32> to vector<34x1xf32>
    %57 = tpu.reciprocal %56 {approx = true} : vector<34x1xf32> -> vector<34x1xf32>
    %58 = vector.broadcast %57 : vector<34x1xf32> to vector<34x34xf32>
    %59 = arith.mulf %54, %58 : vector<34x34xf32>
    %cst_25 = arith.constant dense<0.000000e+00> : vector<34x8xf32>
    %60 = tpu.matmul %59, %47, %cst_25 {dimension_numbers = #tpu.dot_dimension_numbers<[1], [0], [0], [1], [0, 0, 1, 1], [], []>} : vector<34x34xf32>, vector<34x8xf32>, vector<34x8xf32> -> vector<34x8xf32>
    %61 = vector.extract_strided_slice %44 {offsets = [0, 0], sizes = [8, 32], strides = [1, 1]} : vector<32x32xf32> to vector<8x32xf32>
    %cst_26 = arith.constant dense<0.000000e+00> : vector<34x32xf32>
    %62 = tpu.matmul %60, %61, %cst_26 {dimension_numbers = #tpu.dot_dimension_numbers<[1], [0], [0], [1], [0, 0, 1, 1], [], []>} : vector<34x8xf32>, vector<8x32xf32>, vector<34x32xf32> -> vector<34x32xf32>
    %63 = vector.extract_strided_slice %42 {offsets = [0, 8], sizes = [34, 8], strides = [1, 1]} : vector<34x96xf32> to vector<34x8xf32>
    %64 = vector.extract_strided_slice %42 {offsets = [0, 40], sizes = [34, 8], strides = [1, 1]} : vector<34x96xf32> to vector<34x8xf32>
    %65 = vector.extract_strided_slice %42 {offsets = [0, 72], sizes = [34, 8], strides = [1, 1]} : vector<34x96xf32> to vector<34x8xf32>
    %cst_27 = arith.constant dense<0.000000e+00> : vector<34x34xf32>
    %66 = tpu.matmul %63, %64, %cst_27 {dimension_numbers = #tpu.dot_dimension_numbers<[1], [1], [0], [0], [0, 0, 1, 0], [], []>} : vector<34x8xf32>, vector<34x8xf32>, vector<34x34xf32> -> vector<34x34xf32>
    %67 = arith.addf %66, %5 : vector<34x34xf32>
    %cst_28 = arith.constant dense<0xFF800000> : vector<34xf32>
    %68 = vector.multi_reduction <maximumf>, %67, %cst_28 [1] : vector<34x34xf32> to vector<34xf32>
    %69 = vector.shape_cast %68 : vector<34xf32> to vector<34x1xf32>
    %70 = vector.broadcast %69 : vector<34x1xf32> to vector<34x34xf32>
    %71 = arith.subf %67, %70 : vector<34x34xf32>
    %72 = math.exp %71 : vector<34x34xf32>
    %cst_29 = arith.constant dense<0.000000e+00> : vector<34xf32>
    %73 = vector.multi_reduction <add>, %72, %cst_29 [1] : vector<34x34xf32> to vector<34xf32>
    %74 = vector.shape_cast %73 : vector<34xf32> to vector<34x1xf32>
    %75 = tpu.reciprocal %74 {approx = true} : vector<34x1xf32> -> vector<34x1xf32>
    %76 = vector.broadcast %75 : vector<34x1xf32> to vector<34x34xf32>
    %77 = arith.mulf %72, %76 : vector<34x34xf32>
    %cst_30 = arith.constant dense<0.000000e+00> : vector<34x8xf32>
    %78 = tpu.matmul %77, %65, %cst_30 {dimension_numbers = #tpu.dot_dimension_numbers<[1], [0], [0], [1], [0, 0, 1, 1], [], []>} : vector<34x34xf32>, vector<34x8xf32>, vector<34x8xf32> -> vector<34x8xf32>
    %79 = vector.extract_strided_slice %44 {offsets = [8, 0], sizes = [8, 32], strides = [1, 1]} : vector<32x32xf32> to vector<8x32xf32>
    %cst_31 = arith.constant dense<0.000000e+00> : vector<34x32xf32>
    %80 = tpu.matmul %78, %79, %cst_31 {dimension_numbers = #tpu.dot_dimension_numbers<[1], [0], [0], [1], [0, 0, 1, 1], [], []>} : vector<34x8xf32>, vector<8x32xf32>, vector<34x32xf32> -> vector<34x32xf32>
    %81 = arith.addf %62, %80 : vector<34x32xf32>
    %82 = vector.extract_strided_slice %42 {offsets = [0, 16], sizes = [34, 8], strides = [1, 1]} : vector<34x96xf32> to vector<34x8xf32>
    %83 = vector.extract_strided_slice %42 {offsets = [0, 48], sizes = [34, 8], strides = [1, 1]} : vector<34x96xf32> to vector<34x8xf32>
    %84 = vector.extract_strided_slice %42 {offsets = [0, 80], sizes = [34, 8], strides = [1, 1]} : vector<34x96xf32> to vector<34x8xf32>
    %cst_32 = arith.constant dense<0.000000e+00> : vector<34x34xf32>
    %85 = tpu.matmul %82, %83, %cst_32 {dimension_numbers = #tpu.dot_dimension_numbers<[1], [1], [0], [0], [0, 0, 1, 0], [], []>} : vector<34x8xf32>, vector<34x8xf32>, vector<34x34xf32> -> vector<34x34xf32>
    %86 = arith.addf %85, %5 : vector<34x34xf32>
    %cst_33 = arith.constant dense<0xFF800000> : vector<34xf32>
    %87 = vector.multi_reduction <maximumf>, %86, %cst_33 [1] : vector<34x34xf32> to vector<34xf32>
    %88 = vector.shape_cast %87 : vector<34xf32> to vector<34x1xf32>
    %89 = vector.broadcast %88 : vector<34x1xf32> to vector<34x34xf32>
    %90 = arith.subf %86, %89 : vector<34x34xf32>
    %91 = math.exp %90 : vector<34x34xf32>
    %cst_34 = arith.constant dense<0.000000e+00> : vector<34xf32>
    %92 = vector.multi_reduction <add>, %91, %cst_34 [1] : vector<34x34xf32> to vector<34xf32>
    %93 = vector.shape_cast %92 : vector<34xf32> to vector<34x1xf32>
    %94 = tpu.reciprocal %93 {approx = true} : vector<34x1xf32> -> vector<34x1xf32>
    %95 = vector.broadcast %94 : vector<34x1xf32> to vector<34x34xf32>
    %96 = arith.mulf %91, %95 : vector<34x34xf32>
    %cst_35 = arith.constant dense<0.000000e+00> : vector<34x8xf32>
    %97 = tpu.matmul %96, %84, %cst_35 {dimension_numbers = #tpu.dot_dimension_numbers<[1], [0], [0], [1], [0, 0, 1, 1], [], []>} : vector<34x34xf32>, vector<34x8xf32>, vector<34x8xf32> -> vector<34x8xf32>
    %98 = vector.extract_strided_slice %44 {offsets = [16, 0], sizes = [8, 32], strides = [1, 1]} : vector<32x32xf32> to vector<8x32xf32>
    %cst_36 = arith.constant dense<0.000000e+00> : vector<34x32xf32>
    %99 = tpu.matmul %97, %98, %cst_36 {dimension_numbers = #tpu.dot_dimension_numbers<[1], [0], [0], [1], [0, 0, 1, 1], [], []>} : vector<34x8xf32>, vector<8x32xf32>, vector<34x32xf32> -> vector<34x32xf32>
    %100 = arith.addf %81, %99 : vector<34x32xf32>
    %101 = vector.extract_strided_slice %42 {offsets = [0, 24], sizes = [34, 8], strides = [1, 1]} : vector<34x96xf32> to vector<34x8xf32>
    %102 = vector.extract_strided_slice %42 {offsets = [0, 56], sizes = [34, 8], strides = [1, 1]} : vector<34x96xf32> to vector<34x8xf32>
    %103 = vector.extract_strided_slice %42 {offsets = [0, 88], sizes = [34, 8], strides = [1, 1]} : vector<34x96xf32> to vector<34x8xf32>
    %cst_37 = arith.constant dense<0.000000e+00> : vector<34x34xf32>
    %104 = tpu.matmul %101, %102, %cst_37 {dimension_numbers = #tpu.dot_dimension_numbers<[1], [1], [0], [0], [0, 0, 1, 0], [], []>} : vector<34x8xf32>, vector<34x8xf32>, vector<34x34xf32> -> vector<34x34xf32>
    %105 = arith.addf %104, %5 : vector<34x34xf32>
    %cst_38 = arith.constant dense<0xFF800000> : vector<34xf32>
    %106 = vector.multi_reduction <maximumf>, %105, %cst_38 [1] : vector<34x34xf32> to vector<34xf32>
    %107 = vector.shape_cast %106 : vector<34xf32> to vector<34x1xf32>
    %108 = vector.broadcast %107 : vector<34x1xf32> to vector<34x34xf32>
    %109 = arith.subf %105, %108 : vector<34x34xf32>
    %110 = math.exp %109 : vector<34x34xf32>
    %cst_39 = arith.constant dense<0.000000e+00> : vector<34xf32>
    %111 = vector.multi_reduction <add>, %110, %cst_39 [1] : vector<34x34xf32> to vector<34xf32>
    %112 = vector.shape_cast %111 : vector<34xf32> to vector<34x1xf32>
    %113 = tpu.reciprocal %112 {approx = true} : vector<34x1xf32> -> vector<34x1xf32>
    %114 = vector.broadcast %113 : vector<34x1xf32> to vector<34x34xf32>
    %115 = arith.mulf %110, %114 : vector<34x34xf32>
    %cst_40 = arith.constant dense<0.000000e+00> : vector<34x8xf32>
    %116 = tpu.matmul %115, %103, %cst_40 {dimension_numbers = #tpu.dot_dimension_numbers<[1], [0], [0], [1], [0, 0, 1, 1], [], []>} : vector<34x34xf32>, vector<34x8xf32>, vector<34x8xf32> -> vector<34x8xf32>
    %117 = vector.extract_strided_slice %44 {offsets = [24, 0], sizes = [8, 32], strides = [1, 1]} : vector<32x32xf32> to vector<8x32xf32>
    %cst_41 = arith.constant dense<0.000000e+00> : vector<34x32xf32>
    %118 = tpu.matmul %116, %117, %cst_41 {dimension_numbers = #tpu.dot_dimension_numbers<[1], [0], [0], [1], [0, 0, 1, 1], [], []>} : vector<34x8xf32>, vector<8x32xf32>, vector<34x32xf32> -> vector<34x32xf32>
    %119 = arith.addf %100, %118 : vector<34x32xf32>
    %120 = arith.addf %4, %119 : vector<34x32xf32>
    %121 = vector.broadcast %11 : vector<1x32xf32> to vector<34x32xf32>
    %122 = arith.addf %120, %121 : vector<34x32xf32>
    %cst_42 = arith.constant dense<0.000000e+00> : vector<34xf32>
    %123 = vector.multi_reduction <add>, %122, %cst_42 [1] : vector<34x32xf32> to vector<34xf32>
    %124 = vector.shape_cast %123 : vector<34xf32> to vector<34x1xf32>
    %cst_43 = arith.constant 3.200000e+01 : f32
    %125 = vector.broadcast %cst_43 : f32 to vector<34x1xf32>
    %126 = arith.divf %124, %125 : vector<34x1xf32>
    %127 = vector.broadcast %126 : vector<34x1xf32> to vector<34x32xf32>
    %128 = arith.subf %122, %127 : vector<34x32xf32>
    %129 = arith.mulf %128, %128 : vector<34x32xf32>
    %cst_44 = arith.constant dense<0.000000e+00> : vector<34xf32>
    %130 = vector.multi_reduction <add>, %129, %cst_44 [1] : vector<34x32xf32> to vector<34xf32>
    %131 = vector.shape_cast %130 : vector<34xf32> to vector<34x1xf32>
    %cst_45 = arith.constant 3.200000e+01 : f32
    %132 = vector.broadcast %cst_45 : f32 to vector<34x1xf32>
    %133 = arith.divf %131, %132 : vector<34x1xf32>
    %134 = vector.broadcast %126 : vector<34x1xf32> to vector<34x32xf32>
    %135 = arith.subf %122, %134 : vector<34x32xf32>
    %cst_46 = arith.constant 9.99999974E-6 : f32
    %136 = vector.broadcast %cst_46 : f32 to vector<34x1xf32>
    %137 = arith.addf %133, %136 : vector<34x1xf32>
    %138 = math.rsqrt %137 : vector<34x1xf32>
    %139 = vector.broadcast %138 : vector<34x1xf32> to vector<34x32xf32>
    %140 = arith.mulf %135, %139 : vector<34x32xf32>
    %141 = vector.broadcast %12 : vector<1x32xf32> to vector<34x32xf32>
    %142 = arith.mulf %140, %141 : vector<34x32xf32>
    %143 = vector.broadcast %13 : vector<1x32xf32> to vector<34x32xf32>
    %144 = arith.addf %142, %143 : vector<34x32xf32>
    %c0_47 = arith.constant 0 : index
    %c0_48 = arith.constant 0 : index
    %c0_49 = arith.constant 0 : index
    %145 = vector.load %arg6[%c0_47, %c0_48, %c0_49] : memref<2x32x64xf32, #tpu.memory_space<vmem>>, vector<1x32x64xf32>
    %146 = vector.shape_cast %145 : vector<1x32x64xf32> to vector<32x64xf32>
    %cst_50 = arith.constant dense<0.000000e+00> : vector<34x64xf32>
    %147 = tpu.matmul %144, %146, %cst_50 {dimension_numbers = #tpu.dot_dimension_numbers<[1], [0], [0], [1], [0, 0, 1, 1], [], []>} : vector<34x32xf32>, vector<32x64xf32>, vector<34x64xf32> -> vector<34x64xf32>
    %148 = vector.broadcast %14 : vector<1x64xf32> to vector<34x64xf32>
    %149 = arith.addf %147, %148 : vector<34x64xf32>
    %cst_51 = arith.constant 5.000000e-01 : f32
    %150 = vector.broadcast %cst_51 : f32 to vector<34x64xf32>
    %151 = arith.mulf %150, %149 : vector<34x64xf32>
    %152 = arith.mulf %149, %149 : vector<34x64xf32>
    %153 = arith.mulf %149, %152 : vector<34x64xf32>
    %cst_52 = arith.constant 4.471500e-02 : f32
    %154 = vector.broadcast %cst_52 : f32 to vector<34x64xf32>
    %155 = arith.mulf %154, %153 : vector<34x64xf32>
    %156 = arith.addf %149, %155 : vector<34x64xf32>
    %cst_53 = arith.constant 0.797884583 : f32
    %157 = vector.broadcast %cst_53 : f32 to vector<34x64xf32>
    %158 = arith.mulf %157, %156 : vector<34x64xf32>
    %159 = math.tanh %158 : vector<34x64xf32>
    %cst_54 = arith.constant 1.000000e+00 : f32
    %160 = vector.broadcast %cst_54 : f32 to vector<34x64xf32>
    %161 = arith.addf %160, %159 : vector<34x64xf32>
    %162 = arith.mulf %151, %161 : vector<34x64xf32>
    %c0_55 = arith.constant 0 : index
    %c0_56 = arith.constant 0 : index
    %c0_57 = arith.constant 0 : index
    %163 = vector.load %arg7[%c0_55, %c0_56, %c0_57] : memref<2x64x32xf32, #tpu.memory_space<vmem>>, vector<1x64x32xf32>
    %164 = vector.shape_cast %163 : vector<1x64x32xf32> to vector<64x32xf32>
    %cst_58 = arith.constant dense<0.000000e+00> : vector<34x32xf32>
    %165 = tpu.matmul %162, %164, %cst_58 {dimension_numbers = #tpu.dot_dimension_numbers<[1], [0], [0], [1], [0, 0, 1, 1], [], []>} : vector<34x64xf32>, vector<64x32xf32>, vector<34x32xf32> -> vector<34x32xf32>
    %166 = arith.addf %122, %165 : vector<34x32xf32>
    %167 = vector.broadcast %15 : vector<1x32xf32> to vector<34x32xf32>
    %168 = arith.addf %166, %167 : vector<34x32xf32>
    %c1 = arith.constant 1 : index
    %c0_59 = arith.constant 0 : index
    %c0_60 = arith.constant 0 : index
    %169 = vector.load %arg8[%c1, %c0_59, %c0_60] : memref<2x8x128xf32, #tpu.memory_space<vmem>>, vector<1x8x128xf32>
    %170 = vector.shape_cast %169 : vector<1x8x128xf32> to vector<8x128xf32>
    %171 = vector.extract_strided_slice %170 {offsets = [0, 0], sizes = [1, 32], strides = [1, 1]} : vector<8x128xf32> to vector<1x32xf32>
    %172 = vector.extract_strided_slice %170 {offsets = [1, 0], sizes = [1, 32], strides = [1, 1]} : vector<8x128xf32> to vector<1x32xf32>
    %173 = vector.extract_strided_slice %170 {offsets = [2, 0], sizes = [1, 96], strides = [1, 1]} : vector<8x128xf32> to vector<1x96xf32>
    %174 = vector.extract_strided_slice %170 {offsets = [3, 0], sizes = [1, 32], strides = [1, 1]} : vector<8x128xf32> to vector<1x32xf32>
    %175 = vector.extract_strided_slice %170 {offsets = [4, 0], sizes = [1, 32], strides = [1, 1]} : vector<8x128xf32> to vector<1x32xf32>
    %176 = vector.extract_strided_slice %170 {offsets = [5, 0], sizes = [1, 32], strides = [1, 1]} : vector<8x128xf32> to vector<1x32xf32>
    %177 = vector.extract_strided_slice %170 {offsets = [6, 0], sizes = [1, 64], strides = [1, 1]} : vector<8x128xf32> to vector<1x64xf32>
    %178 = vector.extract_strided_slice %170 {offsets = [7, 0], sizes = [1, 32], strides = [1, 1]} : vector<8x128xf32> to vector<1x32xf32>
    %cst_61 = arith.constant dense<0.000000e+00> : vector<34xf32>
    %179 = vector.multi_reduction <add>, %168, %cst_61 [1] : vector<34x32xf32> to vector<34xf32>
    %180 = vector.shape_cast %179 : vector<34xf32> to vector<34x1xf32>
    %cst_62 = arith.constant 3.200000e+01 : f32
    %181 = vector.broadcast %cst_62 : f32 to vector<34x1xf32>
    %182 = arith.divf %180, %181 : vector<34x1xf32>
    %183 = vector.broadcast %182 : vector<34x1xf32> to vector<34x32xf32>
    %184 = arith.subf %168, %183 : vector<34x32xf32>
    %185 = arith.mulf %184, %184 : vector<34x32xf32>
    %cst_63 = arith.constant dense<0.000000e+00> : vector<34xf32>
    %186 = vector.multi_reduction <add>, %185, %cst_63 [1] : vector<34x32xf32> to vector<34xf32>
    %187 = vector.shape_cast %186 : vector<34xf32> to vector<34x1xf32>
    %cst_64 = arith.constant 3.200000e+01 : f32
    %188 = vector.broadcast %cst_64 : f32 to vector<34x1xf32>
    %189 = arith.divf %187, %188 : vector<34x1xf32>
    %190 = vector.broadcast %182 : vector<34x1xf32> to vector<34x32xf32>
    %191 = arith.subf %168, %190 : vector<34x32xf32>
    %cst_65 = arith.constant 9.99999974E-6 : f32
    %192 = vector.broadcast %cst_65 : f32 to vector<34x1xf32>
    %193 = arith.addf %189, %192 : vector<34x1xf32>
    %194 = math.rsqrt %193 : vector<34x1xf32>
    %195 = vector.broadcast %194 : vector<34x1xf32> to vector<34x32xf32>
    %196 = arith.mulf %191, %195 : vector<34x32xf32>
    %197 = vector.broadcast %171 : vector<1x32xf32> to vector<34x32xf32>
    %198 = arith.mulf %196, %197 : vector<34x32xf32>
    %199 = vector.broadcast %172 : vector<1x32xf32> to vector<34x32xf32>
    %200 = arith.addf %198, %199 : vector<34x32xf32>
    %c1_66 = arith.constant 1 : index
    %c0_67 = arith.constant 0 : index
    %c0_68 = arith.constant 0 : index
    %201 = vector.load %arg4[%c1_66, %c0_67, %c0_68] : memref<2x32x96xf32, #tpu.memory_space<vmem>>, vector<1x32x96xf32>
    %202 = vector.shape_cast %201 : vector<1x32x96xf32> to vector<32x96xf32>
    %cst_69 = arith.constant dense<0.000000e+00> : vector<34x96xf32>
    %203 = tpu.matmul %200, %202, %cst_69 {dimension_numbers = #tpu.dot_dimension_numbers<[1], [0], [0], [1], [0, 0, 1, 1], [], []>} : vector<34x32xf32>, vector<32x96xf32>, vector<34x96xf32> -> vector<34x96xf32>
    %204 = vector.broadcast %173 : vector<1x96xf32> to vector<34x96xf32>
    %205 = arith.addf %203, %204 : vector<34x96xf32>
    %c1_70 = arith.constant 1 : index
    %c0_71 = arith.constant 0 : index
    %c0_72 = arith.constant 0 : index
    %206 = vector.load %arg5[%c1_70, %c0_71, %c0_72] : memref<2x32x32xf32, #tpu.memory_space<vmem>>, vector<1x32x32xf32>
    %207 = vector.shape_cast %206 : vector<1x32x32xf32> to vector<32x32xf32>
    %208 = vector.extract_strided_slice %205 {offsets = [0, 0], sizes = [34, 8], strides = [1, 1]} : vector<34x96xf32> to vector<34x8xf32>
    %209 = vector.extract_strided_slice %205 {offsets = [0, 32], sizes = [34, 8], strides = [1, 1]} : vector<34x96xf32> to vector<34x8xf32>
    %210 = vector.extract_strided_slice %205 {offsets = [0, 64], sizes = [34, 8], strides = [1, 1]} : vector<34x96xf32> to vector<34x8xf32>
    %cst_73 = arith.constant dense<0.000000e+00> : vector<34x34xf32>
    %211 = tpu.matmul %208, %209, %cst_73 {dimension_numbers = #tpu.dot_dimension_numbers<[1], [1], [0], [0], [0, 0, 1, 0], [], []>} : vector<34x8xf32>, vector<34x8xf32>, vector<34x34xf32> -> vector<34x34xf32>
    %212 = arith.addf %211, %5 : vector<34x34xf32>
    %cst_74 = arith.constant dense<0xFF800000> : vector<34xf32>
    %213 = vector.multi_reduction <maximumf>, %212, %cst_74 [1] : vector<34x34xf32> to vector<34xf32>
    %214 = vector.shape_cast %213 : vector<34xf32> to vector<34x1xf32>
    %215 = vector.broadcast %214 : vector<34x1xf32> to vector<34x34xf32>
    %216 = arith.subf %212, %215 : vector<34x34xf32>
    %217 = math.exp %216 : vector<34x34xf32>
    %cst_75 = arith.constant dense<0.000000e+00> : vector<34xf32>
    %218 = vector.multi_reduction <add>, %217, %cst_75 [1] : vector<34x34xf32> to vector<34xf32>
    %219 = vector.shape_cast %218 : vector<34xf32> to vector<34x1xf32>
    %220 = tpu.reciprocal %219 {approx = true} : vector<34x1xf32> -> vector<34x1xf32>
    %221 = vector.broadcast %220 : vector<34x1xf32> to vector<34x34xf32>
    %222 = arith.mulf %217, %221 : vector<34x34xf32>
    %cst_76 = arith.constant dense<0.000000e+00> : vector<34x8xf32>
    %223 = tpu.matmul %222, %210, %cst_76 {dimension_numbers = #tpu.dot_dimension_numbers<[1], [0], [0], [1], [0, 0, 1, 1], [], []>} : vector<34x34xf32>, vector<34x8xf32>, vector<34x8xf32> -> vector<34x8xf32>
    %224 = vector.extract_strided_slice %207 {offsets = [0, 0], sizes = [8, 32], strides = [1, 1]} : vector<32x32xf32> to vector<8x32xf32>
    %cst_77 = arith.constant dense<0.000000e+00> : vector<34x32xf32>
    %225 = tpu.matmul %223, %224, %cst_77 {dimension_numbers = #tpu.dot_dimension_numbers<[1], [0], [0], [1], [0, 0, 1, 1], [], []>} : vector<34x8xf32>, vector<8x32xf32>, vector<34x32xf32> -> vector<34x32xf32>
    %226 = vector.extract_strided_slice %205 {offsets = [0, 8], sizes = [34, 8], strides = [1, 1]} : vector<34x96xf32> to vector<34x8xf32>
    %227 = vector.extract_strided_slice %205 {offsets = [0, 40], sizes = [34, 8], strides = [1, 1]} : vector<34x96xf32> to vector<34x8xf32>
    %228 = vector.extract_strided_slice %205 {offsets = [0, 72], sizes = [34, 8], strides = [1, 1]} : vector<34x96xf32> to vector<34x8xf32>
    %cst_78 = arith.constant dense<0.000000e+00> : vector<34x34xf32>
    %229 = tpu.matmul %226, %227, %cst_78 {dimension_numbers = #tpu.dot_dimension_numbers<[1], [1], [0], [0], [0, 0, 1, 0], [], []>} : vector<34x8xf32>, vector<34x8xf32>, vector<34x34xf32> -> vector<34x34xf32>
    %230 = arith.addf %229, %5 : vector<34x34xf32>
    %cst_79 = arith.constant dense<0xFF800000> : vector<34xf32>
    %231 = vector.multi_reduction <maximumf>, %230, %cst_79 [1] : vector<34x34xf32> to vector<34xf32>
    %232 = vector.shape_cast %231 : vector<34xf32> to vector<34x1xf32>
    %233 = vector.broadcast %232 : vector<34x1xf32> to vector<34x34xf32>
    %234 = arith.subf %230, %233 : vector<34x34xf32>
    %235 = math.exp %234 : vector<34x34xf32>
    %cst_80 = arith.constant dense<0.000000e+00> : vector<34xf32>
    %236 = vector.multi_reduction <add>, %235, %cst_80 [1] : vector<34x34xf32> to vector<34xf32>
    %237 = vector.shape_cast %236 : vector<34xf32> to vector<34x1xf32>
    %238 = tpu.reciprocal %237 {approx = true} : vector<34x1xf32> -> vector<34x1xf32>
    %239 = vector.broadcast %238 : vector<34x1xf32> to vector<34x34xf32>
    %240 = arith.mulf %235, %239 : vector<34x34xf32>
    %cst_81 = arith.constant dense<0.000000e+00> : vector<34x8xf32>
    %241 = tpu.matmul %240, %228, %cst_81 {dimension_numbers = #tpu.dot_dimension_numbers<[1], [0], [0], [1], [0, 0, 1, 1], [], []>} : vector<34x34xf32>, vector<34x8xf32>, vector<34x8xf32> -> vector<34x8xf32>
    %242 = vector.extract_strided_slice %207 {offsets = [8, 0], sizes = [8, 32], strides = [1, 1]} : vector<32x32xf32> to vector<8x32xf32>
    %cst_82 = arith.constant dense<0.000000e+00> : vector<34x32xf32>
    %243 = tpu.matmul %241, %242, %cst_82 {dimension_numbers = #tpu.dot_dimension_numbers<[1], [0], [0], [1], [0, 0, 1, 1], [], []>} : vector<34x8xf32>, vector<8x32xf32>, vector<34x32xf32> -> vector<34x32xf32>
    %244 = arith.addf %225, %243 : vector<34x32xf32>
    %245 = vector.extract_strided_slice %205 {offsets = [0, 16], sizes = [34, 8], strides = [1, 1]} : vector<34x96xf32> to vector<34x8xf32>
    %246 = vector.extract_strided_slice %205 {offsets = [0, 48], sizes = [34, 8], strides = [1, 1]} : vector<34x96xf32> to vector<34x8xf32>
    %247 = vector.extract_strided_slice %205 {offsets = [0, 80], sizes = [34, 8], strides = [1, 1]} : vector<34x96xf32> to vector<34x8xf32>
    %cst_83 = arith.constant dense<0.000000e+00> : vector<34x34xf32>
    %248 = tpu.matmul %245, %246, %cst_83 {dimension_numbers = #tpu.dot_dimension_numbers<[1], [1], [0], [0], [0, 0, 1, 0], [], []>} : vector<34x8xf32>, vector<34x8xf32>, vector<34x34xf32> -> vector<34x34xf32>
    %249 = arith.addf %248, %5 : vector<34x34xf32>
    %cst_84 = arith.constant dense<0xFF800000> : vector<34xf32>
    %250 = vector.multi_reduction <maximumf>, %249, %cst_84 [1] : vector<34x34xf32> to vector<34xf32>
    %251 = vector.shape_cast %250 : vector<34xf32> to vector<34x1xf32>
    %252 = vector.broadcast %251 : vector<34x1xf32> to vector<34x34xf32>
    %253 = arith.subf %249, %252 : vector<34x34xf32>
    %254 = math.exp %253 : vector<34x34xf32>
    %cst_85 = arith.constant dense<0.000000e+00> : vector<34xf32>
    %255 = vector.multi_reduction <add>, %254, %cst_85 [1] : vector<34x34xf32> to vector<34xf32>
    %256 = vector.shape_cast %255 : vector<34xf32> to vector<34x1xf32>
    %257 = tpu.reciprocal %256 {approx = true} : vector<34x1xf32> -> vector<34x1xf32>
    %258 = vector.broadcast %257 : vector<34x1xf32> to vector<34x34xf32>
    %259 = arith.mulf %254, %258 : vector<34x34xf32>
    %cst_86 = arith.constant dense<0.000000e+00> : vector<34x8xf32>
    %260 = tpu.matmul %259, %247, %cst_86 {dimension_numbers = #tpu.dot_dimension_numbers<[1], [0], [0], [1], [0, 0, 1, 1], [], []>} : vector<34x34xf32>, vector<34x8xf32>, vector<34x8xf32> -> vector<34x8xf32>
    %261 = vector.extract_strided_slice %207 {offsets = [16, 0], sizes = [8, 32], strides = [1, 1]} : vector<32x32xf32> to vector<8x32xf32>
    %cst_87 = arith.constant dense<0.000000e+00> : vector<34x32xf32>
    %262 = tpu.matmul %260, %261, %cst_87 {dimension_numbers = #tpu.dot_dimension_numbers<[1], [0], [0], [1], [0, 0, 1, 1], [], []>} : vector<34x8xf32>, vector<8x32xf32>, vector<34x32xf32> -> vector<34x32xf32>
    %263 = arith.addf %244, %262 : vector<34x32xf32>
    %264 = vector.extract_strided_slice %205 {offsets = [0, 24], sizes = [34, 8], strides = [1, 1]} : vector<34x96xf32> to vector<34x8xf32>
    %265 = vector.extract_strided_slice %205 {offsets = [0, 56], sizes = [34, 8], strides = [1, 1]} : vector<34x96xf32> to vector<34x8xf32>
    %266 = vector.extract_strided_slice %205 {offsets = [0, 88], sizes = [34, 8], strides = [1, 1]} : vector<34x96xf32> to vector<34x8xf32>
    %cst_88 = arith.constant dense<0.000000e+00> : vector<34x34xf32>
    %267 = tpu.matmul %264, %265, %cst_88 {dimension_numbers = #tpu.dot_dimension_numbers<[1], [1], [0], [0], [0, 0, 1, 0], [], []>} : vector<34x8xf32>, vector<34x8xf32>, vector<34x34xf32> -> vector<34x34xf32>
    %268 = arith.addf %267, %5 : vector<34x34xf32>
    %cst_89 = arith.constant dense<0xFF800000> : vector<34xf32>
    %269 = vector.multi_reduction <maximumf>, %268, %cst_89 [1] : vector<34x34xf32> to vector<34xf32>
    %270 = vector.shape_cast %269 : vector<34xf32> to vector<34x1xf32>
    %271 = vector.broadcast %270 : vector<34x1xf32> to vector<34x34xf32>
    %272 = arith.subf %268, %271 : vector<34x34xf32>
    %273 = math.exp %272 : vector<34x34xf32>
    %cst_90 = arith.constant dense<0.000000e+00> : vector<34xf32>
    %274 = vector.multi_reduction <add>, %273, %cst_90 [1] : vector<34x34xf32> to vector<34xf32>
    %275 = vector.shape_cast %274 : vector<34xf32> to vector<34x1xf32>
    %276 = tpu.reciprocal %275 {approx = true} : vector<34x1xf32> -> vector<34x1xf32>
    %277 = vector.broadcast %276 : vector<34x1xf32> to vector<34x34xf32>
    %278 = arith.mulf %273, %277 : vector<34x34xf32>
    %cst_91 = arith.constant dense<0.000000e+00> : vector<34x8xf32>
    %279 = tpu.matmul %278, %266, %cst_91 {dimension_numbers = #tpu.dot_dimension_numbers<[1], [0], [0], [1], [0, 0, 1, 1], [], []>} : vector<34x34xf32>, vector<34x8xf32>, vector<34x8xf32> -> vector<34x8xf32>
    %280 = vector.extract_strided_slice %207 {offsets = [24, 0], sizes = [8, 32], strides = [1, 1]} : vector<32x32xf32> to vector<8x32xf32>
    %cst_92 = arith.constant dense<0.000000e+00> : vector<34x32xf32>
    %281 = tpu.matmul %279, %280, %cst_92 {dimension_numbers = #tpu.dot_dimension_numbers<[1], [0], [0], [1], [0, 0, 1, 1], [], []>} : vector<34x8xf32>, vector<8x32xf32>, vector<34x32xf32> -> vector<34x32xf32>
    %282 = arith.addf %263, %281 : vector<34x32xf32>
    %283 = arith.addf %168, %282 : vector<34x32xf32>
    %284 = vector.broadcast %174 : vector<1x32xf32> to vector<34x32xf32>
    %285 = arith.addf %283, %284 : vector<34x32xf32>
    %cst_93 = arith.constant dense<0.000000e+00> : vector<34xf32>
    %286 = vector.multi_reduction <add>, %285, %cst_93 [1] : vector<34x32xf32> to vector<34xf32>
    %287 = vector.shape_cast %286 : vector<34xf32> to vector<34x1xf32>
    %cst_94 = arith.constant 3.200000e+01 : f32
    %288 = vector.broadcast %cst_94 : f32 to vector<34x1xf32>
    %289 = arith.divf %287, %288 : vector<34x1xf32>
    %290 = vector.broadcast %289 : vector<34x1xf32> to vector<34x32xf32>
    %291 = arith.subf %285, %290 : vector<34x32xf32>
    %292 = arith.mulf %291, %291 : vector<34x32xf32>
    %cst_95 = arith.constant dense<0.000000e+00> : vector<34xf32>
    %293 = vector.multi_reduction <add>, %292, %cst_95 [1] : vector<34x32xf32> to vector<34xf32>
    %294 = vector.shape_cast %293 : vector<34xf32> to vector<34x1xf32>
    %cst_96 = arith.constant 3.200000e+01 : f32
    %295 = vector.broadcast %cst_96 : f32 to vector<34x1xf32>
    %296 = arith.divf %294, %295 : vector<34x1xf32>
    %297 = vector.broadcast %289 : vector<34x1xf32> to vector<34x32xf32>
    %298 = arith.subf %285, %297 : vector<34x32xf32>
    %cst_97 = arith.constant 9.99999974E-6 : f32
    %299 = vector.broadcast %cst_97 : f32 to vector<34x1xf32>
    %300 = arith.addf %296, %299 : vector<34x1xf32>
    %301 = math.rsqrt %300 : vector<34x1xf32>
    %302 = vector.broadcast %301 : vector<34x1xf32> to vector<34x32xf32>
    %303 = arith.mulf %298, %302 : vector<34x32xf32>
    %304 = vector.broadcast %175 : vector<1x32xf32> to vector<34x32xf32>
    %305 = arith.mulf %303, %304 : vector<34x32xf32>
    %306 = vector.broadcast %176 : vector<1x32xf32> to vector<34x32xf32>
    %307 = arith.addf %305, %306 : vector<34x32xf32>
    %c1_98 = arith.constant 1 : index
    %c0_99 = arith.constant 0 : index
    %c0_100 = arith.constant 0 : index
    %308 = vector.load %arg6[%c1_98, %c0_99, %c0_100] : memref<2x32x64xf32, #tpu.memory_space<vmem>>, vector<1x32x64xf32>
    %309 = vector.shape_cast %308 : vector<1x32x64xf32> to vector<32x64xf32>
    %cst_101 = arith.constant dense<0.000000e+00> : vector<34x64xf32>
    %310 = tpu.matmul %307, %309, %cst_101 {dimension_numbers = #tpu.dot_dimension_numbers<[1], [0], [0], [1], [0, 0, 1, 1], [], []>} : vector<34x32xf32>, vector<32x64xf32>, vector<34x64xf32> -> vector<34x64xf32>
    %311 = vector.broadcast %177 : vector<1x64xf32> to vector<34x64xf32>
    %312 = arith.addf %310, %311 : vector<34x64xf32>
    %cst_102 = arith.constant 5.000000e-01 : f32
    %313 = vector.broadcast %cst_102 : f32 to vector<34x64xf32>
    %314 = arith.mulf %313, %312 : vector<34x64xf32>
    %315 = arith.mulf %312, %312 : vector<34x64xf32>
    %316 = arith.mulf %312, %315 : vector<34x64xf32>
    %cst_103 = arith.constant 4.471500e-02 : f32
    %317 = vector.broadcast %cst_103 : f32 to vector<34x64xf32>
    %318 = arith.mulf %317, %316 : vector<34x64xf32>
    %319 = arith.addf %312, %318 : vector<34x64xf32>
    %cst_104 = arith.constant 0.797884583 : f32
    %320 = vector.broadcast %cst_104 : f32 to vector<34x64xf32>
    %321 = arith.mulf %320, %319 : vector<34x64xf32>
    %322 = math.tanh %321 : vector<34x64xf32>
    %cst_105 = arith.constant 1.000000e+00 : f32
    %323 = vector.broadcast %cst_105 : f32 to vector<34x64xf32>
    %324 = arith.addf %323, %322 : vector<34x64xf32>
    %325 = arith.mulf %314, %324 : vector<34x64xf32>
    %c1_106 = arith.constant 1 : index
    %c0_107 = arith.constant 0 : index
    %c0_108 = arith.constant 0 : index
    %326 = vector.load %arg7[%c1_106, %c0_107, %c0_108] : memref<2x64x32xf32, #tpu.memory_space<vmem>>, vector<1x64x32xf32>
    %327 = vector.shape_cast %326 : vector<1x64x32xf32> to vector<64x32xf32>
    %cst_109 = arith.constant dense<0.000000e+00> : vector<34x32xf32>
    %328 = tpu.matmul %325, %327, %cst_109 {dimension_numbers = #tpu.dot_dimension_numbers<[1], [0], [0], [1], [0, 0, 1, 1], [], []>} : vector<34x64xf32>, vector<64x32xf32>, vector<34x32xf32> -> vector<34x32xf32>
    %329 = arith.addf %285, %328 : vector<34x32xf32>
    %330 = vector.broadcast %178 : vector<1x32xf32> to vector<34x32xf32>
    %331 = arith.addf %329, %330 : vector<34x32xf32>
    %c0_110 = arith.constant 0 : index
    %c0_111 = arith.constant 0 : index
    %332 = vector.load %arg9[%c0_110, %c0_111] : memref<33x128xf32, #tpu.memory_space<vmem>>, vector<32x128xf32>
    %cst_112 = arith.constant dense<0.000000e+00> : vector<34x128xf32>
    %333 = tpu.matmul %331, %332, %cst_112 {dimension_numbers = #tpu.dot_dimension_numbers<[1], [0], [0], [1], [0, 0, 1, 1], [], []>} : vector<34x32xf32>, vector<32x128xf32>, vector<34x128xf32> -> vector<34x128xf32>
    %c32 = arith.constant 32 : index
    %c0_113 = arith.constant 0 : index
    %334 = vector.load %arg9[%c32, %c0_113] : memref<33x128xf32, #tpu.memory_space<vmem>>, vector<1x128xf32>
    %335 = vector.broadcast %334 : vector<1x128xf32> to vector<34x128xf32>
    %336 = arith.addf %333, %335 : vector<34x128xf32>
    %c0_114 = arith.constant 0 : index
    %c0_115 = arith.constant 0 : index
    %337 = vector.load %arg10[%c0_114, %c0_115] : memref<34x128xf32, #tpu.memory_space<vmem>>, vector<34x128xf32>
    tpu.vector_store %arg10[%c0_114, %c0_115], %336 {strides = array<i32>} : memref<34x128xf32, #tpu.memory_space<vmem>>, vector<34x128xf32>,
    return
  }
}

</mosaic_0001>

<bundles_post_ra>
// kernel: tile.9
= control target key start
LH: loop header
LB: loop body
LE: loop exit
PB: predicated region body
PF: predicated region fallthrough
CT: control target
= control target key end

     0   :  { %vm3_vm0 = vcmask 261120   ;;  %s11_s6 = smov 3  ;;  %s74_s0 = inlined_call_operand.vmem [shape: f32[2,17,32], index: 0, kind: input, shape index: {}]   ;;  %s75_s1 = inlined_call_operand.vmem [shape: f32[34,32], index: 1, kind: output, shape index: {}]  }
   0x1   :  { %v2_v0 = vld [vmem:[%s74_s0] sm:$0xff]   ;;  %v26_v1 = vld [vmem:[%s74_s0 + $0x8] sm:$0xff]  }
   0x2   :  { %v28_v2 = vld [vmem:[%s74_s0 + $0x10] ss:$8 sm:%s11_s6]   ;;  %4 = vst.msk [vmem:[%s75_s1] sm:$0xff] %vm3_vm0, %v2_v0   ;;  %27 = vst.msk [vmem:[%s75_s1 + $0x8] sm:$0xff] %vm3_vm0, %v26_v1  }
   0x3   :  { %29 = vst.msk [vmem:[%s75_s1 + $0x10] sm:$0x3] %vm3_vm0, %v28_v2   ;;  %v30_v3 = vld [vmem:[%s74_s0 + $0x19] sm:$0xff]   ;;  %v32_v4 = vld [vmem:[%s74_s0 + $0x21] sm:$0xff]  }
   0x4   :  { %31 = vst.msk [vmem:[%s75_s1 + $0x12] sm:$0xff] %vm3_vm0, %v30_v3   ;;  %33 = vst.msk [vmem:[%s75_s1 + $0x1a] sm:$0xff] %vm3_vm0, %v32_v4  }

// kernel: eq.8
= control target key start
LH: loop header
LB: loop body
LE: loop exit
PB: predicated region body
PF: predicated region fallthrough
CT: control target
= control target key end

     0   :  { %vm7_vm0 = vcmask 138240   ;;  %vm13_vm1 = vcmask 277640   ;;  %s39_s0 = inlined_call_operand.vmem [shape: s32[2,17], index: 0, kind: input, shape index: {}]   ;;  %s40_s1 = inlined_call_operand.vmem [shape: s32[34], index: 1, kind: output, shape index: {}]  }
   0x1   :  { %v4_v0 = vld [vmem:[%s39_s0] sm:$0x3]  ;;  %s22_s0 = smov 17  }
   0x2   :  { %5 = vst [vmem:[#allocation1] sm:$0x3] %v4_v0 }
   0x9   :  { %v10_v1 = vld [vmem:[#allocation1 + $0x1] sm:$0x1]   ;;  %v6_v2 = vld [vmem:[#allocation1] sm:$0x1]  }
   0xa   :  { %11 = vrot.lane.b32.xlu0 %v10_v1, %s22_s0  ;;  %8 = vst.msk [vmem:[#allocation0] sm:$0x1] %vm7_vm0, %v6_v2  }
  0x7c   :  { %v12_v3 = vpop.permute.xlu0 %11  }
  0x7d   :  { %14 = vst.msk [vmem:[#allocation0] sm:$0x1] %vm13_vm1, %v12_v3  }
  0x84   :  { %v18_v4 = vld [vmem:[#allocation0] sm:$0x1] }
  0x85   :  { %20 = vst [vmem:[%s40_s1] sm:$0x1] %v18_v4 }

// kernel: vit_forward.1
= control target key start
LH: loop header
LB: loop body
LE: loop exit
PB: predicated region body
PF: predicated region fallthrough
CT: control target
= control target key end

     0   :  { %v6619_v0 = vmov 0.0|0.0   ;;  %vm6620_vm0 = vmmov 0   ;;  %v6621_v4 = vmov 0.0   ;;  %vm53_vm1 = vcmask 523264   ;;  %s6622_s15 = smov 96   ;;  %s6623_s16 = smov 88   ;;  %s8303_s3 = inlined_call_operand.vmem [shape: f32[64,32], index: 3, kind: input, shape index: {}]   ;;  %s8304_s0 = inlined_call_operand.vmem [shape: f32[34,64], index: 0, kind: input, shape index: {}]   ;;  %s8305_s1 = inlined_call_operand.vmem [shape: f32[34,32], index: 1, kind: input, shape index: {}]   ;;  %s8306_s4 = inlined_call_operand.vmem [shape: f32[2,32,96], index: 4, kind: input, shape index: {}]   ;;  %s8307_s8 = inlined_call_operand.vmem [shape: f32[2,8,128], index: 8, kind: input, shape index: {}]   ;;  %s8308_s2 = inlined_call_operand.vmem [shape: f32[34,34], index: 2, kind: input, shape index: {}]   ;;  %s8309_s5 = inlined_call_operand.vmem [shape: f32[2,32,32], index: 5, kind: input, shape index: {}]   ;;  %s8310_s6 = inlined_call_operand.vmem [shape: f32[2,32,64], index: 6, kind: input, shape index: {}]   ;;  %s8311_s7 = inlined_call_operand.vmem [shape: f32[2,64,32], index: 7, kind: input, shape index: {}]   ;;  %s8312_s9 = inlined_call_operand.vmem [shape: f32[33,128], index: 9, kind: input, shape index: {}]   ;;  %s8313_s10 = inlined_call_operand.vmem [shape: f32[34,128], index: 10, kind: output, shape index: {}]  }
   0x1   :  { %6029 = vmatprep.subr.bf16.mxu0 %v6619_v0  ;;  %v40_v1 = vld [vmem:[%s8303_s3] sm:$0xff]  ;;  %v41_v2 = vld [vmem:[%s8303_s3 + $0x8] sm:$0xff]  ;;  %v42_v3 = vld [vmem:[%s8303_s3 + $0x10] sm:$0xff]  ;;  %5301 = vmatprep.mubr.msk.f32.mxu0 %vm6620_vm0, %v6621_v4  ;;  %vm165_vm2 = vcmask 261120   ;;  %vm178_vm3 = vcmask 254976   ;;  %s6624_s17 = smov 120  }
   0x2   :  { %v6030_v5 = vpack.c.bf16 %v41_v2, %v40_v1  ;;  %v43_v6 = vld [vmem:[%s8303_s3 + $0x18] sm:$0xff]  ;;  %6041 = vmatprep.subr.bf16.mxu1 %v6619_v0  ;;  %5324 = vmatprep.mubr.msk.f32.mxu1 %vm6620_vm0, %v6621_v4  ;;  %v44_v8 = vld [vmem:[%s8303_s3 + $0x20] sm:$0xff]  ;;  %v45_v9 = vld [vmem:[%s8303_s3 + $0x28] sm:$0xff]  ;;  %vm383_vm4 = vcmask 64512   ;;  %vm494_vm6 = vcmask 277504   ;;  %vm507_vm7 = vcmask 271360  }
   0x3   :  { %v6033_v7 = vpack.c.bf16 %v43_v6, %v42_v3  ;;  %v6036_v10 = vpack.c.bf16 %v45_v9, %v44_v8  ;;  %v46_v11 = vld [vmem:[%s8303_s3 + $0x30] sm:$0xff]  ;;  %v47_v12 = vld [vmem:[%s8303_s3 + $0x38] sm:$0xff]  ;;  %v35_v14 = vld [vmem:[%s8304_s0] sm:$0xff]  ;;  %s6626_s27 = smov 56   ;;  %s6627_s28 = smov 80   ;;  %vm580_vm8 = vcmask 1041408  }
   0x4   :  { %6031 = vmatpush3.bf16.msra.mxu0 %v6030_v5  ;;  %v6039_v13 = vpack.c.bf16 %v47_v12, %v46_v11  ;;  %v36_v15 = vld [vmem:[%s8304_s0 + $0x8] sm:$0xff]  ;;  %v37_v16 = vld [vmem:[%s8304_s0 + $0x10] sm:$0xff]  ;;  %v38_v17 = vld [vmem:[%s8304_s0 + $0x18] sm:$0xff]  ;;  %s6628_s29 = smov 112   ;;  %s6629_s13 = smov 48  }
   0x5   :  { %6032 = vmatprep.subr.bf16.mxu0 %v6619_v0  ;;  %v39_v18 = vld [vmem:[%s8304_s0 + $0x20] sm:$0x3]  ;;  %v49_v23 = vld [vmem:[%s8305_s1 + $0x8] sm:$0xff]  ;;  %v50_v28 = vld [vmem:[%s8305_s1 + $0x10] sm:$0xff]  ;;  %s6630_s14 = smov 104   ;;  %s6631_s18 = smov 72  }
   0x6   :  { %v48_v19 = vld [vmem:[%s8305_s1] sm:$0xff]  ;;  %v51_v33 = vld [vmem:[%s8305_s1 + $0x18] sm:$0xff]  ;;  %v252_v8 = vld [vmem:[%s8306_s4 + $0x8] sm:$0xff]  ;;  %s6632_s3 = smov 40  }
   0x7   :  { %v52_v38 = vld [vmem:[%s8305_s1 + $0x20] sm:$0x3]  ;;  %v254_v11 = vld [vmem:[%s8306_s4 + $0x18] sm:$0xff]  ;;  %vm6907_vm5 = vmpackc.low %vm383_vm4, %vm383_vm4  ;;  %s6625_s1 = smov 64  }
   0x8   :  { %6034 = vmatpush3.bf16.msra.mxu0 %v6033_v7  ;;  %v251_v7 = vld [vmem:[%s8306_s4] sm:$0xff] }
   0x9   :  { %6035 = vmatprep.subr.bf16.mxu0 %v6619_v0  ;;  %v6042_v9 = vpack.c.bf16 %v252_v8, %v251_v7 }
   0xb   :  { %6043 = vmatpush3.bf16.msra.mxu1 %v6042_v9 }
   0xc   :  { %6037 = vmatpush3.bf16.msra.mxu0 %v6036_v10  ;;  %6044 = vmatprep.subr.bf16.mxu1 %v6619_v0  ;;  %v253_v10 = vld [vmem:[%s8306_s4 + $0x10] sm:$0xff] }
   0xd   :  { %6038 = vmatprep.subr.bf16.mxu0 %v6619_v0  ;;  %v6045_v12 = vpack.c.bf16 %v254_v11, %v253_v10 }
   0xf   :  { %6046 = vmatpush3.bf16.msra.mxu1 %v6045_v12 }
  0x10   :  { %6040 = vmatpush3.bf16.msra.mxu0 %v6039_v13  ;;  %6047 = vmatprep.subr.bf16.mxu1 %v6619_v0 }
  0x11   :  { %6055 = vmatprep.subr.bf16.mxu0 %v6619_v0 }
  0x13   :  { %5302 = vmatmul.mubr.msk.f32.vlgmr.msra.gmra.mrb[0].mxu0 %vm53_vm1, %v35_v14 }
  0x14   :  { %5304 = vmatprep.mubr.msk.f32.mxu0 %vm6620_vm0, %v6621_v4 }
  0x17   :  { %5305 = vmatmul.mubr.msk.f32.gmra.mrb[2].mxu0 %vm53_vm1, %v36_v15  ;;  %v233_v15 = vlaneseq }
  0x18   :  { %5307 = vmatprep.mubr.msk.f32.mxu0 %vm6620_vm0, %v6621_v4 }
  0x1b   :  { %5308 = vmatmul.mubr.msk.f32.gmra.mrb[4].mxu0 %vm53_vm1, %v37_v16 }
  0x1c   :  { %5310 = vmatprep.mubr.msk.f32.mxu0 %vm6620_vm0, %v6621_v4 }
  0x1f   :  { %5311 = vmatmul.mubr.msk.f32.gmra.mrb[6].mxu0 %vm53_vm1, %v38_v17 }
  0x20   :  { %5313 = vmatprep.mubr.msk.f32.mxu0 %vm6620_vm0, %v6621_v4 }
  0x23   :  { %5314 = vmatmul.mubr.msk.f32.gmra.mrb[8].mxu0 %vm53_vm1, %v39_v18 }
  0x24   :  { %5374 = vmatprep.mubr.msk.f32.mxu0 %vm6620_vm0, %v6621_v4 }
  0xe6   :  { %v135_v20 = vpop.f32.mrb[0].mxu0 }
  0xe7   :  { %v6755_v21 = vadd.f32 %v135_v20, %v48_v19  ;;  %v5303_v22 = vpop.f32.mrb[1].mxu0  ;;  %v6831_v19 = vshrl.u32 %v233_v15, 7 }
  0xe9   :  { %v166_v24 = vsel %vm165_vm2, %v6755_v21, 0.0 }
  0xea   :  { %167 = vadd.xlane.f32.xlu0 %v166_v24  ;;  %v140_v25 = vpop.f32.mrb[2].mxu0  ;;  %v235_v24 = vsub.s32 0, %v6831_v19 }
  0xeb   :  { %v6762_v26 = vadd.f32 %v140_v25, %v49_v23  ;;  %v5306_v27 = vpop.f32.mrb[3].mxu0 }
  0xec   :  { %v164_v27 = vld [vmem:[%s8307_s8] sm:$0xff] }
  0xed   :  { %v169_v29 = vsel %vm165_vm2, %v6762_v26, 0.0 }
  0xee   :  { %170 = vadd.xlane.f32.xlu0 %v169_v29  ;;  %v145_v30 = vpop.f32.mrb[4].mxu0  ;;  %v244_v29 = vsub.s32 1, %v6831_v19 }
  0xef   :  { %v6769_v31 = vadd.f32 %v145_v30, %v50_v28  ;;  %v5309_v32 = vpop.f32.mrb[5].mxu0 }
  0xf0   :  { %v236_v32 = vrot.slane %v164_v27, %v235_v24 }
  0xf1   :  { %v172_v34 = vsel %vm165_vm2, %v6769_v31, 0.0 }
  0xf2   :  { %173 = vadd.xlane.f32.xlu1 %v172_v34  ;;  %v150_v35 = vpop.f32.mrb[6].mxu0 }
  0xf3   :  { %v6776_v36 = vadd.f32 %v150_v35, %v51_v33  ;;  %v5312_v37 = vpop.f32.mrb[7].mxu0 }
  0xf5   :  { %v175_v39 = vsel %vm165_vm2, %v6776_v36, 0.0 }
  0xf6   :  { %176 = vadd.xlane.f32.xlu1 %v175_v39  ;;  %v155_v40 = vpop.f32.mrb[8].mxu0 }
  0xf7   :  { %v6783_v41 = vadd.f32 %v155_v40, %v52_v38  ;;  %v5315_v42 = vpop.f32.mrb[9].mxu0  ;;  %v245_v38 = vrot.slane %v164_v27, %v244_v29 }
  0xf9   :  { %v179_v43 = vsel %vm178_vm3, %v6783_v41, 0.0 }
  0xfa   :  { %180 = vadd.xlane.f32.xlu0 %v179_v43 }
 0x177   :  { %v168_v44 = vpop.xlane.xlu0 %167 }
 0x178   :  { %v183_v45 = vmul.f32 0.03125, %v168_v44 }
 0x17a   :  { %v6788_v46 = vsub.f32 %v6755_v21, %v183_v45 }
 0x17b   :  { %v171_v47 = vpop.xlane.xlu0 %170 }
 0x17c   :  { %v184_v48 = vmul.f32 0.03125, %v171_v47  ;;  %v193_v49 = vmul.f32 %v6788_v46, %v6788_v46 }
 0x17e   :  { %v6793_v50 = vsub.f32 %v6762_v26, %v184_v48  ;;  %v198_v51 = vsel %vm165_vm2, %v193_v49, 0.0 }
 0x17f   :  { %v174_v52 = vpop.xlane.xlu1 %173  ;;  %199 = vadd.xlane.f32.xlu1 %v198_v51 }
 0x180   :  { %v185_v53 = vmul.f32 0.03125, %v174_v52  ;;  %v194_v54 = vmul.f32 %v6793_v50, %v6793_v50 }
 0x182   :  { %v6799_v55 = vsub.f32 %v6769_v31, %v185_v53  ;;  %v201_v56 = vsel %vm165_vm2, %v194_v54, 0.0 }
 0x183   :  { %v177_v57 = vpop.xlane.xlu1 %176  ;;  %202 = vadd.xlane.f32.xlu0 %v201_v56 }
 0x184   :  { %v186_v58 = vmul.f32 0.03125, %v177_v57  ;;  %v195_v59 = vmul.f32 %v6799_v55, %v6799_v55 }
 0x186   :  { %v6805_v60 = vsub.f32 %v6776_v36, %v186_v58  ;;  %v204_v61 = vsel %vm165_vm2, %v195_v59, 0.0 }
 0x187   :  { %205 = vadd.xlane.f32.xlu1 %v204_v61  ;;  %v181_v62 = vpop.xlane.xlu0 %180 }
 0x188   :  { %v187_v63 = vmul.f32 0.03125, %v181_v62  ;;  %v196_v1 = vmul.f32 %v6805_v60, %v6805_v60 }
 0x18a   :  { %v6811_v2 = vsub.f32 %v6783_v41, %v187_v63  ;;  %v207_v3 = vsel %vm165_vm2, %v196_v1, 0.0 }
 0x18b   :  { %208 = vadd.xlane.f32.xlu0 %v207_v3 }
 0x18c   :  { %v197_v5 = vmul.f32 %v6811_v2, %v6811_v2 }
 0x18e   :  { %v210_v6 = vsel %vm178_vm3, %v197_v5, 0.0 }
 0x18f   :  { %211 = vadd.xlane.f32.xlu1 %v210_v6 }
 0x20c   :  { %v200_v13 = vpop.xlane.xlu1 %199 }
 0x20d   :  { %v213_v14 = vmul.f32 0.03125, %v200_v13 }
 0x20f   :  { %v218_v16 = vadd.f32 1e-05, %v213_v14 }
 0x210   :  { %v203_v17 = vpop.xlane.xlu0 %202 }
 0x211   :  { %6387 = vrsqrt.f32 %v218_v16  ;;  %v214_v18 = vmul.f32 0.03125, %v203_v17 }
 0x213   :  { %v219_v20 = vadd.f32 1e-05, %v214_v18 }
 0x214   :  { %v206_v22 = vpop.xlane.xlu1 %205 }
 0x215   :  { %6389 = vrsqrt.f32 %v219_v20  ;;  %v215_v23 = vmul.f32 0.03125, %v206_v22 }
 0x217   :  { %v220_v25 = vadd.f32 1e-05, %v215_v23 }
 0x218   :  { %v209_v28 = vpop.xlane.xlu0 %208 }
 0x219   :  { %6391 = vrsqrt.f32 %v220_v25  ;;  %v216_v30 = vmul.f32 0.03125, %v209_v28 }
 0x21b   :  { %v6388_v33 = vpop.eup %6387  ;;  %v221_v34 = vadd.f32 1e-05, %v216_v30 }
 0x21c   :  { %v212_v35 = vpop.xlane.xlu1 %211  ;;  %v228_v37 = vmul.f32 %v6388_v33, %v6788_v46 }
 0x21d   :  { %6393 = vrsqrt.f32 %v221_v34  ;;  %v217_v39 = vmul.f32 0.03125, %v212_v35 }
 0x21e   :  { %v237_v40 = vmul.f32 %v236_v32, %v228_v37 }
 0x21f   :  { %v6390_v42 = vpop.eup %6389  ;;  %v222_v43 = vadd.f32 1e-05, %v217_v39 }
 0x220   :  { %v246_v44 = vadd.f32 %v245_v38, %v237_v40  ;;  %v229_v45 = vmul.f32 %v6390_v42, %v6793_v50 }
 0x221   :  { %6395 = vrsqrt.f32 %v222_v43 }
 0x222   :  { %5325 = vmatmul.mubr.msk.f32.vlgmr.msra.gmra.mrb[0].mxu1 %vm165_vm2, %v246_v44  ;;  %v238_v47 = vmul.f32 %v236_v32, %v229_v45 }
 0x223   :  { %v6392_v48 = vpop.eup %6391  ;;  %5327 = vmatprep.mubr.msk.f32.mxu1 %vm6620_vm0, %v6621_v4 }
 0x224   :  { %v247_v46 = vadd.f32 %v245_v38, %v238_v47  ;;  %v230_v49 = vmul.f32 %v6392_v48, %v6799_v55 }
 0x226   :  { %5328 = vmatmul.mubr.msk.f32.gmra.mrb[2].mxu1 %vm165_vm2, %v247_v46  ;;  %v239_v51 = vmul.f32 %v236_v32, %v230_v49  ;;  %v6965_v49 = vld [vmem:[%s8308_s2] sm:$0xff] }
 0x227   :  { %v6394_v52 = vpop.eup %6393  ;;  %5330 = vmatprep.mubr.msk.f32.mxu1 %vm6620_vm0, %v6621_v4 }
 0x228   :  { %v248_v53 = vadd.f32 %v245_v38, %v239_v51  ;;  %v231_v50 = vmul.f32 %v6394_v52, %v6805_v60  ;;  %v257_v60 = vsub.s32 2, %v6831_v19 }
 0x22a   :  { %5331 = vmatmul.mubr.msk.f32.gmra.mrb[4].mxu1 %vm165_vm2, %v248_v53  ;;  %v240_v54 = vmul.f32 %v236_v32, %v231_v50  ;;  %v258_v62 = vrot.slane %v164_v27, %v257_v60  ;;  %v6971_v50 = vld [vmem:[%s8308_s2 + $0x8] sm:$0xff] }
 0x22b   :  { %v6396_v56 = vpop.eup %6395  ;;  %5333 = vmatprep.mubr.msk.f32.mxu1 %vm6620_vm0, %v6621_v4 }
 0x22c   :  { %v249_v57 = vadd.f32 %v245_v38, %v240_v54  ;;  %v232_v55 = vmul.f32 %v6396_v56, %v6811_v2 }
 0x22e   :  { %5334 = vmatmul.mubr.msk.f32.gmra.mrb[6].mxu1 %vm165_vm2, %v249_v57  ;;  %v241_v58 = vmul.f32 %v236_v32, %v232_v55 }
 0x22f   :  { %5336 = vmatprep.mubr.msk.f32.mxu1 %vm6620_vm0, %v6621_v4 }
 0x230   :  { %v250_v59 = vadd.f32 %v245_v38, %v241_v58  ;;  %v6978_v58 = vld [vmem:[%s8308_s2 + $0x10] sm:$0xff] }
 0x232   :  { %5337 = vmatmul.mubr.msk.f32.gmra.mrb[8].mxu1 %vm165_vm2, %v250_v59 }
 0x233   :  { %5349 = vmatprep.mubr.msk.f32.mxu1 %vm6620_vm0, %v6621_v4 }
 0x2f5   :  { %v340_v61 = vpop.f32.mrb[0].mxu1 }
 0x2f6   :  { %v5326_v63 = vpop.f32.mrb[1].mxu1  ;;  %v6865_v2 = vadd.f32 %v340_v61, %v258_v62 }
 0x2f9   :  { %v345_v1 = vpop.f32.mrb[2].mxu1 }
 0x2fa   :  { %v6867_v3 = vadd.f32 %v345_v1, %v258_v62  ;;  %v5329_v5 = vpop.f32.mrb[3].mxu1  ;;  %v6985_v1 = vld [vmem:[%s8308_s2 + $0x18] sm:$0xff] }
 0x2fc   :  { %v6871_v6 = vpack.i.bf16 %v6867_v3, %v6865_v2 }
 0x2fd   :  { %v350_v7 = vpop.f32.mrb[4].mxu1 }
 0x2fe   :  { %6228 = vrot.lane.b32.xlu0 %v6871_v6, %s6622_s15  ;;  %v5332_v8 = vpop.f32.mrb[5].mxu1  ;;  %v6875_v10 = vadd.f32 %v350_v7, %v258_v62 }
 0x301   :  { %v355_v9 = vpop.f32.mrb[6].mxu1 }
 0x302   :  { %v6877_v11 = vadd.f32 %v355_v9, %v258_v62  ;;  %v5335_v12 = vpop.f32.mrb[7].mxu1 }
 0x303   :  { %v6992_v12 = vld [vmem:[%s8308_s2 + $0x20] sm:$0x3] }
 0x304   :  { %v6881_v13 = vpack.i.bf16 %v6877_v11, %v6875_v10 }
 0x305   :  { %v360_v14 = vpop.f32.mrb[8].mxu1 }
 0x306   :  { %6243 = vrot.lane.b32.xlu0 %v6881_v13, %s6623_s16  ;;  %6233 = vrot.lane.b32.xlu1 %v6881_v13, %s6622_s15  ;;  %v5338_v15 = vpop.f32.mrb[9].mxu1  ;;  %v6887_v16 = vadd.f32 %v360_v14, %v258_v62 }
 0x30a   :  { %673 = vrot.lane.b32.xlu0 %v6865_v2, %s6624_s17  ;;  %381 = vrot.lane.b32.xlu1 %v6887_v16, %s6622_s15 }
 0x30e   :  { %677 = vrot.lane.b32.xlu0 %v6875_v10, %s6624_s17  ;;  %6238 = vrot.lane.b32.xlu1 %v6871_v6, %s6623_s16 }
 0x312   :  { %681 = vrot.lane.b32.xlu0 %v6887_v16, %s6624_s17  ;;  %691 = vrot.lane.b32.xlu1 %v6887_v16, %s6623_s16 }
 0x316   :  { %675 = vrot.lane.b32.xlu1 %v6867_v3, %s6624_s17 }
 0x31a   :  { %679 = vrot.lane.b32.xlu1 %v6877_v11, %s6624_s17 }
 0x370   :  { %v6229_v17 = vpop.permute.xlu0 %6228 }
 0x371   :  { %v6231_v18 = vunpack.i.h.bf16 %v6229_v17  ;;  %v6230_v20 = vunpack.i.l.bf16 %v6229_v17 }
 0x373   :  { %v6048_v23 = vpack.c.bf16 %v6231_v18, %v6230_v20 }
 0x375   :  { %6050 = vmatpush3.bf16.xpose.msk.msra.mxu1 %vm6907_vm5, %v6048_v23 }
 0x376   :  { %6051 = vmatprep.subr.bf16.mxu1 %v6619_v0 }
 0x378   :  { %v6234_v25 = vpop.permute.xlu1 %6233  ;;  %v6244_v38 = vpop.permute.xlu0 %6243 }
 0x379   :  { %v6236_v27 = vunpack.i.h.bf16 %v6234_v25  ;;  %v6235_v28 = vunpack.i.l.bf16 %v6234_v25  ;;  %v6246_v39 = vunpack.i.h.bf16 %v6244_v38  ;;  %v6245_v40 = vunpack.i.l.bf16 %v6244_v38 }
 0x37b   :  { %v6052_v30 = vpack.c.bf16 %v6236_v27, %v6235_v28  ;;  %v6066_v42 = vpack.c.bf16 %v6246_v39, %v6245_v40 }
 0x37c   :  { %v382_v32 = vpop.permute.xlu1 %381  ;;  %v674_v44 = vpop.permute.xlu0 %673 }
 0x37d   :  { %6054 = vmatpush3.bf16.xpose.msk.msra.mxu1 %vm6907_vm5, %v6052_v30 }
 0x37e   :  { %5347 = vmatprep.subr.mxu1 %v6621_v4 }
 0x380   :  { %v6239_v33 = vpop.permute.xlu1 %6238  ;;  %v678_v47 = vpop.permute.xlu0 %677 }
 0x381   :  { %v6241_v34 = vunpack.i.h.bf16 %v6239_v33  ;;  %v6240_v35 = vunpack.i.l.bf16 %v6239_v33 }
 0x383   :  { %v6062_v37 = vpack.c.bf16 %v6241_v34, %v6240_v35 }
 0x384   :  { %v692_v43 = vpop.permute.xlu1 %691  ;;  %v682_v46 = vpop.permute.xlu0 %681 }
 0x385   :  { %5348 = vmatpush3.xpose.msk.msra.mxu1 %vm383_vm4, %v382_v32 }
 0x386   :  { %6061 = vmatprep.subr.bf16.mxu1 %v6619_v0 }
 0x388   :  { %5350 = vmatmul.mubr.msk.f32.vlgmr.msra.gmra.mrb[10].mxu1 %vm383_vm4, %v6865_v2  ;;  %v676_v45 = vpop.permute.xlu1 %675 }
 0x389   :  { %6064 = vmatpush3.bf16.xpose.msk.msra.mxu1 %vm6907_vm5, %v6062_v37  ;;  %5352 = vmatprep.mubr.msk.f32.mxu1 %vm6620_vm0, %v6621_v4 }
 0x38a   :  { %6065 = vmatprep.subr.bf16.mxu1 %v6619_v0 }
 0x38c   :  { %5353 = vmatmul.mubr.msk.f32.gmra.mrb[12].mxu1 %vm383_vm4, %v6867_v3  ;;  %v680_v48 = vpop.permute.xlu1 %679 }
 0x38d   :  { %5355 = vmatprep.mubr.msk.f32.mxu1 %vm6620_vm0, %v6621_v4 }
 0x390   :  { %5356 = vmatmul.mubr.msk.f32.gmra.mrb[14].mxu1 %vm383_vm4, %v6875_v10 }
 0x391   :  { %6068 = vmatpush3.bf16.xpose.msk.msra.mxu1 %vm6907_vm5, %v6066_v42  ;;  %5358 = vmatprep.mubr.msk.f32.mxu1 %vm6620_vm0, %v6621_v4 }
 0x392   :  { %5397 = vmatprep.subr.mxu1 %v6621_v4 }
 0x394   :  { %5359 = vmatmul.mubr.msk.f32.gmra.mrb[16].mxu1 %vm383_vm4, %v6877_v11 }
 0x395   :  { %5361 = vmatprep.mubr.msk.f32.mxu1 %vm6620_vm0, %v6621_v4 }
 0x398   :  { %5362 = vmatmul.mubr.msk.f32.gmra.mrb[18].mxu1 %vm383_vm4, %v6887_v16 }
 0x399   :  { %5398 = vmatpush3.xpose.msk.msra.mxu1 %vm383_vm4, %v692_v43  ;;  %5399 = vmatprep.mubr.msk.f32.mxu1 %vm6620_vm0, %v6621_v4 }
 0x39a   :  { %6207 = vmatprep.subr.bf16.mxu1 %v6619_v0 }
 0x39c   :  { %5400 = vmatmul.mubr.msk.f32.vlgmr.msra.gmra.mrb[20].mxu1 %vm383_vm4, %v674_v44 }
 0x39d   :  { %5402 = vmatprep.mubr.msk.f32.mxu1 %vm6620_vm0, %v6621_v4 }
 0x3a0   :  { %5403 = vmatmul.mubr.msk.f32.gmra.mrb[22].mxu1 %vm383_vm4, %v676_v45 }
 0x3a1   :  { %5405 = vmatprep.mubr.msk.f32.mxu1 %vm6620_vm0, %v6621_v4 }
 0x3a4   :  { %5406 = vmatmul.mubr.msk.f32.gmra.mrb[24].mxu1 %vm383_vm4, %v678_v47 }
 0x3a5   :  { %5408 = vmatprep.mubr.msk.f32.mxu1 %vm6620_vm0, %v6621_v4 }
 0x3a8   :  { %5409 = vmatmul.mubr.msk.f32.gmra.mrb[26].mxu1 %vm383_vm4, %v680_v48 }
 0x3a9   :  { %5411 = vmatprep.mubr.msk.f32.mxu1 %vm6620_vm0, %v6621_v4 }
 0x3ac   :  { %5412 = vmatmul.mubr.msk.f32.gmra.mrb[28].mxu1 %vm383_vm4, %v682_v46 }
 0x3ad   :  { %5436 = vmatprep.mubr.msk.f32.mxu1 %vm6620_vm0, %v6621_v4 }
 0x45b   :  { %v470_v51 = vpop.f32.mrb[10].mxu1 }
 0x45c   :  { %v471_v52 = vadd.f32 %v470_v51, %v6965_v49  ;;  %v5351_v53 = vpop.f32.mrb[11].mxu1 }
 0x45e   :  { %v495_v54 = vsel %vm494_vm6, %v471_v52, -inf }
 0x45f   :  { %496 = vmax.xlane.f32.xlu1 %v495_v54  ;;  %v475_v56 = vpop.f32.mrb[12].mxu1 }
 0x460   :  { %v476_v57 = vadd.f32 %v475_v56, %v6971_v50  ;;  %v5354_v55 = vpop.f32.mrb[13].mxu1 }
 0x462   :  { %v498_v59 = vsel %vm494_vm6, %v476_v57, -inf }
 0x463   :  { %499 = vmax.xlane.f32.xlu0 %v498_v59  ;;  %v480_v61 = vpop.f32.mrb[14].mxu1 }
 0x464   :  { %v481_v62 = vadd.f32 %v480_v61, %v6978_v58  ;;  %v5357_v63 = vpop.f32.mrb[15].mxu1 }
 0x466   :  { %v501_v5 = vsel %vm494_vm6, %v481_v62, -inf }
 0x467   :  { %502 = vmax.xlane.f32.xlu0 %v501_v5  ;;  %v485_v7 = vpop.f32.mrb[16].mxu1 }
 0x468   :  { %v486_v8 = vadd.f32 %v485_v7, %v6985_v1  ;;  %v5360_v9 = vpop.f32.mrb[17].mxu1 }
 0x46a   :  { %v504_v14 = vsel %vm494_vm6, %v486_v8, -inf }
 0x46b   :  { %505 = vmax.xlane.f32.xlu0 %v504_v14  ;;  %v490_v15 = vpop.f32.mrb[18].mxu1 }
 0x46c   :  { %v491_v17 = vadd.f32 %v490_v15, %v6992_v12  ;;  %v5363_v18 = vpop.f32.mrb[19].mxu1 }
 0x46e   :  { %v508_v20 = vsel %vm507_vm7, %v491_v17, -inf }
 0x46f   :  { %509 = vmax.xlane.f32.xlu1 %v508_v20  ;;  %v779_v23 = vpop.f32.mrb[20].mxu1 }
 0x470   :  { %v780_v25 = vadd.f32 %v779_v23, %v6965_v49  ;;  %v5401_v27 = vpop.f32.mrb[21].mxu1 }
 0x472   :  { %v803_v28 = vsel %vm494_vm6, %v780_v25, -inf }
 0x473   :  { %804 = vmax.xlane.f32.xlu0 %v803_v28  ;;  %v784_v30 = vpop.f32.mrb[22].mxu1 }
 0x474   :  { %v785_v32 = vadd.f32 %v784_v30, %v6971_v50  ;;  %v5404_v33 = vpop.f32.mrb[23].mxu1 }
 0x476   :  { %v806_v34 = vsel %vm494_vm6, %v785_v32, -inf }
 0x477   :  { %807 = vmax.xlane.f32.xlu1 %v806_v34  ;;  %v789_v35 = vpop.f32.mrb[24].mxu1 }
 0x478   :  { %v790_v37 = vadd.f32 %v789_v35, %v6978_v58  ;;  %v5407_v38 = vpop.f32.mrb[25].mxu1 }
 0x47a   :  { %v809_v39 = vsel %vm494_vm6, %v790_v37, -inf }
 0x47b   :  { %810 = vmax.xlane.f32.xlu0 %v809_v39  ;;  %v794_v40 = vpop.f32.mrb[26].mxu1 }
 0x47c   :  { %v7004_v42 = vadd.f32 %v794_v40, %v6985_v1  ;;  %v5410_v43 = vpop.f32.mrb[27].mxu1 }
 0x47e   :  { %v812_v44 = vsel %vm494_vm6, %v7004_v42, -inf }
 0x47f   :  { %813 = vmax.xlane.f32.xlu1 %v812_v44  ;;  %v799_v45 = vpop.f32.mrb[28].mxu1 }
 0x480   :  { %v5413_v47 = vpop.f32.mrb[29].mxu1  ;;  %v7013_v48 = vadd.f32 %v799_v45, %v6992_v12 }
 0x482   :  { %v815_v46 = vsel %vm507_vm7, %v7013_v48, -inf }
 0x490   :  { %6253 = vrot.lane.b32.xlu1 %v6881_v13, %s6625_s1 }
 0x491   :  { %6248 = vrot.lane.b32.xlu0 %v6871_v6, %s6625_s1 }
 0x4b0   :  { %816 = vmax.xlane.f32.xlu0 %v815_v46 }
 0x4c6   :  { %559 = vrot.lane.b32.xlu0 %v6887_v16, %s6625_s1 }
 0x4ec   :  { %v497_v51 = vpop.xlane.xlu1 %496 }
 0x4ed   :  { %v511_v53 = vsub.f32 %v471_v52, %v497_v51 }
 0x4ef   :  { %v516_v54 = vmul.f32 1.442695, %v511_v53 }
 0x4f0   :  { %v500_v56 = vpop.xlane.xlu0 %499 }
 0x4f1   :  { %6397 = vpow2.f32 %v516_v54  ;;  %v512_v55 = vsub.f32 %v476_v57, %v500_v56 }
 0x4f3   :  { %v518_v59 = vmul.f32 1.442695, %v512_v55 }
 0x4f4   :  { %v503_v61 = vpop.xlane.xlu0 %502 }
 0x4f5   :  { %6399 = vpow2.f32 %v518_v59  ;;  %v513_v63 = vsub.f32 %v481_v62, %v503_v61 }
 0x4f7   :  { %v520_v5 = vmul.f32 1.442695, %v513_v63 }
 0x4f8   :  { %v506_v7 = vpop.xlane.xlu0 %505 }
 0x4f9   :  { %6401 = vpow2.f32 %v520_v5  ;;  %v514_v9 = vsub.f32 %v486_v8, %v506_v7 }
 0x4fb   :  { %v7019_v14 = vpop.eup %6397  ;;  %v522_v15 = vmul.f32 1.442695, %v514_v9 }
 0x4fc   :  { %v510_v18 = vpop.xlane.xlu1 %509  ;;  %v526_v20 = vsel %vm494_vm6, %v7019_v14, 0.0 }
 0x4fd   :  { %6403 = vpow2.f32 %v522_v15  ;;  %v515_v52 = vsub.f32 %v491_v17, %v510_v18  ;;  %527 = vadd.xlane.f32.xlu1 %v526_v20 }
 0x4ff   :  { %v7023_v23 = vpop.eup %6399  ;;  %v524_v57 = vmul.f32 1.442695, %v515_v52 }
 0x500   :  { %v805_v27 = vpop.xlane.xlu0 %804  ;;  %v529_v62 = vsel %vm494_vm6, %v7023_v23, 0.0 }
 0x501   :  { %6405 = vpow2.f32 %v524_v57  ;;  %v818_v28 = vsub.f32 %v780_v25, %v805_v27  ;;  %530 = vadd.xlane.f32.xlu0 %v529_v62 }
 0x503   :  { %v7027_v8 = vpop.eup %6401  ;;  %v823_v30 = vmul.f32 1.442695, %v818_v28 }
 0x504   :  { %v808_v33 = vpop.xlane.xlu1 %807  ;;  %v532_v34 = vsel %vm494_vm6, %v7027_v8, 0.0 }
 0x505   :  { %6407 = vpow2.f32 %v823_v30  ;;  %v819_v17 = vsub.f32 %v785_v32, %v808_v33  ;;  %533 = vadd.xlane.f32.xlu1 %v532_v34 }
 0x507   :  { %v7031_v35 = vpop.eup %6403  ;;  %v825_v38 = vmul.f32 1.442695, %v819_v17 }
 0x508   :  { %v811_v39 = vpop.xlane.xlu0 %810  ;;  %v535_v40 = vsel %vm494_vm6, %v7031_v35, 0.0 }
 0x509   :  { %6409 = vpow2.f32 %v825_v38  ;;  %v820_v25 = vsub.f32 %v790_v37, %v811_v39  ;;  %536 = vadd.xlane.f32.xlu0 %v535_v40 }
 0x50b   :  { %v7035_v43 = vpop.eup %6405  ;;  %v827_v44 = vmul.f32 1.442695, %v820_v25 }
 0x50c   :  { %v6249_v45 = vpop.permute.xlu0 %6248  ;;  %v814_v47 = vpop.xlane.xlu1 %813  ;;  %v538_v46 = vsel %vm507_vm7, %v7035_v43, 0.0 }
 0x50d   :  { %6411 = vpow2.f32 %v827_v44  ;;  %v6251_v32 = vunpack.i.h.bf16 %v6249_v45  ;;  %v6250_v51 = vunpack.i.l.bf16 %v6249_v45  ;;  %v821_v53 = vsub.f32 %v7004_v42, %v814_v47  ;;  %539 = vadd.xlane.f32.xlu1 %v538_v46 }
 0x50f   :  { %v7040_v54 = vpop.eup %6407  ;;  %v6056_v56 = vpack.c.bf16 %v6251_v32, %v6250_v51  ;;  %v829_v55 = vmul.f32 1.442695, %v821_v53 }
 0x510   :  { %v6254_v37 = vpop.permute.xlu1 %6253  ;;  %v833_v59 = vsel %vm494_vm6, %v7040_v54, 0.0 }
 0x511   :  { %6413 = vpow2.f32 %v829_v55  ;;  %v6256_v61 = vunpack.i.h.bf16 %v6254_v37  ;;  %v6255_v63 = vunpack.i.l.bf16 %v6254_v37  ;;  %6057 = vmatpush3.bf16.msra.mxu0 %v6056_v56  ;;  %834 = vadd.xlane.f32.xlu1 %v833_v59 }
 0x512   :  { %6058 = vmatprep.subr.bf16.mxu0 %v6619_v0 }
 0x513   :  { %v7045_v5 = vpop.eup %6409  ;;  %v6059_v7 = vpack.c.bf16 %v6256_v61, %v6255_v63 }
 0x514   :  { %v836_v42 = vsel %vm494_vm6, %v7045_v5, 0.0 }
 0x515   :  { %6060 = vmatpush3.bf16.msra.mxu0 %v6059_v7  ;;  %837 = vadd.xlane.f32.xlu0 %v836_v42 }
 0x516   :  { %5372 = vmatprep.subr.mxu0 %v6621_v4 }
 0x517   :  { %v7050_v9 = vpop.eup %6411 }
 0x518   :  { %v839_v15 = vsel %vm494_vm6, %v7050_v9, 0.0 }
 0x519   :  { %840 = vadd.xlane.f32.xlu1 %v839_v15 }
 0x51b   :  { %v7054_v18 = vpop.eup %6413 }
 0x51c   :  { %v842_v20 = vsel %vm494_vm6, %v7054_v18, 0.0 }
 0x51d   :  { %843 = vadd.xlane.f32.xlu1 %v842_v20 }
 0x52b   :  { %6263 = vrot.lane.b32.xlu0 %v6881_v13, %s6626_s27 }
 0x52f   :  { %866 = vrot.lane.b32.xlu0 %v6887_v16, %s6626_s27 }
 0x533   :  { %6273 = vrot.lane.b32.xlu0 %v6881_v13, %s6627_s28 }
 0x537   :  { %1189 = vrot.lane.b32.xlu0 %v6865_v2, %s6628_s29 }
 0x53b   :  { %1193 = vrot.lane.b32.xlu0 %v6875_v10, %s6628_s29 }
 0x53d   :  { %v817_v52 = vpop.xlane.xlu0 %816 }
 0x53e   :  { %v822_v57 = vsub.f32 %v7013_v48, %v817_v52 }
 0x53f   :  { %1197 = vrot.lane.b32.xlu0 %v6887_v16, %s6628_s29 }
 0x540   :  { %v831_v27 = vmul.f32 1.442695, %v822_v57 }
 0x541   :  { %v560_v62 = vpop.permute.xlu0 %559 }
 0x542   :  { %6415 = vpow2.f32 %v831_v27  ;;  %5373 = vmatpush3.msk.msra.mxu0 %vm580_vm8, %v560_v62 }
 0x543   :  { %6069 = vmatprep.subr.bf16.mxu0 %v6619_v0 }
 0x54c   :  { %v7073_v28 = vpop.eup %6415 }
 0x54d   :  { %v845_v30 = vsel %vm507_vm7, %v7073_v28, 0.0 }
 0x54e   :  { %846 = vadd.xlane.f32.xlu1 %v845_v30  ;;  %v364_v30 = vld [vmem:[%s8309_s5] sm:$0xff] }
 0x55f   :  { %6258 = vrot.lane.b32.xlu1 %v6871_v6, %s6626_s27 }
 0x563   :  { %6268 = vrot.lane.b32.xlu1 %v6871_v6, %s6627_s28 }
 0x567   :  { %1207 = vrot.lane.b32.xlu1 %v6887_v16, %s6627_s28 }
 0x56b   :  { %1191 = vrot.lane.b32.xlu1 %v6867_v3, %s6628_s29 }
 0x56f   :  { %1195 = vrot.lane.b32.xlu1 %v6877_v11, %s6628_s29 }
 0x58a   :  { %v528_v48 = vpop.xlane.xlu1 %527 }
 0x58b   :  { %6417 = vrcp.f32 %v528_v48 }
 0x58e   :  { %v531_v33 = vpop.xlane.xlu0 %530 }
 0x58f   :  { %6419 = vrcp.f32 %v531_v33 }
 0x592   :  { %v534_v34 = vpop.xlane.xlu1 %533 }
 0x593   :  { %6421 = vrcp.f32 %v534_v34  ;;  %v365_v34 = vld [vmem:[%s8309_s5 + $0x8] sm:$0xff] }
 0x595   :  { %v6418_v17 = vpop.eup %6417 }
 0x596   :  { %v546_v38 = vmul.f32 %v6418_v17, %v7019_v14  ;;  %v537_v39 = vpop.xlane.xlu0 %536 }
 0x597   :  { %6423 = vrcp.f32 %v537_v39 }
 0x598   :  { %5375 = vmatmul.mubr.msk.f32.vlgmr.msra.gmra.mrb[10].mxu0 %vm494_vm6, %v546_v38 }
 0x599   :  { %v6420_v40 = vpop.eup %6419  ;;  %5377 = vmatprep.mubr.msk.f32.mxu0 %vm6620_vm0, %v6621_v4 }
 0x59a   :  { %v540_v25 = vpop.xlane.xlu1 %539  ;;  %v547_v44 = vmul.f32 %v6420_v40, %v7023_v23 }
 0x59b   :  { %6425 = vrcp.f32 %v540_v25 }
 0x59c   :  { %5378 = vmatmul.mubr.msk.f32.gmra.mrb[12].mxu0 %vm494_vm6, %v547_v44 }
 0x59d   :  { %v6422_v45 = vpop.eup %6421  ;;  %5380 = vmatprep.mubr.msk.f32.mxu0 %vm6620_vm0, %v6621_v4 }
 0x59e   :  { %v548_v14 = vmul.f32 %v6422_v45, %v7027_v8  ;;  %v835_v8 = vpop.xlane.xlu1 %834 }
 0x59f   :  { %6427 = vrcp.f32 %v835_v8 }
 0x5a0   :  { %5381 = vmatmul.mubr.msk.f32.gmra.mrb[14].mxu0 %vm494_vm6, %v548_v14 }
 0x5a1   :  { %v6424_v47 = vpop.eup %6423  ;;  %5383 = vmatprep.mubr.msk.f32.mxu0 %vm6620_vm0, %v6621_v4 }
 0x5a2   :  { %v549_v46 = vmul.f32 %v6424_v47, %v7031_v35  ;;  %v838_v56 = vpop.xlane.xlu0 %837 }
 0x5a4   :  { %5384 = vmatmul.mubr.msk.f32.gmra.mrb[16].mxu0 %vm494_vm6, %v549_v46 }
 0x5a5   :  { %v6426_v23 = vpop.eup %6425  ;;  %5386 = vmatprep.mubr.msk.f32.mxu0 %vm6620_vm0, %v6621_v4 }
 0x5a6   :  { %v550_v32 = vmul.f32 %v6426_v23, %v7035_v43  ;;  %v841_v51 = vpop.xlane.xlu1 %840  ;;  %v6264_v35 = vpop.permute.xlu0 %6263 }
 0x5a7   :  { %v6266_v63 = vunpack.i.h.bf16 %v6264_v35  ;;  %v6265_v7 = vunpack.i.l.bf16 %v6264_v35 }
 0x5a8   :  { %5387 = vmatmul.mubr.msk.f32.gmra.mrb[18].mxu0 %vm494_vm6, %v550_v32 }
 0x5a9   :  { %5424 = vmatprep.mubr.msk.f32.mxu0 %vm6620_vm0, %v6621_v4  ;;  %v6073_v42 = vpack.c.bf16 %v6266_v63, %v6265_v7  ;;  %v6428_v15 = vpop.eup %6427 }
 0x5aa   :  { %v844_v53 = vpop.xlane.xlu1 %843  ;;  %v853_v52 = vmul.f32 %v6428_v15, %v7040_v54  ;;  %v867_v57 = vpop.permute.xlu0 %866 }
 0x5ae   :  { %v6274_v32 = vpop.permute.xlu0 %6273 }
 0x5af   :  { %v6276_v35 = vunpack.i.h.bf16 %v6274_v32 }
 0x5db   :  { %v847_v55 = vpop.xlane.xlu1 %846 }
 0x5dc   :  { %6429 = vrcp.f32 %v847_v55 }
 0x5dd   :  { %6431 = vrcp.f32 %v838_v56 }
 0x5de   :  { %6433 = vrcp.f32 %v841_v51 }
 0x5df   :  { %v6259_v37 = vpop.permute.xlu1 %6258  ;;  %6435 = vrcp.f32 %v844_v53 }
 0x5e0   :  { %v6261_v59 = vunpack.i.h.bf16 %v6259_v37  ;;  %v6260_v61 = vunpack.i.l.bf16 %v6259_v37  ;;  %v6275_v37 = vunpack.i.l.bf16 %v6274_v32 }
 0x5e2   :  { %v6070_v43 = vpack.c.bf16 %v6261_v59, %v6260_v61  ;;  %v6080_v63 = vpack.c.bf16 %v6276_v35, %v6275_v37 }
 0x5e3   :  { %v6269_v47 = vpop.permute.xlu1 %6268 }
 0x5e4   :  { %6071 = vmatpush3.bf16.msra.mxu0 %v6070_v43  ;;  %6210 = vmatpush3.bf16.msra.mxu1 %v6070_v43  ;;  %v6271_v46 = vunpack.i.h.bf16 %v6269_v47  ;;  %v6270_v23 = vunpack.i.l.bf16 %v6269_v47 }
 0x5e5   :  { %6072 = vmatprep.subr.bf16.mxu0 %v6619_v0  ;;  %6208 = vmatprep.subr.bf16.mxu1 %v6619_v0 }
 0x5e6   :  { %v6430_v20 = vpop.eup %6429  ;;  %v6076_v8 = vpack.c.bf16 %v6271_v46, %v6270_v23 }
 0x5e7   :  { %v857_v27 = vmul.f32 %v6430_v20, %v7073_v28  ;;  %v6432_v62 = vpop.eup %6431  ;;  %v1208_v20 = vpop.permute.xlu1 %1207 }
 0x5e8   :  { %6074 = vmatpush3.bf16.msra.mxu0 %v6073_v42  ;;  %6211 = vmatpush3.bf16.msra.mxu1 %v6073_v42  ;;  %v854_v54 = vmul.f32 %v6432_v62, %v7045_v5  ;;  %v6434_v28 = vpop.eup %6433 }
 0x5e9   :  { %5422 = vmatprep.subr.mxu0 %v6621_v4  ;;  %6209 = vmatprep.subr.mxu1 %v6621_v4  ;;  %v855_v48 = vmul.f32 %v6434_v28, %v7050_v9  ;;  %v6436_v33 = vpop.eup %6435 }
 0x5ea   :  { %v856_v5 = vmul.f32 %v6436_v33, %v7054_v18 }
 0x5ec   :  { %5423 = vmatpush3.msk.msra.mxu0 %vm580_vm8, %v867_v57  ;;  %6212 = vmatpush3.msk.msra.mxu1 %vm580_vm8, %v867_v57  ;;  %v1192_v57 = vpop.permute.xlu1 %1191 }
 0x5ed   :  { %5425 = vmatmul.mubr.msk.f32.vlgmr.msra.gmra.mrb[20].mxu0 %vm494_vm6, %v853_v52  ;;  %5437 = vmatmul.mubr.msk.f32.vlgmr.msra.gmra.mrb[30].mxu1 %vm494_vm6, %v857_v27  ;;  %v1190_v52 = vpop.permute.xlu0 %1189 }
 0x5ee   :  { %5427 = vmatprep.mubr.msk.f32.mxu0 %vm6620_vm0, %v6621_v4  ;;  %5456 = vmatprep.subr.mxu0 %v6621_v4 }
 0x5ef   :  { %5457 = vmatpush3.msra.mxu0 %v364_v30  ;;  %5439 = vmatprep.subr.mxu1 %v6621_v4 }
 0x5f0   :  { %5441 = vmatprep.mubr.msk.f32.mxu1 %vm6620_vm0, %v6621_v4  ;;  %6083 = vmatprep.subr.bf16.mxu0 %v6619_v0  ;;  %v1196_v62 = vpop.permute.xlu1 %1195 }
 0x5f1   :  { %5428 = vmatmul.mubr.msk.f32.gmra.mrb[22].mxu0 %vm494_vm6, %v854_v54  ;;  %5440 = vmatpush3.msra.mxu1 %v365_v34  ;;  %v1194_v27 = vpop.permute.xlu0 %1193 }
 0x5f2   :  { %5430 = vmatprep.mubr.msk.f32.mxu0 %vm6620_vm0, %v6621_v4  ;;  %6075 = vmatprep.subr.bf16.mxu1 %v6619_v0 }
 0x5f5   :  { %5431 = vmatmul.mubr.msk.f32.gmra.mrb[24].mxu0 %vm494_vm6, %v855_v48  ;;  %v1198_v30 = vpop.permute.xlu0 %1197 }
 0x5f6   :  { %5433 = vmatprep.mubr.msk.f32.mxu0 %vm6620_vm0, %v6621_v4 }
 0x5f9   :  { %5434 = vmatmul.mubr.msk.f32.gmra.mrb[26].mxu0 %vm494_vm6, %v856_v5 }
 0x5fa   :  { %5458 = vmatprep.mubr.msk.f32.mxu0 %vm6620_vm0, %v6621_v4 }
 0x66b   :  { %v649_v9 = vpop.f32.mrb[10].mxu0 }
 0x66c   :  { %v5376_v17 = vpop.f32.mrb[11].mxu0  ;;  %5459 = vmatmul.mubr.msk.f32.vlgmr.msra.gmra.mrb[28].mxu0 %vm383_vm4, %v649_v9 }
 0x66d   :  { %5461 = vmatprep.mubr.msk.f32.mxu0 %vm6620_vm0, %v6621_v4 }
 0x66f   :  { %v654_v18 = vpop.f32.mrb[12].mxu0 }
 0x670   :  { %v5379_v38 = vpop.f32.mrb[13].mxu0  ;;  %5462 = vmatmul.mubr.msk.f32.gmra.mrb[30].mxu0 %vm383_vm4, %v654_v18 }
 0x671   :  { %5464 = vmatprep.mubr.msk.f32.mxu0 %vm6620_vm0, %v6621_v4 }
 0x673   :  { %v659_v39 = vpop.f32.mrb[14].mxu0 }
 0x674   :  { %v5382_v40 = vpop.f32.mrb[15].mxu0  ;;  %5465 = vmatmul.mubr.msk.f32.gmra.mrb[32].mxu0 %vm383_vm4, %v659_v39 }
 0x675   :  { %5467 = vmatprep.mubr.msk.f32.mxu0 %vm6620_vm0, %v6621_v4 }
 0x677   :  { %v664_v25 = vpop.f32.mrb[16].mxu0 }
 0x678   :  { %v5385_v44 = vpop.f32.mrb[17].mxu0  ;;  %5468 = vmatmul.mubr.msk.f32.gmra.mrb[34].mxu0 %vm383_vm4, %v664_v25 }
 0x679   :  { %5470 = vmatprep.mubr.msk.f32.mxu0 %vm6620_vm0, %v6621_v4 }
 0x67b   :  { %v669_v45 = vpop.f32.mrb[18].mxu0 }
 0x67c   :  { %v5388_v14 = vpop.f32.mrb[19].mxu0  ;;  %5471 = vmatmul.mubr.msk.f32.gmra.mrb[36].mxu0 %vm383_vm4, %v669_v45 }
 0x67d   :  { %5508 = vmatprep.mubr.msk.f32.mxu0 %vm6620_vm0, %v6621_v4 }
 0x6c0   :  { %v955_v51 = vpop.f32.mrb[20].mxu0  ;;  %v975_v53 = vpop.f32.mrb[30].mxu1 }
 0x6c1   :  { %v5426_v56 = vpop.f32.mrb[21].mxu0  ;;  %v5438_v55 = vpop.f32.mrb[31].mxu1  ;;  %5442 = vmatmul.mubr.msk.f32.vlgmr.msra.gmra.mrb[32].mxu1 %vm383_vm4, %v955_v51 }
 0x6c2   :  { %6078 = vmatpush3.bf16.xpose.msk.msra.mxu1 %vm6907_vm5, %v6076_v8  ;;  %5444 = vmatprep.mubr.msk.f32.mxu1 %vm6620_vm0, %v6621_v4 }
 0x6c3   :  { %6079 = vmatprep.subr.bf16.mxu1 %v6619_v0 }
 0x6c4   :  { %v960_v59 = vpop.f32.mrb[22].mxu0 }
 0x6c5   :  { %v5429_v61 = vpop.f32.mrb[23].mxu0  ;;  %5445 = vmatmul.mubr.msk.f32.gmra.mrb[34].mxu1 %vm383_vm4, %v960_v59 }
 0x6c6   :  { %5447 = vmatprep.mubr.msk.f32.mxu1 %vm6620_vm0, %v6621_v4 }
 0x6c8   :  { %v965_v7 = vpop.f32.mrb[24].mxu0 }
 0x6c9   :  { %v5432_v43 = vpop.f32.mrb[25].mxu0  ;;  %5448 = vmatmul.mubr.msk.f32.gmra.mrb[36].mxu1 %vm383_vm4, %v965_v7 }
 0x6ca   :  { %6082 = vmatpush3.bf16.xpose.msk.msra.mxu1 %vm6907_vm5, %v6080_v63  ;;  %5450 = vmatprep.mubr.msk.f32.mxu1 %vm6620_vm0, %v6621_v4 }
 0x6cb   :  { %5481 = vmatprep.subr.mxu1 %v6621_v4 }
 0x6cc   :  { %v970_v42 = vpop.f32.mrb[26].mxu0 }
 0x6cd   :  { %v5435_v15 = vpop.f32.mrb[27].mxu0  ;;  %5451 = vmatmul.mubr.msk.f32.gmra.mrb[38].mxu1 %vm383_vm4, %v970_v42 }
 0x6ce   :  { %5453 = vmatprep.mubr.msk.f32.mxu1 %vm6620_vm0, %v6621_v4 }
 0x6d1   :  { %5454 = vmatmul.mubr.msk.f32.gmra.mrb[40].mxu1 %vm383_vm4, %v975_v53 }
 0x6d2   :  { %5482 = vmatpush3.xpose.msk.msra.mxu1 %vm383_vm4, %v1208_v20  ;;  %5483 = vmatprep.mubr.msk.f32.mxu1 %vm6620_vm0, %v6621_v4 }
 0x6d3   :  { %5523 = vmatprep.subr.mxu1 %v6621_v4 }
 0x6d5   :  { %5484 = vmatmul.mubr.msk.f32.vlgmr.msra.gmra.mrb[42].mxu1 %vm383_vm4, %v1190_v52 }
 0x6d6   :  { %5486 = vmatprep.mubr.msk.f32.mxu1 %vm6620_vm0, %v6621_v4 }
 0x6d9   :  { %5487 = vmatmul.mubr.msk.f32.gmra.mrb[44].mxu1 %vm383_vm4, %v1192_v57 }
 0x6da   :  { %5489 = vmatprep.mubr.msk.f32.mxu1 %vm6620_vm0, %v6621_v4 }
 0x6dd   :  { %5490 = vmatmul.mubr.msk.f32.gmra.mrb[46].mxu1 %vm383_vm4, %v1194_v27 }
 0x6de   :  { %5492 = vmatprep.mubr.msk.f32.mxu1 %vm6620_vm0, %v6621_v4 }
 0x6e1   :  { %5493 = vmatmul.mubr.msk.f32.gmra.mrb[48].mxu1 %vm383_vm4, %v1196_v62 }
 0x6e2   :  { %5495 = vmatprep.mubr.msk.f32.mxu1 %vm6620_vm0, %v6621_v4 }
 0x6e5   :  { %5496 = vmatmul.mubr.msk.f32.gmra.mrb[50].mxu1 %vm383_vm4, %v1198_v30 }
 0x6e6   :  { %5525 = vmatprep.mubr.msk.f32.mxu1 %vm6620_vm0, %v6621_v4 }
 0x73f   :  { %v1165_v54 = vpop.f32.mrb[28].mxu0 }
 0x740   :  { %v5460_v28 = vpop.f32.mrb[29].mxu0 }
 0x743   :  { %v1170_v48 = vpop.f32.mrb[30].mxu0 }
 0x744   :  { %v5463_v33 = vpop.f32.mrb[31].mxu0 }
 0x747   :  { %v1175_v5 = vpop.f32.mrb[32].mxu0 }
 0x748   :  { %v5466_v34 = vpop.f32.mrb[33].mxu0 }
 0x74b   :  { %v1180_v9 = vpop.f32.mrb[34].mxu0 }
 0x74c   :  { %v5469_v17 = vpop.f32.mrb[35].mxu0 }
 0x74f   :  { %v1185_v18 = vpop.f32.mrb[36].mxu0 }
 0x750   :  { %v5472_v38 = vpop.f32.mrb[37].mxu0 }
 0x794   :  { %v1060_v39 = vpop.f32.mrb[32].mxu1 }
 0x795   :  { %v7196_v40 = vadd.f32 %v1165_v54, %v1060_v39  ;;  %v5443_v25 = vpop.f32.mrb[33].mxu1 }
 0x798   :  { %v1065_v44 = vpop.f32.mrb[34].mxu1 }
 0x799   :  { %v7198_v45 = vadd.f32 %v1170_v48, %v1065_v44  ;;  %v5446_v14 = vpop.f32.mrb[35].mxu1 }
 0x79c   :  { %v1070_v47 = vpop.f32.mrb[36].mxu1 }
 0x79d   :  { %v7200_v46 = vadd.f32 %v1175_v5, %v1070_v47  ;;  %v5449_v23 = vpop.f32.mrb[37].mxu1 }
 0x7a0   :  { %v1075_v32 = vpop.f32.mrb[38].mxu1 }
 0x7a1   :  { %v7202_v8 = vadd.f32 %v1180_v9, %v1075_v32  ;;  %v5452_v51 = vpop.f32.mrb[39].mxu1 }
 0x7a4   :  { %v1080_v53 = vpop.f32.mrb[40].mxu1 }
 0x7a5   :  { %v7204_v56 = vadd.f32 %v1185_v18, %v1080_v53  ;;  %v5455_v55 = vpop.f32.mrb[41].mxu1 }
 0x7a8   :  { %v1295_v35 = vpop.f32.mrb[42].mxu1 }
 0x7a9   :  { %v1296_v37 = vadd.f32 %v1295_v35, %v6965_v49  ;;  %v5485_v59 = vpop.f32.mrb[43].mxu1 }
 0x7ab   :  { %v1319_v61 = vsel %vm494_vm6, %v1296_v37, -inf }
 0x7ac   :  { %1320 = vmax.xlane.f32.xlu1 %v1319_v61  ;;  %v1300_v63 = vpop.f32.mrb[44].mxu1 }
 0x7ad   :  { %v1301_v7 = vadd.f32 %v1300_v63, %v6971_v50  ;;  %v5488_v43 = vpop.f32.mrb[45].mxu1 }
 0x7af   :  { %v1322_v42 = vsel %vm494_vm6, %v1301_v7, -inf }
 0x7b0   :  { %1323 = vmax.xlane.f32.xlu0 %v1322_v42  ;;  %v1305_v15 = vpop.f32.mrb[46].mxu1 }
 0x7b1   :  { %v1306_v20 = vadd.f32 %v1305_v15, %v6978_v58  ;;  %v5491_v52 = vpop.f32.mrb[47].mxu1 }
 0x7b3   :  { %v1325_v57 = vsel %vm494_vm6, %v1306_v20, -inf }
 0x7b4   :  { %1326 = vmax.xlane.f32.xlu0 %v1325_v57  ;;  %v1310_v27 = vpop.f32.mrb[48].mxu1 }
 0x7b5   :  { %v1311_v49 = vadd.f32 %v1310_v27, %v6985_v1  ;;  %v5494_v62 = vpop.f32.mrb[49].mxu1 }
 0x7b7   :  { %v1328_v30 = vsel %vm494_vm6, %v1311_v49, -inf }
 0x7b8   :  { %1329 = vmax.xlane.f32.xlu0 %v1328_v30  ;;  %v1315_v54 = vpop.f32.mrb[50].mxu1 }
 0x7b9   :  { %v1316_v50 = vadd.f32 %v1315_v54, %v6992_v12  ;;  %v5497_v28 = vpop.f32.mrb[51].mxu1 }
 0x7bb   :  { %v1331_v48 = vsel %vm507_vm7, %v1316_v50, -inf }
 0x7bc   :  { %1332 = vmax.xlane.f32.xlu1 %v1331_v48 }
 0x839   :  { %v1321_v33 = vpop.xlane.xlu1 %1320 }
 0x83a   :  { %v1334_v58 = vsub.f32 %v1296_v37, %v1321_v33 }
 0x83c   :  { %v1339_v5 = vmul.f32 1.442695, %v1334_v58 }
 0x83d   :  { %v1324_v34 = vpop.xlane.xlu0 %1323 }
 0x83e   :  { %6437 = vpow2.f32 %v1339_v5  ;;  %v1335_v9 = vsub.f32 %v1301_v7, %v1324_v34 }
 0x840   :  { %v1341_v17 = vmul.f32 1.442695, %v1335_v9 }
 0x841   :  { %v1327_v39 = vpop.xlane.xlu0 %1326 }
 0x842   :  { %6439 = vpow2.f32 %v1341_v17  ;;  %v1336_v25 = vsub.f32 %v1306_v20, %v1327_v39 }
 0x844   :  { %v1343_v23 = vmul.f32 1.442695, %v1336_v25 }
 0x845   :  { %v1330_v44 = vpop.xlane.xlu0 %1329 }
 0x846   :  { %v1337_v47 = vsub.f32 %v1311_v49, %v1330_v44  ;;  %6441 = vpow2.f32 %v1343_v23 }
 0x848   :  { %v6438_v1 = vpop.eup %6437  ;;  %v1345_v51 = vmul.f32 1.442695, %v1337_v47 }
 0x849   :  { %v1349_v18 = vsel %vm494_vm6, %v6438_v1, 0.0  ;;  %v1333_v14 = vpop.xlane.xlu1 %1332 }
 0x84a   :  { %1350 = vadd.xlane.f32.xlu0 %v1349_v18  ;;  %v1338_v32 = vsub.f32 %v1316_v50, %v1333_v14  ;;  %6443 = vpow2.f32 %v1345_v51 }
 0x84c   :  { %v7217_v38 = vpop.eup %6439  ;;  %v1347_v53 = vmul.f32 1.442695, %v1338_v32 }
 0x84d   :  { %v1352_v12 = vsel %vm494_vm6, %v7217_v38, 0.0 }
 0x84e   :  { %1353 = vadd.xlane.f32.xlu1 %v1352_v12  ;;  %6445 = vpow2.f32 %v1347_v53 }
 0x850   :  { %v6442_v55 = vpop.eup %6441 }
 0x851   :  { %v1355_v37 = vsel %vm494_vm6, %v6442_v55, 0.0 }
 0x854   :  { %v7225_v35 = vpop.eup %6443 }
 0x855   :  { %v1358_v61 = vsel %vm494_vm6, %v7225_v35, 0.0 }
 0x858   :  { %v7228_v59 = vpop.eup %6445 }
 0x859   :  { %v1361_v63 = vsel %vm507_vm7, %v7228_v59, 0.0 }
 0x85f   :  { %6278 = vrot.lane.b32.xlu1 %v6871_v6, %s6629_s13 }
 0x860   :  { %6283 = vrot.lane.b32.xlu0 %v6881_v13, %s6629_s13 }
 0x87f   :  { %1356 = vadd.xlane.f32.xlu0 %v1355_v37 }
 0x883   :  { %1359 = vadd.xlane.f32.xlu0 %v1358_v61  ;;  %1362 = vadd.xlane.f32.xlu1 %v1361_v63 }
 0x894   :  { %1609 = vrot.lane.b32.xlu1 %v6875_v10, %s6630_s14 }
 0x899   :  { %1382 = vrot.lane.b32.xlu0 %v6887_v16, %s6629_s13 }
 0x89d   :  { %6288 = vrot.lane.b32.xlu0 %v6871_v6, %s6631_s18 }
 0x8a1   :  { %6293 = vrot.lane.b32.xlu0 %v6881_v13, %s6631_s18 }
 0x8a5   :  { %1623 = vrot.lane.b32.xlu0 %v6887_v16, %s6631_s18 }
 0x8a9   :  { %1605 = vrot.lane.b32.xlu0 %v6865_v2, %s6630_s14 }
 0x8ad   :  { %1607 = vrot.lane.b32.xlu0 %v6867_v3, %s6630_s14 }
 0x8b1   :  { %1611 = vrot.lane.b32.xlu0 %v6877_v11, %s6630_s14 }
 0x8b5   :  { %1613 = vrot.lane.b32.xlu0 %v6887_v16, %s6630_s14 }
 0x8d7   :  { %v1351_v10 = vpop.xlane.xlu0 %1350 }
 0x8d8   :  { %6447 = vrcp.f32 %v1351_v10 }
 0x8db   :  { %v1354_v7 = vpop.xlane.xlu1 %1353  ;;  %v6284_v43 = vpop.permute.xlu0 %6283 }
 0x8dc   :  { %v6286_v52 = vunpack.i.h.bf16 %v6284_v43  ;;  %v6285_v57 = vunpack.i.l.bf16 %v6284_v43  ;;  %6449 = vrcp.f32 %v1354_v7 }
 0x8de   :  { %v6087_v2 = vpack.c.bf16 %v6286_v52, %v6285_v57  ;;  %v6607_v52 = vld [vmem:[%s8308_s2] sm:$0xff] }
 0x8df   :  { %v6279_v42 = vpop.permute.xlu1 %6278 }
 0x8e0   :  { %v6281_v15 = vunpack.i.h.bf16 %v6279_v42  ;;  %v6280_v20 = vunpack.i.l.bf16 %v6279_v42 }
 0x8e2   :  { %v6084_v27 = vpack.c.bf16 %v6281_v15, %v6280_v20  ;;  %v6448_v49 = vpop.eup %6447 }
 0x8e3   :  { %v1369_v62 = vmul.f32 %v6448_v49, %v6438_v1 }
 0x8e4   :  { %6085 = vmatpush3.bf16.msra.mxu0 %v6084_v27 }
 0x8e5   :  { %6086 = vmatprep.subr.bf16.mxu0 %v6619_v0 }
 0x8e6   :  { %v6450_v50 = vpop.eup %6449 }
 0x8e7   :  { %v1370_v48 = vmul.f32 %v6450_v50, %v7217_v38  ;;  %v6609_v50 = vld [vmem:[%s8308_s2 + $0x10] sm:$0xff] }
 0x8e8   :  { %6088 = vmatpush3.bf16.msra.mxu0 %v6087_v2 }
 0x8e9   :  { %5506 = vmatprep.subr.mxu0 %v6621_v4 }
 0x90c   :  { %v1357_v3 = vpop.xlane.xlu0 %1356 }
 0x90d   :  { %6451 = vrcp.f32 %v1357_v3 }
 0x910   :  { %v1360_v11 = vpop.xlane.xlu0 %1359  ;;  %v1363_v30 = vpop.xlane.xlu1 %1362 }
 0x911   :  { %6453 = vrcp.f32 %v1360_v11  ;;  %v6608_v11 = vld [vmem:[%s8308_s2 + $0x8] sm:$0xff] }
 0x912   :  { %6455 = vrcp.f32 %v1363_v30 }
 0x914   :  { %v1383_v54 = vpop.permute.xlu0 %1382  ;;  %v1610_v32 = vpop.permute.xlu1 %1609 }
 0x915   :  { %5507 = vmatpush3.msk.msra.mxu0 %vm580_vm8, %v1383_v54 }
 0x916   :  { %5509 = vmatmul.mubr.msk.f32.vlgmr.msra.gmra.mrb[38].mxu0 %vm494_vm6, %v1369_v62  ;;  %6089 = vmatprep.subr.bf16.mxu0 %v6619_v0 }
 0x917   :  { %5511 = vmatprep.mubr.msk.f32.mxu0 %vm6620_vm0, %v6621_v4  ;;  %v6452_v33 = vpop.eup %6451 }
 0x918   :  { %v6289_v28 = vpop.permute.xlu0 %6288  ;;  %v1371_v17 = vmul.f32 %v6452_v33, %v6442_v55  ;;  %v366_v55 = vld [vmem:[%s8309_s5 + $0x10] sm:$0xff] }
 0x919   :  { %v6291_v58 = vunpack.i.h.bf16 %v6289_v28  ;;  %v6290_v5 = vunpack.i.l.bf16 %v6289_v28  ;;  %5524 = vmatpush3.msra.mxu1 %v366_v55 }
 0x91a   :  { %5512 = vmatmul.mubr.msk.f32.gmra.mrb[40].mxu0 %vm494_vm6, %v1370_v48  ;;  %6097 = vmatprep.subr.bf16.mxu1 %v6619_v0 }
 0x91b   :  { %v6090_v34 = vpack.c.bf16 %v6291_v58, %v6290_v5  ;;  %5514 = vmatprep.mubr.msk.f32.mxu0 %vm6620_vm0, %v6621_v4  ;;  %v6454_v1 = vpop.eup %6453  ;;  %v6610_v5 = vld [vmem:[%s8308_s2 + $0x18] sm:$0xff] }
 0x91c   :  { %v6294_v9 = vpop.permute.xlu0 %6293  ;;  %v1372_v12 = vmul.f32 %v6454_v1, %v7225_v35  ;;  %v6456_v39 = vpop.eup %6455 }
 0x91d   :  { %6092 = vmatpush3.bf16.xpose.msk.msra.mxu0 %vm6907_vm5, %v6090_v34  ;;  %v6296_v18 = vunpack.i.h.bf16 %v6294_v9  ;;  %v6295_v38 = vunpack.i.l.bf16 %v6294_v9  ;;  %v1373_v44 = vmul.f32 %v6456_v39, %v7228_v59 }
 0x91e   :  { %5515 = vmatmul.mubr.msk.f32.gmra.mrb[42].mxu0 %vm494_vm6, %v1371_v17  ;;  %6093 = vmatprep.subr.bf16.mxu0 %v6619_v0 }
 0x91f   :  { %5517 = vmatprep.mubr.msk.f32.mxu0 %vm6620_vm0, %v6621_v4  ;;  %v6094_v25 = vpack.c.bf16 %v6296_v18, %v6295_v38  ;;  %v6611_v18 = vld [vmem:[%s8308_s2 + $0x20] sm:$0x3] }
 0x920   :  { %v1624_v14 = vpop.permute.xlu0 %1623 }
 0x922   :  { %5518 = vmatmul.mubr.msk.f32.gmra.mrb[44].mxu0 %vm494_vm6, %v1372_v12 }
 0x923   :  { %5520 = vmatprep.mubr.msk.f32.mxu0 %vm6620_vm0, %v6621_v4 }
 0x924   :  { %v1606_v47 = vpop.permute.xlu0 %1605 }
 0x925   :  { %6096 = vmatpush3.bf16.xpose.msk.msra.mxu0 %vm6907_vm5, %v6094_v25 }
 0x926   :  { %5521 = vmatmul.mubr.msk.f32.gmra.mrb[46].mxu0 %vm494_vm6, %v1373_v44  ;;  %5548 = vmatprep.subr.mxu0 %v6621_v4 }
 0x927   :  { %5550 = vmatprep.mubr.msk.f32.mxu0 %vm6620_vm0, %v6621_v4 }
 0x928   :  { %v1608_v23 = vpop.permute.xlu0 %1607 }
 0x92c   :  { %v1612_v51 = vpop.permute.xlu0 %1611 }
 0x92d   :  { %5549 = vmatpush3.xpose.msk.msra.mxu0 %vm383_vm4, %v1624_v14 }
 0x92e   :  { %5590 = vmatprep.subr.mxu0 %v6621_v4 }
 0x930   :  { %5551 = vmatmul.mubr.msk.f32.vlgmr.msra.gmra.mrb[48].mxu0 %vm383_vm4, %v1606_v47  ;;  %v1614_v53 = vpop.permute.xlu0 %1613 }
 0x931   :  { %5553 = vmatprep.mubr.msk.f32.mxu0 %vm6620_vm0, %v6621_v4 }
 0x934   :  { %5554 = vmatmul.mubr.msk.f32.gmra.mrb[50].mxu0 %vm383_vm4, %v1608_v23 }
 0x935   :  { %5556 = vmatprep.mubr.msk.f32.mxu0 %vm6620_vm0, %v6621_v4 }
 0x938   :  { %5557 = vmatmul.mubr.msk.f32.gmra.mrb[52].mxu0 %vm383_vm4, %v1610_v32 }
 0x939   :  { %5559 = vmatprep.mubr.msk.f32.mxu0 %vm6620_vm0, %v6621_v4 }
 0x93c   :  { %5560 = vmatmul.mubr.msk.f32.gmra.mrb[54].mxu0 %vm383_vm4, %v1612_v51 }
 0x93d   :  { %5562 = vmatprep.mubr.msk.f32.mxu0 %vm6620_vm0, %v6621_v4 }
 0x940   :  { %5563 = vmatmul.mubr.msk.f32.gmra.mrb[56].mxu0 %vm383_vm4, %v1614_v53 }
 0x941   :  { %5592 = vmatprep.mubr.msk.f32.mxu0 %vm6620_vm0, %v6621_v4 }
 0x9e9   :  { %v1471_v35 = vpop.f32.mrb[38].mxu0 }
 0x9ea   :  { %v5510_v37 = vpop.f32.mrb[39].mxu0  ;;  %5526 = vmatmul.mubr.msk.f32.vlgmr.msra.gmra.mrb[52].mxu1 %vm383_vm4, %v1471_v35 }
 0x9eb   :  { %5528 = vmatprep.mubr.msk.f32.mxu1 %vm6620_vm0, %v6621_v4 }
 0x9ed   :  { %v1476_v59 = vpop.f32.mrb[40].mxu0 }
 0x9ee   :  { %v5513_v61 = vpop.f32.mrb[41].mxu0  ;;  %5529 = vmatmul.mubr.msk.f32.gmra.mrb[54].mxu1 %vm383_vm4, %v1476_v59 }
 0x9ef   :  { %5531 = vmatprep.mubr.msk.f32.mxu1 %vm6620_vm0, %v6621_v4 }
 0x9f1   :  { %v1481_v63 = vpop.f32.mrb[42].mxu0 }
 0x9f2   :  { %v5516_v10 = vpop.f32.mrb[43].mxu0  ;;  %5532 = vmatmul.mubr.msk.f32.gmra.mrb[56].mxu1 %vm383_vm4, %v1481_v63 }
 0x9f3   :  { %5534 = vmatprep.mubr.msk.f32.mxu1 %vm6620_vm0, %v6621_v4 }
 0x9f5   :  { %v1486_v7 = vpop.f32.mrb[44].mxu0 }
 0x9f6   :  { %v5519_v43 = vpop.f32.mrb[45].mxu0  ;;  %5535 = vmatmul.mubr.msk.f32.gmra.mrb[58].mxu1 %vm383_vm4, %v1486_v7 }
 0x9f7   :  { %5537 = vmatprep.mubr.msk.f32.mxu1 %vm6620_vm0, %v6621_v4 }
 0x9f9   :  { %v1491_v42 = vpop.f32.mrb[46].mxu0 }
 0x9fa   :  { %v5522_v15 = vpop.f32.mrb[47].mxu0  ;;  %5538 = vmatmul.mubr.msk.f32.gmra.mrb[60].mxu1 %vm383_vm4, %v1491_v42 }
 0x9fb   :  { %5575 = vmatprep.mubr.msk.f32.mxu1 %vm6620_vm0, %v6621_v4 }
 0xa03   :  { %v1711_v20 = vpop.f32.mrb[48].mxu0 }
 0xa04   :  { %v1712_v57 = vadd.f32 %v6607_v52, %v1711_v20  ;;  %v5552_v27 = vpop.f32.mrb[49].mxu0 }
 0xa06   :  { %v1735_v2 = vsel %vm494_vm6, %v1712_v57, -inf }
 0xa07   :  { %1736 = vmax.xlane.f32.xlu0 %v1735_v2  ;;  %v1716_v3 = vpop.f32.mrb[50].mxu0 }
 0xa08   :  { %v1717_v49 = vadd.f32 %v6608_v11, %v1716_v3  ;;  %v5555_v62 = vpop.f32.mrb[51].mxu0 }
 0xa0a   :  { %v1738_v30 = vsel %vm494_vm6, %v1717_v49, -inf }
 0xa0b   :  { %1739 = vmax.xlane.f32.xlu1 %v1738_v30  ;;  %v1721_v54 = vpop.f32.mrb[52].mxu0 }
 0xa0c   :  { %v1722_v28 = vadd.f32 %v6609_v50, %v1721_v54  ;;  %v5558_v48 = vpop.f32.mrb[53].mxu0 }
 0xa0e   :  { %v1741_v33 = vsel %vm494_vm6, %v1722_v28, -inf }
 0xa0f   :  { %1742 = vmax.xlane.f32.xlu0 %v1741_v33  ;;  %v1726_v58 = vpop.f32.mrb[54].mxu0 }
 0xa10   :  { %v1727_v34 = vadd.f32 %v6610_v5, %v1726_v58  ;;  %v5561_v9 = vpop.f32.mrb[55].mxu0 }
 0xa12   :  { %v1744_v17 = vsel %vm494_vm6, %v1727_v34, -inf }
 0xa13   :  { %1745 = vmax.xlane.f32.xlu0 %v1744_v17  ;;  %v1731_v1 = vpop.f32.mrb[56].mxu0 }
 0xa14   :  { %v1732_v38 = vadd.f32 %v6611_v18, %v1731_v1  ;;  %v5564_v12 = vpop.f32.mrb[57].mxu0 }
 0xa16   :  { %v1747_v39 = vsel %vm507_vm7, %v1732_v38, -inf }
 0xa17   :  { %1748 = vmax.xlane.f32.xlu0 %v1747_v39 }
 0xa2d   :  { %6298 = vrot.lane.b32.xlu0 %v6871_v6, %s6632_s3 }
 0xa94   :  { %v1737_v25 = vpop.xlane.xlu0 %1736 }
 0xa95   :  { %v1750_v44 = vsub.f32 %v1712_v57, %v1737_v25 }
 0xa97   :  { %v1755_v14 = vmul.f32 1.442695, %v1750_v44 }
 0xa98   :  { %v1740_v47 = vpop.xlane.xlu1 %1739 }
 0xa99   :  { %6457 = vpow2.f32 %v1755_v14  ;;  %v1751_v23 = vsub.f32 %v1717_v49, %v1740_v47 }
 0xa9b   :  { %v1757_v32 = vmul.f32 1.442695, %v1751_v23 }
 0xa9c   :  { %v1743_v51 = vpop.xlane.xlu0 %1742 }
 0xa9d   :  { %6459 = vpow2.f32 %v1757_v32  ;;  %v1752_v53 = vsub.f32 %v1722_v28, %v1743_v51 }
 0xa9f   :  { %v1759_v55 = vmul.f32 1.442695, %v1752_v53 }
 0xaa0   :  { %v1746_v35 = vpop.xlane.xlu0 %1745 }
 0xaa1   :  { %6461 = vpow2.f32 %v1759_v55  ;;  %v1753_v37 = vsub.f32 %v1727_v34, %v1746_v35 }
 0xaa3   :  { %v6458_v59 = vpop.eup %6457  ;;  %v1761_v61 = vmul.f32 1.442695, %v1753_v37 }
 0xaa4   :  { %v1749_v63 = vpop.xlane.xlu0 %1748  ;;  %v1765_v10 = vsel %vm494_vm6, %v6458_v59, 0.0 }
 0xaa5   :  { %6463 = vpow2.f32 %v1761_v61  ;;  %1766 = vadd.xlane.f32.xlu0 %v1765_v10  ;;  %v1754_v9 = vsub.f32 %v1732_v38, %v1749_v63  ;;  %v367_v61 = vld [vmem:[%s8309_s5 + $0x18] sm:$0xff] }
 0xaa6   :  { %5591 = vmatpush3.msra.mxu0 %v367_v61 }
 0xaa7   :  { %v6460_v6 = vpop.eup %6459  ;;  %6109 = vmatprep.subr.bf16.mxu0 %v6619_v0 }
 0xaa8   :  { %v6299_v7 = vpop.permute.xlu0 %6298  ;;  %v1768_v43 = vsel %vm494_vm6, %v6460_v6, 0.0 }
 0xaa9   :  { %v6301_v42 = vunpack.i.h.bf16 %v6299_v7  ;;  %v6300_v15 = vunpack.i.l.bf16 %v6299_v7  ;;  %1769 = vadd.xlane.f32.xlu1 %v1768_v43 }
 0xaab   :  { %v6462_v20 = vpop.eup %6461  ;;  %v6098_v52 = vpack.c.bf16 %v6301_v42, %v6300_v15 }
 0xaac   :  { %v1771_v57 = vsel %vm494_vm6, %v6462_v20, 0.0 }
 0xaad   :  { %1772 = vadd.xlane.f32.xlu0 %v1771_v57  ;;  %6099 = vmatpush3.bf16.msra.mxu1 %v6098_v52 }
 0xaae   :  { %6100 = vmatprep.subr.bf16.mxu1 %v6619_v0 }
 0xaaf   :  { %v6464_v27 = vpop.eup %6463 }
 0xab0   :  { %v1774_v2 = vsel %vm494_vm6, %v6464_v27, 0.0 }
 0xab1   :  { %1775 = vadd.xlane.f32.xlu1 %v1774_v2 }
 0xabd   :  { %v1576_v3 = vpop.f32.mrb[52].mxu1 }
 0xabe   :  { %v7344_v11 = vadd.f32 %v1576_v3, %v7196_v40  ;;  %v5527_v49 = vpop.f32.mrb[53].mxu1 }
 0xabf   :  { %v7405_v49 = vld [vmem:[%s8307_s8] sm:$0xff] }
 0xac1   :  { %v1581_v62 = vpop.f32.mrb[54].mxu1 }
 0xac2   :  { %v7347_v30 = vadd.f32 %v1581_v62, %v7198_v45  ;;  %v5530_v54 = vpop.f32.mrb[55].mxu1  ;;  %6303 = vrot.lane.b32.xlu1 %v6881_v13, %s6632_s3  ;;  %v1763_v13 = vmul.f32 1.442695, %v1754_v9 }
 0xac3   :  { %1798 = vrot.lane.b32.xlu0 %v6887_v16, %s6632_s3 }
 0xac4   :  { %6465 = vpow2.f32 %v1763_v13 }
 0xac5   :  { %v1586_v50 = vpop.f32.mrb[56].mxu1 }
 0xac6   :  { %v7354_v28 = vadd.f32 %v1586_v50, %v7200_v46  ;;  %v5533_v48 = vpop.f32.mrb[57].mxu1 }
 0xac9   :  { %v1591_v33 = vpop.f32.mrb[58].mxu1 }
 0xaca   :  { %v7357_v40 = vadd.f32 %v1591_v33, %v7202_v8  ;;  %v5536_v58 = vpop.f32.mrb[59].mxu1 }
 0xacd   :  { %v1596_v5 = vpop.f32.mrb[60].mxu1 }
 0xace   :  { %v7360_v45 = vadd.f32 %v1596_v5, %v7204_v56  ;;  %v5539_v34 = vpop.f32.mrb[61].mxu1  ;;  %v6466_v17 = vpop.eup %6465 }
 0xacf   :  { %v1777_v16 = vsel %vm507_vm7, %v6466_v17, 0.0 }
 0xae6   :  { %1778 = vadd.xlane.f32.xlu1 %v1777_v16 }
 0xb32   :  { %v1767_v46 = vpop.xlane.xlu0 %1766 }
 0xb33   :  { %6467 = vrcp.f32 %v1767_v46 }
 0xb36   :  { %v1770_v1 = vpop.xlane.xlu1 %1769 }
 0xb37   :  { %6469 = vrcp.f32 %v1770_v1 }
 0xb3a   :  { %v1773_v8 = vpop.xlane.xlu0 %1772 }
 0xb3b   :  { %6471 = vrcp.f32 %v1773_v8 }
 0xb3d   :  { %v6468_v44 = vpop.eup %6467 }
 0xb3e   :  { %v1776_v18 = vpop.xlane.xlu1 %1775  ;;  %v1785_v38 = vmul.f32 %v6468_v44, %v6458_v59  ;;  %v1799_v14 = vpop.permute.xlu0 %1798 }
 0xb3f   :  { %6473 = vrcp.f32 %v1776_v18 }
 0xb41   :  { %v6470_v47 = vpop.eup %6469 }
 0xb42   :  { %v6304_v12 = vpop.permute.xlu1 %6303  ;;  %v1786_v23 = vmul.f32 %v6470_v47, %v6460_v6 }
 0xb43   :  { %v6306_v39 = vunpack.i.h.bf16 %v6304_v12  ;;  %v6305_v25 = vunpack.i.l.bf16 %v6304_v12 }
 0xb45   :  { %v6101_v56 = vpack.c.bf16 %v6306_v39, %v6305_v25  ;;  %v6472_v32 = vpop.eup %6471 }
 0xb46   :  { %v1787_v51 = vmul.f32 %v6472_v32, %v6462_v20 }
 0xb47   :  { %6102 = vmatpush3.bf16.msra.mxu1 %v6101_v56 }
 0xb48   :  { %5573 = vmatprep.subr.mxu1 %v6621_v4 }
 0xb49   :  { %v6474_v53 = vpop.eup %6473 }
 0xb4a   :  { %v1788_v55 = vmul.f32 %v6474_v53, %v6464_v27  ;;  %v2028_v27 = vsub.s32 3, %v6831_v19 }
 0xb4b   :  { %5574 = vmatpush3.msk.msra.mxu1 %vm580_vm8, %v1799_v14 }
 0xb4c   :  { %5576 = vmatmul.mubr.msk.f32.vlgmr.msra.gmra.mrb[62].mxu1 %vm494_vm6, %v1785_v38  ;;  %6103 = vmatprep.subr.bf16.mxu1 %v6619_v0  ;;  %v2029_v62 = vrot.slane %v7405_v49, %v2028_v27 }
 0xb4d   :  { %5578 = vmatprep.mubr.msk.f32.mxu1 %vm6620_vm0, %v6621_v4 }
 0xb50   :  { %5579 = vmatmul.mubr.msk.f32.gmra.mrb[64].mxu1 %vm494_vm6, %v1786_v23 }
 0xb51   :  { %5581 = vmatprep.mubr.msk.f32.mxu1 %vm6620_vm0, %v6621_v4 }
 0xb54   :  { %5582 = vmatmul.mubr.msk.f32.gmra.mrb[66].mxu1 %vm494_vm6, %v1787_v51 }
 0xb55   :  { %5584 = vmatprep.mubr.msk.f32.mxu1 %vm6620_vm0, %v6621_v4 }
 0xb58   :  { %5585 = vmatmul.mubr.msk.f32.gmra.mrb[68].mxu1 %vm494_vm6, %v1788_v55 }
 0xb59   :  { %5587 = vmatprep.mubr.msk.f32.mxu1 %vm6620_vm0, %v6621_v4 }
 0xb73   :  { %v1779_v35 = vpop.xlane.xlu1 %1778 }
 0xb74   :  { %6475 = vrcp.f32 %v1779_v35 }
 0xb7e   :  { %v6476_v37 = vpop.eup %6475 }
 0xb7f   :  { %v1789_v59 = vmul.f32 %v6476_v37, %v6466_v17 }
 0xb81   :  { %5588 = vmatmul.mubr.msk.f32.gmra.mrb[70].mxu1 %vm494_vm6, %v1789_v59 }
 0xb82   :  { %5615 = vmatprep.mubr.msk.f32.mxu1 %vm6620_vm0, %v6621_v4 }
 0xc1f   :  { %v1887_v63 = vpop.f32.mrb[62].mxu1 }
 0xc20   :  { %v5577_v10 = vpop.f32.mrb[63].mxu1  ;;  %5593 = vmatmul.mubr.msk.f32.vlgmr.msra.gmra.mrb[58].mxu0 %vm383_vm4, %v1887_v63 }
 0xc21   :  { %5595 = vmatprep.mubr.msk.f32.mxu0 %vm6620_vm0, %v6621_v4 }
 0xc23   :  { %v1892_v6 = vpop.f32.mrb[64].mxu1 }
 0xc24   :  { %v5580_v7 = vpop.f32.mrb[65].mxu1  ;;  %5596 = vmatmul.mubr.msk.f32.gmra.mrb[60].mxu0 %vm383_vm4, %v1892_v6 }
 0xc25   :  { %5598 = vmatprep.mubr.msk.f32.mxu0 %vm6620_vm0, %v6621_v4 }
 0xc27   :  { %v1897_v43 = vpop.f32.mrb[66].mxu1 }
 0xc28   :  { %v5583_v42 = vpop.f32.mrb[67].mxu1  ;;  %5599 = vmatmul.mubr.msk.f32.gmra.mrb[62].mxu0 %vm383_vm4, %v1897_v43 }
 0xc29   :  { %5601 = vmatprep.mubr.msk.f32.mxu0 %vm6620_vm0, %v6621_v4 }
 0xc2b   :  { %v1902_v15 = vpop.f32.mrb[68].mxu1 }
 0xc2c   :  { %v5586_v20 = vpop.f32.mrb[69].mxu1  ;;  %5602 = vmatmul.mubr.msk.f32.gmra.mrb[64].mxu0 %vm383_vm4, %v1902_v15  ;;  %v2118_v15 = vld [vmem:[%s8310_s6] sm:$0xff] }
 0xc2d   :  { %5604 = vmatprep.mubr.msk.f32.mxu0 %vm6620_vm0, %v6621_v4  ;;  %v2119_v20 = vld [vmem:[%s8310_s6 + $0x8] sm:$0xff] }
 0xc54   :  { %v1907_v52 = vpop.f32.mrb[70].mxu1 }
 0xc55   :  { %v5589_v57 = vpop.f32.mrb[71].mxu1  ;;  %5605 = vmatmul.mubr.msk.f32.gmra.mrb[66].mxu0 %vm383_vm4, %v1907_v52  ;;  %v6104_v52 = vpack.c.bf16 %v2119_v20, %v2118_v15  ;;  %v2276_v15 = vld [vmem:[%s8311_s7] sm:$0xff]  ;;  %v2277_v20 = vld [vmem:[%s8311_s7 + $0x8] sm:$0xff] }
 0xc56   :  { %5646 = vmatprep.mubr.msk.f32.mxu0 %vm6620_vm0, %v6621_v4  ;;  %v2120_v57 = vld [vmem:[%s8310_s6 + $0x10] sm:$0xff] }
 0xc57   :  { %6105 = vmatpush3.bf16.msra.mxu1 %v6104_v52  ;;  %v6110_v52 = vpack.c.bf16 %v2277_v20, %v2276_v15 }
 0xc58   :  { %6106 = vmatprep.subr.bf16.mxu1 %v6619_v0 }
 0xc59   :  { %6111 = vmatpush3.bf16.msra.mxu0 %v6110_v52 }
 0xc5a   :  { %6112 = vmatprep.subr.bf16.mxu0 %v6619_v0 }
 0xcf3   :  { %v1992_v2 = vpop.f32.mrb[58].mxu0 }
 0xcf4   :  { %v2016_v3 = vadd.f32 %v1992_v2, %v7344_v11  ;;  %v5594_v54 = vpop.f32.mrb[59].mxu0  ;;  %v2121_v2 = vld [vmem:[%s8310_s6 + $0x18] sm:$0xff] }
 0xcf6   :  { %v2021_v50 = vadd.f32 %v2016_v3, %v6755_v21  ;;  %v6107_v3 = vpack.c.bf16 %v2121_v2, %v2120_v57  ;;  %v2278_v57 = vld [vmem:[%s8311_s7 + $0x10] sm:$0xff]  ;;  %v2279_v2 = vld [vmem:[%s8311_s7 + $0x18] sm:$0xff] }
 0xcf7   :  { %v1997_v48 = vpop.f32.mrb[60].mxu0 }
 0xcf8   :  { %v7411_v33 = vadd.f32 %v2029_v62, %v2021_v50  ;;  %v2017_v58 = vadd.f32 %v1997_v48, %v7347_v30  ;;  %v5597_v5 = vpop.f32.mrb[61].mxu0  ;;  %6108 = vmatpush3.bf16.msra.mxu1 %v6107_v3  ;;  %v6113_v3 = vpack.c.bf16 %v2279_v2, %v2278_v57 }
 0xcf9   :  { %6121 = vmatprep.subr.bf16.mxu1 %v6619_v0 }
 0xcfa   :  { %v2022_v11 = vadd.f32 %v2017_v58, %v6762_v26  ;;  %v2035_v34 = vsel %vm165_vm2, %v7411_v33, 0.0  ;;  %6114 = vmatpush3.bf16.msra.mxu0 %v6113_v3 }
 0xcfb   :  { %2036 = vadd.xlane.f32.xlu0 %v2035_v34  ;;  %v2002_v9 = vpop.f32.mrb[62].mxu0  ;;  %6115 = vmatprep.subr.bf16.mxu0 %v6619_v0 }
 0xcfc   :  { %v7417_v13 = vadd.f32 %v2029_v62, %v2022_v11  ;;  %v2018_v17 = vadd.f32 %v2002_v9, %v7354_v28  ;;  %v5600_v16 = vpop.f32.mrb[63].mxu0 }
 0xcfe   :  { %v2023_v21 = vadd.f32 %v2018_v17, %v6769_v31  ;;  %v2038_v46 = vsel %vm165_vm2, %v7417_v13, 0.0 }
 0xcff   :  { %2039 = vadd.xlane.f32.xlu1 %v2038_v46  ;;  %v2007_v30 = vpop.f32.mrb[64].mxu0 }
 0xd00   :  { %v7423_v1 = vadd.f32 %v2029_v62, %v2023_v21  ;;  %v2019_v26 = vadd.f32 %v2007_v30, %v7357_v40  ;;  %v5603_v18 = vpop.f32.mrb[65].mxu0  ;;  %v2102_v30 = vsub.s32 4, %v6831_v19 }
 0xd01   :  { %v2111_v18 = vsub.s32 5, %v6831_v19 }
 0xd02   :  { %v2024_v8 = vadd.f32 %v2019_v26, %v6776_v36  ;;  %v2041_v12 = vsel %vm165_vm2, %v7423_v1, 0.0 }
 0xd03   :  { %2042 = vadd.xlane.f32.xlu0 %v2041_v12 }
 0xd04   :  { %v7429_v28 = vadd.f32 %v2029_v62, %v2024_v8 }
 0xd06   :  { %v2044_v31 = vsel %vm165_vm2, %v7429_v28, 0.0 }
 0xd07   :  { %2045 = vadd.xlane.f32.xlu1 %v2044_v31  ;;  %v2103_v31 = vrot.slane %v7405_v49, %v2102_v30 }
 0xd28   :  { %v2012_v39 = vpop.f32.mrb[66].mxu0 }
 0xd29   :  { %v2020_v25 = vadd.f32 %v2012_v39, %v7360_v45  ;;  %v5606_v56 = vpop.f32.mrb[67].mxu0 }
 0xd2a   :  { %v2112_v56 = vrot.slane %v7405_v49, %v2111_v18 }
 0xd2b   :  { %v2025_v44 = vadd.f32 %v2020_v25, %v6783_v41 }
 0xd2d   :  { %v7435_v40 = vadd.f32 %v2029_v62, %v2025_v44 }
 0xd2f   :  { %v2047_v36 = vsel %vm178_vm3, %v7435_v40, 0.0 }
 0xd30   :  { %2048 = vadd.xlane.f32.xlu0 %v2047_v36 }
 0xd88   :  { %v2037_v38 = vpop.xlane.xlu0 %2036 }
 0xd89   :  { %v2050_v14 = vmul.f32 0.03125, %v2037_v38 }
 0xd8b   :  { %v2055_v47 = vsub.f32 %v7411_v33, %v2050_v14 }
 0xd8c   :  { %v2040_v23 = vpop.xlane.xlu1 %2039 }
 0xd8d   :  { %v2051_v32 = vmul.f32 0.03125, %v2040_v23  ;;  %v2060_v51 = vmul.f32 %v2055_v47, %v2055_v47 }
 0xd8f   :  { %v2056_v53 = vsub.f32 %v7417_v13, %v2051_v32  ;;  %v2065_v45 = vsel %vm165_vm2, %v2060_v51, 0.0 }
 0xd90   :  { %v2043_v55 = vpop.xlane.xlu0 %2042  ;;  %2066 = vadd.xlane.f32.xlu1 %v2065_v45 }
 0xd91   :  { %v2052_v41 = vmul.f32 0.03125, %v2043_v55  ;;  %v2061_v35 = vmul.f32 %v2056_v53, %v2056_v53 }
 0xd93   :  { %v2057_v37 = vsub.f32 %v7423_v1, %v2052_v41  ;;  %v2068_v59 = vsel %vm165_vm2, %v2061_v35, 0.0 }
 0xd94   :  { %v2046_v61 = vpop.xlane.xlu1 %2045  ;;  %2069 = vadd.xlane.f32.xlu0 %v2068_v59 }
 0xd95   :  { %v2053_v63 = vmul.f32 0.03125, %v2046_v61  ;;  %v2062_v10 = vmul.f32 %v2057_v37, %v2057_v37 }
 0xd97   :  { %v2058_v6 = vsub.f32 %v7429_v28, %v2053_v63  ;;  %v2071_v7 = vsel %vm165_vm2, %v2062_v10, 0.0 }
 0xd98   :  { %2072 = vadd.xlane.f32.xlu1 %v2071_v7 }
 0xd99   :  { %v2063_v43 = vmul.f32 %v2058_v6, %v2058_v6 }
 0xd9b   :  { %v2074_v42 = vsel %vm165_vm2, %v2063_v43, 0.0 }
 0xd9c   :  { %2075 = vadd.xlane.f32.xlu0 %v2074_v42 }
 0xdbd   :  { %v2049_v62 = vpop.xlane.xlu0 %2048 }
 0xdbe   :  { %v2054_v54 = vmul.f32 0.03125, %v2049_v62  ;;  %v2280_v62 = vld [vmem:[%s8311_s7 + $0x20] sm:$0xff] }
 0xdc0   :  { %v2059_v50 = vsub.f32 %v7435_v40, %v2054_v54  ;;  %v2281_v54 = vld [vmem:[%s8311_s7 + $0x28] sm:$0xff] }
 0xdc2   :  { %v2064_v48 = vmul.f32 %v2059_v50, %v2059_v50 }
 0xdc4   :  { %v2077_v58 = vsel %vm178_vm3, %v2064_v48, 0.0  ;;  %v2282_v48 = vld [vmem:[%s8311_s7 + $0x30] sm:$0xff] }
 0xdc5   :  { %2078 = vadd.xlane.f32.xlu1 %v2077_v58  ;;  %v2283_v58 = vld [vmem:[%s8311_s7 + $0x38] sm:$0xff] }
 0xe1d   :  { %v2067_v5 = vpop.xlane.xlu1 %2066 }
 0xe1e   :  { %v2080_v11 = vmul.f32 0.03125, %v2067_v5  ;;  %v6119_v5 = vpack.c.bf16 %v2283_v58, %v2282_v48 }
 0xe20   :  { %v2085_v34 = vadd.f32 1e-05, %v2080_v11  ;;  %v2124_v11 = vsub.s32 6, %v6831_v19 }
 0xe21   :  { %v2070_v9 = vpop.xlane.xlu0 %2069 }
 0xe22   :  { %6477 = vrsqrt.f32 %v2085_v34  ;;  %v2081_v17 = vmul.f32 0.03125, %v2070_v9  ;;  %v2125_v34 = vrot.slane %v7405_v49, %v2124_v11 }
 0xe24   :  { %v2086_v16 = vadd.f32 1e-05, %v2081_v17 }
 0xe25   :  { %v2073_v21 = vpop.xlane.xlu1 %2072 }
 0xe26   :  { %6479 = vrsqrt.f32 %v2086_v16  ;;  %v2082_v46 = vmul.f32 0.03125, %v2073_v21 }
 0xe28   :  { %v2087_v26 = vadd.f32 1e-05, %v2082_v46 }
 0xe29   :  { %v2076_v8 = vpop.xlane.xlu0 %2075 }
 0xe2a   :  { %6481 = vrsqrt.f32 %v2087_v26  ;;  %v2083_v12 = vmul.f32 0.03125, %v2076_v8 }
 0xe2c   :  { %v6478_v39 = vpop.eup %6477  ;;  %v2088_v25 = vadd.f32 1e-05, %v2083_v12 }
 0xe2d   :  { %v2095_v44 = vmul.f32 %v6478_v39, %v2055_v47 }
 0xe2e   :  { %6483 = vrsqrt.f32 %v2088_v25 }
 0xe2f   :  { %v2104_v36 = vmul.f32 %v2103_v31, %v2095_v44 }
 0xe30   :  { %v6480_v38 = vpop.eup %6479 }
 0xe31   :  { %v2113_v14 = vadd.f32 %v2112_v56, %v2104_v36  ;;  %v2096_v23 = vmul.f32 %v6480_v38, %v2056_v53 }
 0xe33   :  { %5616 = vmatmul.mubr.msk.f32.vlgmr.msra.gmra.mrb[72].mxu1 %vm165_vm2, %v2113_v14  ;;  %v2105_v32 = vmul.f32 %v2103_v31, %v2096_v23 }
 0xe34   :  { %v6482_v51 = vpop.eup %6481  ;;  %5618 = vmatprep.mubr.msk.f32.mxu1 %vm6620_vm0, %v6621_v4 }
 0xe35   :  { %v2114_v45 = vadd.f32 %v2112_v56, %v2105_v32  ;;  %v2097_v55 = vmul.f32 %v6482_v51, %v2057_v37 }
 0xe37   :  { %5619 = vmatmul.mubr.msk.f32.gmra.mrb[74].mxu1 %vm165_vm2, %v2114_v45  ;;  %v2106_v41 = vmul.f32 %v2103_v31, %v2097_v55 }
 0xe38   :  { %v6484_v35 = vpop.eup %6483  ;;  %5621 = vmatprep.mubr.msk.f32.mxu1 %vm6620_vm0, %v6621_v4 }
 0xe39   :  { %v2115_v47 = vadd.f32 %v2112_v56, %v2106_v41  ;;  %v2098_v59 = vmul.f32 %v6484_v35, %v2058_v6 }
 0xe3b   :  { %5622 = vmatmul.mubr.msk.f32.gmra.mrb[76].mxu1 %vm165_vm2, %v2115_v47  ;;  %v2107_v53 = vmul.f32 %v2103_v31, %v2098_v59 }
 0xe3c   :  { %5624 = vmatprep.mubr.msk.f32.mxu1 %vm6620_vm0, %v6621_v4 }
 0xe3d   :  { %v2116_v61 = vadd.f32 %v2112_v56, %v2107_v53 }
 0xe3f   :  { %5625 = vmatmul.mubr.msk.f32.gmra.mrb[78].mxu1 %vm165_vm2, %v2116_v61 }
 0xe40   :  { %5627 = vmatprep.mubr.msk.f32.mxu1 %vm6620_vm0, %v6621_v4 }
 0xe52   :  { %v2079_v37 = vpop.xlane.xlu1 %2078 }
 0xe53   :  { %v2084_v63 = vmul.f32 0.03125, %v2079_v37 }
 0xe55   :  { %v2089_v10 = vadd.f32 1e-05, %v2084_v63 }
 0xe57   :  { %6485 = vrsqrt.f32 %v2089_v10 }
 0xe61   :  { %v6486_v7 = vpop.eup %6485 }
 0xe62   :  { %v2099_v43 = vmul.f32 %v6486_v7, %v2059_v50  ;;  %v6116_v50 = vpack.c.bf16 %v2281_v54, %v2280_v62 }
 0xe64   :  { %v2108_v42 = vmul.f32 %v2103_v31, %v2099_v43  ;;  %6117 = vmatpush3.bf16.msra.mxu0 %v6116_v50 }
 0xe65   :  { %6118 = vmatprep.subr.bf16.mxu0 %v6619_v0 }
 0xe66   :  { %v2117_v6 = vadd.f32 %v2112_v56, %v2108_v42 }
 0xe68   :  { %5628 = vmatmul.mubr.msk.f32.gmra.mrb[80].mxu1 %vm165_vm2, %v2117_v6  ;;  %6120 = vmatpush3.bf16.msra.mxu0 %v6119_v5 }
 0xe69   :  { %5669 = vmatprep.mubr.msk.f32.mxu1 %vm6620_vm0, %v6621_v4  ;;  %6127 = vmatprep.subr.bf16.mxu0 %v6619_v0 }
 0xf06   :  { %v2207_v9 = vpop.f32.mrb[72].mxu1 }
 0xf07   :  { %v2208_v17 = vadd.f32 %v2207_v9, %v2125_v34  ;;  %v5617_v16 = vpop.f32.mrb[73].mxu1 }
 0xf09   :  { %v2236_v21 = vmul.f32 %v2208_v17, %v2208_v17  ;;  %v2231_v6 = vmul.f32 0.5, %v2208_v17 }
 0xf0a   :  { %v2212_v46 = vpop.f32.mrb[74].mxu1 }
 0xf0b   :  { %v2241_v26 = vmul.f32 %v2236_v21, %v2208_v17  ;;  %v2213_v8 = vadd.f32 %v2212_v46, %v2125_v34  ;;  %v5620_v12 = vpop.f32.mrb[75].mxu1 }
 0xf0d   :  { %v2246_v31 = vmul.f32 0.044715, %v2241_v26  ;;  %v2237_v39 = vmul.f32 %v2213_v8, %v2213_v8  ;;  %v2232_v57 = vmul.f32 0.5, %v2213_v8 }
 0xf0e   :  { %v2217_v25 = vpop.f32.mrb[76].mxu1 }
 0xf0f   :  { %v2251_v56 = vadd.f32 %v2246_v31, %v2208_v17  ;;  %v2242_v44 = vmul.f32 %v2237_v39, %v2213_v8  ;;  %v2218_v36 = vadd.f32 %v2217_v25, %v2125_v34  ;;  %v5623_v38 = vpop.f32.mrb[77].mxu1 }
 0xf10   :  { %v2396_v38 = vsub.s32 7, %v6831_v19 }
 0xf11   :  { %v2256_v14 = vmul.f32 0.7978846, %v2251_v56  ;;  %v2247_v23 = vmul.f32 0.044715, %v2242_v44  ;;  %v2238_v32 = vmul.f32 %v2218_v36, %v2218_v36  ;;  %v2233_v54 = vmul.f32 0.5, %v2218_v36 }
 0xf12   :  { %v2222_v51 = vpop.f32.mrb[78].mxu1 }
 0xf13   :  { %6487 = vtanh.f32 %v2256_v14  ;;  %v2252_v45 = vadd.f32 %v2247_v23, %v2213_v8  ;;  %v2243_v55 = vmul.f32 %v2238_v32, %v2218_v36  ;;  %v2223_v41 = vadd.f32 %v2222_v51, %v2125_v34  ;;  %v5626_v35 = vpop.f32.mrb[79].mxu1 }
 0xf15   :  { %v2257_v47 = vmul.f32 0.7978846, %v2252_v45  ;;  %v2248_v59 = vmul.f32 0.044715, %v2243_v55  ;;  %v2239_v53 = vmul.f32 %v2223_v41, %v2223_v41  ;;  %v2234_v5 = vmul.f32 0.5, %v2223_v41 }
 0xf17   :  { %6489 = vtanh.f32 %v2257_v47  ;;  %v2253_v61 = vadd.f32 %v2248_v59, %v2218_v36  ;;  %v2244_v37 = vmul.f32 %v2239_v53, %v2223_v41 }
 0xf19   :  { %v2258_v63 = vmul.f32 0.7978846, %v2253_v61  ;;  %v2249_v10 = vmul.f32 0.044715, %v2244_v37 }
 0xf1b   :  { %6491 = vtanh.f32 %v2258_v63  ;;  %v2254_v7 = vadd.f32 %v2249_v10, %v2223_v41 }
 0xf1d   :  { %v6488_v43 = vpop.eup %6487  ;;  %v2259_v42 = vmul.f32 0.7978846, %v2254_v7 }
 0xf1e   :  { %v2266_v15 = vadd.f32 1.0, %v6488_v43 }
 0xf1f   :  { %6493 = vtanh.f32 %v2259_v42 }
 0xf20   :  { %v2271_v20 = vmul.f32 %v2266_v15, %v2231_v6 }
 0xf21   :  { %v6490_v52 = vpop.eup %6489 }
 0xf22   :  { %5647 = vmatmul.mubr.msk.f32.vlgmr.msra.gmra.mrb[68].mxu0 %vm53_vm1, %v2271_v20  ;;  %v2267_v2 = vadd.f32 1.0, %v6490_v52 }
 0xf23   :  { %5649 = vmatprep.mubr.msk.f32.mxu0 %vm6620_vm0, %v6621_v4 }
 0xf24   :  { %v2272_v3 = vmul.f32 %v2267_v2, %v2232_v57 }
 0xf25   :  { %v6492_v62 = vpop.eup %6491 }
 0xf26   :  { %5650 = vmatmul.mubr.msk.f32.gmra.mrb[70].mxu0 %vm53_vm1, %v2272_v3  ;;  %v2268_v50 = vadd.f32 1.0, %v6492_v62 }
 0xf27   :  { %5652 = vmatprep.mubr.msk.f32.mxu0 %vm6620_vm0, %v6621_v4 }
 0xf28   :  { %v2273_v48 = vmul.f32 %v2268_v50, %v2233_v54 }
 0xf29   :  { %v6494_v58 = vpop.eup %6493 }
 0xf2a   :  { %5653 = vmatmul.mubr.msk.f32.gmra.mrb[72].mxu0 %vm53_vm1, %v2273_v48  ;;  %v2269_v9 = vadd.f32 1.0, %v6494_v58 }
 0xf2b   :  { %5655 = vmatprep.mubr.msk.f32.mxu0 %vm6620_vm0, %v6621_v4 }
 0xf2c   :  { %v2274_v17 = vmul.f32 %v2269_v9, %v2234_v5 }
 0xf2e   :  { %5656 = vmatmul.mubr.msk.f32.gmra.mrb[74].mxu0 %vm53_vm1, %v2274_v17 }
 0xf2f   :  { %5658 = vmatprep.mubr.msk.f32.mxu0 %vm6620_vm0, %v6621_v4 }
 0xf3b   :  { %v2227_v16 = vpop.f32.mrb[80].mxu1 }
 0xf3c   :  { %v2228_v21 = vadd.f32 %v2227_v16, %v2125_v34  ;;  %v5629_v46 = vpop.f32.mrb[81].mxu1  ;;  %v2397_v34 = vrot.slane %v7405_v49, %v2396_v38 }
 0xf3e   :  { %v2240_v26 = vmul.f32 %v2228_v21, %v2228_v21  ;;  %v2235_v56 = vmul.f32 0.5, %v2228_v21 }
 0xf40   :  { %v2245_v8 = vmul.f32 %v2240_v26, %v2228_v21 }
 0xf42   :  { %v2250_v12 = vmul.f32 0.044715, %v2245_v8 }
 0xf44   :  { %v2255_v31 = vadd.f32 %v2250_v12, %v2228_v21 }
 0xf46   :  { %v2260_v39 = vmul.f32 0.7978846, %v2255_v31  ;;  %v4868_v31 = vld [vmem:[%s8306_s4 + $0x20] sm:$0xff] }
 0xf48   :  { %6495 = vtanh.f32 %v2260_v39  ;;  %v4869_v39 = vld [vmem:[%s8306_s4 + $0x28] sm:$0xff] }
 0xf52   :  { %v6496_v25 = vpop.eup %6495 }
 0xf53   :  { %v2270_v44 = vadd.f32 1.0, %v6496_v25  ;;  %v6122_v25 = vpack.c.bf16 %v4869_v39, %v4868_v31 }
 0xf55   :  { %v2275_v36 = vmul.f32 %v2270_v44, %v2235_v56  ;;  %6123 = vmatpush3.bf16.msra.mxu1 %v6122_v25  ;;  %v4870_v56 = vld [vmem:[%s8306_s4 + $0x30] sm:$0xff]  ;;  %v4871_v44 = vld [vmem:[%s8306_s4 + $0x38] sm:$0xff] }
 0xf56   :  { %6124 = vmatprep.subr.bf16.mxu1 %v6619_v0 }
 0xf57   :  { %5659 = vmatmul.mubr.msk.f32.gmra.mrb[76].mxu0 %vm53_vm1, %v2275_v36  ;;  %v6125_v36 = vpack.c.bf16 %v4871_v44, %v4870_v56 }
 0xf58   :  { %5694 = vmatprep.mubr.msk.f32.mxu0 %vm6620_vm0, %v6621_v4 }
 0xf59   :  { %6126 = vmatpush3.bf16.msra.mxu1 %v6125_v36 }
 0xf5a   :  { %6135 = vmatprep.subr.bf16.mxu1 %v6619_v0 }
 0xff5   :  { %v2365_v14 = vpop.f32.mrb[68].mxu0 }
 0xff6   :  { %v2389_v23 = vadd.f32 %v2365_v14, %v7411_v33  ;;  %v5648_v32 = vpop.f32.mrb[69].mxu0 }
 0xff8   :  { %v7538_v51 = vadd.f32 %v2397_v34, %v2389_v23 }
 0xff9   :  { %v2370_v45 = vpop.f32.mrb[70].mxu0 }
 0xffa   :  { %v2390_v55 = vadd.f32 %v2370_v45, %v7417_v13  ;;  %v5651_v41 = vpop.f32.mrb[71].mxu0  ;;  %v2405_v35 = vsel %vm165_vm2, %v7538_v51, 0.0 }
 0xffb   :  { %2406 = vadd.xlane.f32.xlu0 %v2405_v35 }
 0xffc   :  { %v7543_v47 = vadd.f32 %v2397_v34, %v2390_v55 }
 0xffd   :  { %v2375_v59 = vpop.f32.mrb[72].mxu0 }
 0xffe   :  { %v2391_v53 = vadd.f32 %v2375_v59, %v7423_v1  ;;  %v5654_v49 = vpop.f32.mrb[73].mxu0  ;;  %v2408_v33 = vsel %vm165_vm2, %v7543_v47, 0.0 }
 0xfff   :  { %2409 = vadd.xlane.f32.xlu1 %v2408_v33 }
0x1000   :  { %v7548_v61 = vadd.f32 %v2397_v34, %v2391_v53 }
0x1001   :  { %v2380_v37 = vpop.f32.mrb[74].mxu0 }
0x1002   :  { %v2392_v13 = vadd.f32 %v2380_v37, %v7429_v28  ;;  %v5657_v63 = vpop.f32.mrb[75].mxu0  ;;  %v2411_v10 = vsel %vm165_vm2, %v7548_v61, 0.0 }
0x1003   :  { %2412 = vadd.xlane.f32.xlu0 %v2411_v10 }
0x1004   :  { %v7553_v7 = vadd.f32 %v2397_v34, %v2392_v13  ;;  %v4867_v13 = vld [vmem:[%s8307_s8 + $0x8] sm:$0xff] }
0x1005   :  { %v2496_v39 = vrot.slane %v4867_v13, %v257_v60 }
0x1006   :  { %v2414_v1 = vsel %vm165_vm2, %v7553_v7, 0.0 }
0x1007   :  { %2415 = vadd.xlane.f32.xlu1 %v2414_v1 }
0x102a   :  { %v2385_v43 = vpop.f32.mrb[76].mxu0 }
0x102b   :  { %v2393_v42 = vadd.f32 %v2385_v43, %v7435_v40  ;;  %v5660_v6 = vpop.f32.mrb[77].mxu0  ;;  %v2473_v43 = vrot.slane %v4867_v13, %v235_v24 }
0x102d   :  { %v7558_v15 = vadd.f32 %v2397_v34, %v2393_v42 }
0x102f   :  { %v2417_v28 = vsel %vm178_vm3, %v7558_v15, 0.0 }
0x1030   :  { %2418 = vadd.xlane.f32.xlu0 %v2417_v28  ;;  %v2482_v28 = vrot.slane %v4867_v13, %v244_v29 }
0x1088   :  { %v2407_v20 = vpop.xlane.xlu0 %2406 }
0x1089   :  { %v2420_v52 = vmul.f32 0.03125, %v2407_v20 }
0x108b   :  { %v2425_v57 = vsub.f32 %v7538_v51, %v2420_v52 }
0x108c   :  { %v2410_v2 = vpop.xlane.xlu1 %2409 }
0x108d   :  { %v2421_v3 = vmul.f32 0.03125, %v2410_v2  ;;  %v2430_v62 = vmul.f32 %v2425_v57, %v2425_v57 }
0x108f   :  { %v2426_v54 = vsub.f32 %v7543_v47, %v2421_v3  ;;  %v2435_v50 = vsel %vm165_vm2, %v2430_v62, 0.0 }
0x1090   :  { %v2413_v48 = vpop.xlane.xlu0 %2412  ;;  %2436 = vadd.xlane.f32.xlu1 %v2435_v50 }
0x1091   :  { %v2422_v40 = vmul.f32 0.03125, %v2413_v48  ;;  %v2431_v58 = vmul.f32 %v2426_v54, %v2426_v54 }
0x1093   :  { %v2427_v5 = vsub.f32 %v7548_v61, %v2422_v40  ;;  %v2438_v9 = vsel %vm165_vm2, %v2431_v58, 0.0 }
0x1094   :  { %v2416_v17 = vpop.xlane.xlu1 %2415  ;;  %2439 = vadd.xlane.f32.xlu0 %v2438_v9 }
0x1095   :  { %v2423_v16 = vmul.f32 0.03125, %v2416_v17  ;;  %v2432_v21 = vmul.f32 %v2427_v5, %v2427_v5 }
0x1097   :  { %v2428_v46 = vsub.f32 %v7553_v7, %v2423_v16  ;;  %v2441_v26 = vsel %vm165_vm2, %v2432_v21, 0.0 }
0x1098   :  { %2442 = vadd.xlane.f32.xlu1 %v2441_v26 }
0x1099   :  { %v2433_v8 = vmul.f32 %v2428_v46, %v2428_v46 }
0x109b   :  { %v2444_v12 = vsel %vm165_vm2, %v2433_v8, 0.0 }
0x109c   :  { %2445 = vadd.xlane.f32.xlu0 %v2444_v12 }
0x10bd   :  { %v2419_v34 = vpop.xlane.xlu0 %2418 }
0x10be   :  { %v2424_v14 = vmul.f32 0.03125, %v2419_v34 }
0x10c0   :  { %v2429_v23 = vsub.f32 %v7558_v15, %v2424_v14 }
0x10c2   :  { %v2434_v32 = vmul.f32 %v2429_v23, %v2429_v23 }
0x10c4   :  { %v2447_v45 = vsel %vm178_vm3, %v2434_v32, 0.0 }
0x10c5   :  { %2448 = vadd.xlane.f32.xlu1 %v2447_v45 }
0x111d   :  { %v2437_v55 = vpop.xlane.xlu1 %2436 }
0x111e   :  { %v2450_v41 = vmul.f32 0.03125, %v2437_v55 }
0x1120   :  { %v2455_v35 = vadd.f32 1e-05, %v2450_v41 }
0x1121   :  { %v2440_v59 = vpop.xlane.xlu0 %2439 }
0x1122   :  { %6497 = vrsqrt.f32 %v2455_v35  ;;  %v2451_v53 = vmul.f32 0.03125, %v2440_v59 }
0x1124   :  { %v2456_v49 = vadd.f32 1e-05, %v2451_v53 }
0x1125   :  { %v2443_v33 = vpop.xlane.xlu1 %2442 }
0x1126   :  { %6499 = vrsqrt.f32 %v2456_v49  ;;  %v2452_v37 = vmul.f32 0.03125, %v2443_v33 }
0x1128   :  { %v2457_v63 = vadd.f32 1e-05, %v2452_v37 }
0x1129   :  { %v2446_v10 = vpop.xlane.xlu0 %2445 }
0x112a   :  { %6501 = vrsqrt.f32 %v2457_v63  ;;  %v2453_v1 = vmul.f32 0.03125, %v2446_v10 }
0x112c   :  { %v6498_v42 = vpop.eup %6497  ;;  %v2458_v6 = vadd.f32 1e-05, %v2453_v1 }
0x112d   :  { %v2465_v20 = vmul.f32 %v6498_v42, %v2425_v57 }
0x112e   :  { %6503 = vrsqrt.f32 %v2458_v6 }
0x112f   :  { %v2474_v52 = vmul.f32 %v2473_v43, %v2465_v20 }
0x1130   :  { %v6500_v2 = vpop.eup %6499 }
0x1131   :  { %v2483_v3 = vadd.f32 %v2482_v28, %v2474_v52  ;;  %v2466_v62 = vmul.f32 %v6500_v2, %v2426_v54 }
0x1133   :  { %5670 = vmatmul.mubr.msk.f32.vlgmr.msra.gmra.mrb[82].mxu1 %vm165_vm2, %v2483_v3  ;;  %v2475_v50 = vmul.f32 %v2473_v43, %v2466_v62 }
0x1134   :  { %v6502_v48 = vpop.eup %6501  ;;  %5672 = vmatprep.mubr.msk.f32.mxu1 %vm6620_vm0, %v6621_v4 }
0x1135   :  { %v2484_v40 = vadd.f32 %v2482_v28, %v2475_v50  ;;  %v2467_v24 = vmul.f32 %v6502_v48, %v2427_v5 }
0x1137   :  { %5673 = vmatmul.mubr.msk.f32.gmra.mrb[84].mxu1 %vm165_vm2, %v2484_v40  ;;  %v2476_v58 = vmul.f32 %v2473_v43, %v2467_v24 }
0x1138   :  { %v6504_v9 = vpop.eup %6503  ;;  %5675 = vmatprep.mubr.msk.f32.mxu1 %vm6620_vm0, %v6621_v4 }
0x1139   :  { %v2485_v29 = vadd.f32 %v2482_v28, %v2476_v58  ;;  %v2468_v57 = vmul.f32 %v6504_v9, %v2428_v46 }
0x113b   :  { %5676 = vmatmul.mubr.msk.f32.gmra.mrb[86].mxu1 %vm165_vm2, %v2485_v29  ;;  %v2477_v54 = vmul.f32 %v2473_v43, %v2468_v57 }
0x113c   :  { %5678 = vmatprep.mubr.msk.f32.mxu1 %vm6620_vm0, %v6621_v4 }
0x113d   :  { %v2486_v17 = vadd.f32 %v2482_v28, %v2477_v54 }
0x113f   :  { %5679 = vmatmul.mubr.msk.f32.gmra.mrb[88].mxu1 %vm165_vm2, %v2486_v17  ;;  %v7704_v17 = vld [vmem:[%s8308_s2] sm:$0xff] }
0x1140   :  { %5681 = vmatprep.mubr.msk.f32.mxu1 %vm6620_vm0, %v6621_v4 }
0x1152   :  { %v2449_v5 = vpop.xlane.xlu1 %2448 }
0x1153   :  { %v2454_v16 = vmul.f32 0.03125, %v2449_v5 }
0x1155   :  { %v2459_v21 = vadd.f32 1e-05, %v2454_v16 }
0x1157   :  { %6505 = vrsqrt.f32 %v2459_v21 }
0x1161   :  { %v6506_v26 = vpop.eup %6505 }
0x1162   :  { %v2469_v8 = vmul.f32 %v6506_v26, %v2429_v23 }
0x1164   :  { %v2478_v12 = vmul.f32 %v2473_v43, %v2469_v8  ;;  %v7711_v8 = vld [vmem:[%s8308_s2 + $0x8] sm:$0xff] }
0x1166   :  { %v2487_v46 = vadd.f32 %v2482_v28, %v2478_v12 }
0x1168   :  { %5682 = vmatmul.mubr.msk.f32.gmra.mrb[90].mxu1 %vm165_vm2, %v2487_v46 }
0x1169   :  { %5719 = vmatprep.mubr.msk.f32.mxu1 %vm6620_vm0, %v6621_v4 }
0x1206   :  { %v2578_v31 = vpop.f32.mrb[82].mxu1 }
0x1207   :  { %v5671_v25 = vpop.f32.mrb[83].mxu1  ;;  %v7610_v44 = vadd.f32 %v2578_v31, %v2496_v39 }
0x1208   :  { %v7718_v25 = vld [vmem:[%s8308_s2 + $0x10] sm:$0xff] }
0x120a   :  { %v2583_v56 = vpop.f32.mrb[84].mxu1 }
0x120b   :  { %v7612_v36 = vadd.f32 %v2583_v56, %v2496_v39  ;;  %v5674_v34 = vpop.f32.mrb[85].mxu1 }
0x120d   :  { %v7616_v14 = vpack.i.bf16 %v7612_v36, %v7610_v44 }
0x120e   :  { %v2588_v23 = vpop.f32.mrb[86].mxu1 }
0x120f   :  { %6308 = vrot.lane.b32.xlu0 %v7616_v14, %s6622_s15  ;;  %v5677_v32 = vpop.f32.mrb[87].mxu1  ;;  %v7620_v55 = vadd.f32 %v2588_v23, %v2496_v39 }
0x1212   :  { %v2593_v45 = vpop.f32.mrb[88].mxu1 }
0x1213   :  { %v7622_v60 = vadd.f32 %v2593_v45, %v2496_v39  ;;  %6318 = vrot.lane.b32.xlu0 %v7616_v14, %s6623_s16  ;;  %v5680_v41 = vpop.f32.mrb[89].mxu1  ;;  %v7725_v45 = vld [vmem:[%s8308_s2 + $0x18] sm:$0xff] }
0x1215   :  { %v7628_v35 = vpack.i.bf16 %v7622_v60, %v7620_v55 }
0x1217   :  { %6313 = vrot.lane.b32.xlu1 %v7628_v35, %s6622_s15 }
0x123b   :  { %v2598_v59 = vpop.f32.mrb[90].mxu1 }
0x123c   :  { %v7632_v53 = vadd.f32 %v2598_v59, %v2496_v39  ;;  %v5683_v49 = vpop.f32.mrb[91].mxu1 }
0x123e   :  { %2926 = vrot.lane.b32.xlu0 %v7632_v53, %s6623_s16  ;;  %2620 = vrot.lane.b32.xlu1 %v7632_v53, %s6622_s15 }
0x1242   :  { %2910 = vrot.lane.b32.xlu0 %v7612_v36, %s6624_s17  ;;  %6323 = vrot.lane.b32.xlu1 %v7628_v35, %s6623_s16 }
0x1246   :  { %2914 = vrot.lane.b32.xlu0 %v7622_v60, %s6624_s17  ;;  %2908 = vrot.lane.b32.xlu1 %v7610_v44, %s6624_s17 }
0x124a   :  { %2912 = vrot.lane.b32.xlu1 %v7620_v55, %s6624_s17 }
0x124e   :  { %2916 = vrot.lane.b32.xlu1 %v7632_v53, %s6624_s17 }
0x1281   :  { %v6309_v33 = vpop.permute.xlu0 %6308 }
0x1282   :  { %v6311_v37 = vunpack.i.h.bf16 %v6309_v33  ;;  %v6310_v13 = vunpack.i.l.bf16 %v6309_v33 }
0x1284   :  { %v6128_v63 = vpack.c.bf16 %v6311_v37, %v6310_v13  ;;  %v7732_v37 = vld [vmem:[%s8308_s2 + $0x20] sm:$0x3] }
0x1285   :  { %v6319_v6 = vpop.permute.xlu0 %6318 }
0x1286   :  { %6130 = vmatpush3.bf16.xpose.msk.msra.mxu0 %vm6907_vm5, %v6128_v63  ;;  %v6321_v28 = vunpack.i.h.bf16 %v6319_v6  ;;  %v6320_v20 = vunpack.i.l.bf16 %v6319_v6 }
0x1287   :  { %6131 = vmatprep.subr.bf16.mxu0 %v6619_v0 }
0x1288   :  { %v6142_v2 = vpack.c.bf16 %v6321_v28, %v6320_v20 }
0x1289   :  { %v6314_v10 = vpop.permute.xlu1 %6313 }
0x128a   :  { %v6316_v1 = vunpack.i.h.bf16 %v6314_v10  ;;  %v6315_v43 = vunpack.i.l.bf16 %v6314_v10 }
0x128c   :  { %v6132_v42 = vpack.c.bf16 %v6316_v1, %v6315_v43 }
0x128e   :  { %6134 = vmatpush3.bf16.xpose.msk.msra.mxu0 %vm6907_vm5, %v6132_v42 }
0x128f   :  { %5692 = vmatprep.subr.mxu0 %v6621_v4 }
0x12b0   :  { %v2621_v52 = vpop.permute.xlu1 %2620  ;;  %v2927_v40 = vpop.permute.xlu0 %2926 }
0x12b1   :  { %5693 = vmatpush3.xpose.msk.msra.mxu0 %vm383_vm4, %v2621_v52 }
0x12b2   :  { %6141 = vmatprep.subr.bf16.mxu0 %v6619_v0 }
0x12b4   :  { %v6324_v3 = vpop.permute.xlu1 %6323  ;;  %5695 = vmatmul.mubr.msk.f32.vlgmr.msra.gmra.mrb[78].mxu0 %vm383_vm4, %v7610_v44  ;;  %v2911_v58 = vpop.permute.xlu0 %2910 }
0x12b5   :  { %6144 = vmatpush3.bf16.xpose.msk.msra.mxu0 %vm6907_vm5, %v6142_v2  ;;  %5697 = vmatprep.mubr.msk.f32.mxu0 %vm6620_vm0, %v6621_v4  ;;  %v6326_v62 = vunpack.i.h.bf16 %v6324_v3  ;;  %v6325_v50 = vunpack.i.l.bf16 %v6324_v3 }
0x12b6   :  { %6145 = vmatprep.subr.bf16.mxu0 %v6619_v0 }
0x12b7   :  { %v6146_v48 = vpack.c.bf16 %v6326_v62, %v6325_v50 }
0x12b8   :  { %5698 = vmatmul.mubr.msk.f32.gmra.mrb[80].mxu0 %vm383_vm4, %v7612_v36  ;;  %v2909_v24 = vpop.permute.xlu1 %2908  ;;  %v2915_v29 = vpop.permute.xlu0 %2914 }
0x12b9   :  { %5700 = vmatprep.mubr.msk.f32.mxu0 %vm6620_vm0, %v6621_v4 }
0x12bc   :  { %5701 = vmatmul.mubr.msk.f32.gmra.mrb[82].mxu0 %vm383_vm4, %v7620_v55  ;;  %v2913_v9 = vpop.permute.xlu1 %2912 }
0x12bd   :  { %6148 = vmatpush3.bf16.xpose.msk.msra.mxu0 %vm6907_vm5, %v6146_v48  ;;  %5703 = vmatprep.mubr.msk.f32.mxu0 %vm6620_vm0, %v6621_v4 }
0x12be   :  { %5742 = vmatprep.subr.mxu0 %v6621_v4 }
0x12c0   :  { %5704 = vmatmul.mubr.msk.f32.gmra.mrb[84].mxu0 %vm383_vm4, %v7622_v60  ;;  %v2917_v57 = vpop.permute.xlu1 %2916 }
0x12c1   :  { %5706 = vmatprep.mubr.msk.f32.mxu0 %vm6620_vm0, %v6621_v4 }
0x12c4   :  { %5707 = vmatmul.mubr.msk.f32.gmra.mrb[86].mxu0 %vm383_vm4, %v7632_v53 }
0x12c5   :  { %5743 = vmatpush3.xpose.msk.msra.mxu0 %vm383_vm4, %v2927_v40  ;;  %5744 = vmatprep.mubr.msk.f32.mxu0 %vm6620_vm0, %v6621_v4 }
0x12c6   :  { %5784 = vmatprep.subr.mxu0 %v6621_v4 }
0x12c8   :  { %5745 = vmatmul.mubr.msk.f32.vlgmr.msra.gmra.mrb[88].mxu0 %vm383_vm4, %v2909_v24 }
0x12c9   :  { %5747 = vmatprep.mubr.msk.f32.mxu0 %vm6620_vm0, %v6621_v4 }
0x12cc   :  { %5748 = vmatmul.mubr.msk.f32.gmra.mrb[90].mxu0 %vm383_vm4, %v2911_v58 }
0x12cd   :  { %5750 = vmatprep.mubr.msk.f32.mxu0 %vm6620_vm0, %v6621_v4 }
0x12d0   :  { %5751 = vmatmul.mubr.msk.f32.gmra.mrb[92].mxu0 %vm383_vm4, %v2913_v9 }
0x12d1   :  { %5753 = vmatprep.mubr.msk.f32.mxu0 %vm6620_vm0, %v6621_v4 }
0x12d4   :  { %5754 = vmatmul.mubr.msk.f32.gmra.mrb[94].mxu0 %vm383_vm4, %v2915_v29 }
0x12d5   :  { %5756 = vmatprep.mubr.msk.f32.mxu0 %vm6620_vm0, %v6621_v4 }
0x12d8   :  { %5757 = vmatmul.mubr.msk.f32.gmra.mrb[96].mxu0 %vm383_vm4, %v2917_v57 }
0x12d9   :  { %5786 = vmatprep.mubr.msk.f32.mxu0 %vm6620_vm0, %v6621_v4 }
0x1387   :  { %v2708_v54 = vpop.f32.mrb[78].mxu0 }
0x1388   :  { %v2709_v5 = vadd.f32 %v7704_v17, %v2708_v54  ;;  %v5696_v16 = vpop.f32.mrb[79].mxu0 }
0x138a   :  { %v2732_v21 = vsel %vm494_vm6, %v2709_v5, -inf }
0x138b   :  { %2733 = vmax.xlane.f32.xlu0 %v2732_v21  ;;  %v2713_v26 = vpop.f32.mrb[80].mxu0 }
0x138c   :  { %v2714_v12 = vadd.f32 %v7711_v8, %v2713_v26  ;;  %v5699_v46 = vpop.f32.mrb[81].mxu0 }
0x138e   :  { %v2735_v31 = vsel %vm494_vm6, %v2714_v12, -inf }
0x138f   :  { %2736 = vmax.xlane.f32.xlu1 %v2735_v31  ;;  %v2718_v39 = vpop.f32.mrb[82].mxu0 }
0x1390   :  { %v2719_v56 = vadd.f32 %v7718_v25, %v2718_v39  ;;  %v5702_v34 = vpop.f32.mrb[83].mxu0 }
0x1392   :  { %v2738_v23 = vsel %vm494_vm6, %v2719_v56, -inf }
0x1393   :  { %2739 = vmax.xlane.f32.xlu0 %v2738_v23  ;;  %v2723_v32 = vpop.f32.mrb[84].mxu0 }
0x1394   :  { %v2724_v41 = vadd.f32 %v7725_v45, %v2723_v32  ;;  %v5705_v59 = vpop.f32.mrb[85].mxu0 }
0x1396   :  { %v2741_v49 = vsel %vm494_vm6, %v2724_v41, -inf }
0x1397   :  { %2742 = vmax.xlane.f32.xlu0 %v2741_v49  ;;  %v2728_v33 = vpop.f32.mrb[86].mxu0 }
0x1398   :  { %v2729_v13 = vadd.f32 %v7732_v37, %v2728_v33  ;;  %v5708_v63 = vpop.f32.mrb[87].mxu0 }
0x139a   :  { %v2744_v10 = vsel %vm507_vm7, %v2729_v13, -inf }
0x139b   :  { %2745 = vmax.xlane.f32.xlu1 %v2744_v10  ;;  %v3014_v1 = vpop.f32.mrb[88].mxu0 }
0x139c   :  { %v3015_v43 = vadd.f32 %v7704_v17, %v3014_v1  ;;  %v5746_v42 = vpop.f32.mrb[89].mxu0 }
0x139e   :  { %v3038_v6 = vsel %vm494_vm6, %v3015_v43, -inf }
0x139f   :  { %3039 = vmax.xlane.f32.xlu0 %v3038_v6  ;;  %v3019_v28 = vpop.f32.mrb[90].mxu0 }
0x13a0   :  { %v3020_v20 = vadd.f32 %v7711_v8, %v3019_v28  ;;  %v5749_v52 = vpop.f32.mrb[91].mxu0 }
0x13a2   :  { %v3041_v2 = vsel %vm494_vm6, %v3020_v20, -inf }
0x13a3   :  { %3042 = vmax.xlane.f32.xlu1 %v3041_v2  ;;  %v3024_v3 = vpop.f32.mrb[92].mxu0 }
0x13a4   :  { %v3025_v62 = vadd.f32 %v7718_v25, %v3024_v3  ;;  %v5752_v50 = vpop.f32.mrb[93].mxu0 }
0x13a6   :  { %v3044_v48 = vsel %vm494_vm6, %v3025_v62, -inf }
0x13a7   :  { %3045 = vmax.xlane.f32.xlu0 %v3044_v48  ;;  %v3029_v40 = vpop.f32.mrb[94].mxu0 }
0x13a8   :  { %v7743_v24 = vadd.f32 %v7725_v45, %v3029_v40  ;;  %v5755_v58 = vpop.f32.mrb[95].mxu0 }
0x13aa   :  { %v3047_v9 = vsel %vm494_vm6, %v7743_v24, -inf }
0x13ab   :  { %3048 = vmax.xlane.f32.xlu1 %v3047_v9  ;;  %v3034_v29 = vpop.f32.mrb[96].mxu0 }
0x13ac   :  { %v5758_v57 = vpop.f32.mrb[97].mxu0  ;;  %v7752_v54 = vadd.f32 %v7732_v37, %v3034_v29 }
0x13ae   :  { %v3050_v16 = vsel %vm507_vm7, %v7752_v54, -inf }
0x13bc   :  { %6333 = vrot.lane.b32.xlu1 %v7628_v35, %s6625_s1 }
0x13bd   :  { %6328 = vrot.lane.b32.xlu0 %v7616_v14, %s6625_s1 }
0x13dc   :  { %3051 = vmax.xlane.f32.xlu0 %v3050_v16 }
0x13f2   :  { %2795 = vrot.lane.b32.xlu0 %v7632_v53, %s6625_s1 }
0x1418   :  { %v2734_v21 = vpop.xlane.xlu0 %2733 }
0x1419   :  { %v2747_v26 = vsub.f32 %v2709_v5, %v2734_v21 }
0x141b   :  { %v2752_v46 = vmul.f32 1.442695, %v2747_v26 }
0x141c   :  { %v2737_v31 = vpop.xlane.xlu1 %2736 }
0x141d   :  { %6507 = vpow2.f32 %v2752_v46  ;;  %v2748_v39 = vsub.f32 %v2714_v12, %v2737_v31 }
0x141f   :  { %v2754_v34 = vmul.f32 1.442695, %v2748_v39 }
0x1420   :  { %v2740_v23 = vpop.xlane.xlu0 %2739 }
0x1421   :  { %6509 = vpow2.f32 %v2754_v34  ;;  %v2749_v32 = vsub.f32 %v2719_v56, %v2740_v23 }
0x1423   :  { %v2756_v59 = vmul.f32 1.442695, %v2749_v32 }
0x1424   :  { %v2743_v49 = vpop.xlane.xlu0 %2742 }
0x1425   :  { %6511 = vpow2.f32 %v2756_v59  ;;  %v2750_v33 = vsub.f32 %v2724_v41, %v2743_v49 }
0x1427   :  { %v7758_v63 = vpop.eup %6507  ;;  %v2758_v10 = vmul.f32 1.442695, %v2750_v33 }
0x1428   :  { %v2746_v1 = vpop.xlane.xlu1 %2745  ;;  %v2762_v42 = vsel %vm494_vm6, %v7758_v63, 0.0 }
0x1429   :  { %6513 = vpow2.f32 %v2758_v10  ;;  %v2751_v5 = vsub.f32 %v2729_v13, %v2746_v1  ;;  %2763 = vadd.xlane.f32.xlu1 %v2762_v42 }
0x142b   :  { %v7762_v6 = vpop.eup %6509  ;;  %v2760_v12 = vmul.f32 1.442695, %v2751_v5 }
0x142c   :  { %v3040_v28 = vpop.xlane.xlu0 %3039  ;;  %v2765_v56 = vsel %vm494_vm6, %v7762_v6, 0.0 }
0x142d   :  { %6515 = vpow2.f32 %v2760_v12  ;;  %v3053_v52 = vsub.f32 %v3015_v43, %v3040_v28  ;;  %2766 = vadd.xlane.f32.xlu0 %v2765_v56 }
0x142f   :  { %v7766_v41 = vpop.eup %6511  ;;  %v3058_v2 = vmul.f32 1.442695, %v3053_v52 }
0x1430   :  { %v3043_v3 = vpop.xlane.xlu1 %3042  ;;  %v2768_v50 = vsel %vm494_vm6, %v7766_v41, 0.0 }
0x1431   :  { %6517 = vpow2.f32 %v3058_v2  ;;  %v3054_v13 = vsub.f32 %v3020_v20, %v3043_v3  ;;  %2769 = vadd.xlane.f32.xlu1 %v2768_v50 }
0x1433   :  { %v7770_v48 = vpop.eup %6513  ;;  %v3060_v40 = vmul.f32 1.442695, %v3054_v13 }
0x1434   :  { %v3046_v58 = vpop.xlane.xlu0 %3045  ;;  %v2771_v9 = vsel %vm494_vm6, %v7770_v48, 0.0 }
0x1435   :  { %6519 = vpow2.f32 %v3060_v40  ;;  %v3055_v43 = vsub.f32 %v3025_v62, %v3046_v58  ;;  %2772 = vadd.xlane.f32.xlu0 %v2771_v9 }
0x1437   :  { %v7774_v29 = vpop.eup %6515  ;;  %v3062_v57 = vmul.f32 1.442695, %v3055_v43 }
0x1438   :  { %v6329_v16 = vpop.permute.xlu0 %6328  ;;  %v3049_v21 = vpop.xlane.xlu1 %3048  ;;  %v2774_v26 = vsel %vm507_vm7, %v7774_v29, 0.0 }
0x1439   :  { %6521 = vpow2.f32 %v3062_v57  ;;  %v6331_v20 = vunpack.i.h.bf16 %v6329_v16  ;;  %v6330_v46 = vunpack.i.l.bf16 %v6329_v16  ;;  %v3056_v31 = vsub.f32 %v7743_v24, %v3049_v21  ;;  %2775 = vadd.xlane.f32.xlu1 %v2774_v26 }
0x143b   :  { %v7779_v39 = vpop.eup %6517  ;;  %v6136_v34 = vpack.c.bf16 %v6331_v20, %v6330_v46  ;;  %v3064_v23 = vmul.f32 1.442695, %v3056_v31 }
0x143c   :  { %v6334_v62 = vpop.permute.xlu1 %6333  ;;  %v3068_v32 = vsel %vm494_vm6, %v7779_v39, 0.0 }
0x143d   :  { %6523 = vpow2.f32 %v3064_v23  ;;  %v6336_v59 = vunpack.i.h.bf16 %v6334_v62  ;;  %v6335_v49 = vunpack.i.l.bf16 %v6334_v62  ;;  %6137 = vmatpush3.bf16.msra.mxu1 %v6136_v34  ;;  %3069 = vadd.xlane.f32.xlu1 %v3068_v32 }
0x143e   :  { %6138 = vmatprep.subr.bf16.mxu1 %v6619_v0 }
0x143f   :  { %v7784_v33 = vpop.eup %6519  ;;  %v6139_v10 = vpack.c.bf16 %v6336_v59, %v6335_v49 }
0x1440   :  { %v3071_v24 = vsel %vm494_vm6, %v7784_v33, 0.0 }
0x1441   :  { %6140 = vmatpush3.bf16.msra.mxu1 %v6139_v10  ;;  %3072 = vadd.xlane.f32.xlu0 %v3071_v24 }
0x1442   :  { %5717 = vmatprep.subr.mxu1 %v6621_v4 }
0x1443   :  { %v7789_v1 = vpop.eup %6521 }
0x1444   :  { %v3074_v42 = vsel %vm494_vm6, %v7789_v1, 0.0 }
0x1445   :  { %3075 = vadd.xlane.f32.xlu1 %v3074_v42 }
0x1447   :  { %v7793_v5 = vpop.eup %6523 }
0x1448   :  { %v3077_v12 = vsel %vm494_vm6, %v7793_v5, 0.0 }
0x1449   :  { %3078 = vadd.xlane.f32.xlu1 %v3077_v12 }
0x1457   :  { %6343 = vrot.lane.b32.xlu0 %v7628_v35, %s6626_s27 }
0x145b   :  { %3101 = vrot.lane.b32.xlu0 %v7632_v53, %s6626_s27 }
0x145f   :  { %6348 = vrot.lane.b32.xlu0 %v7616_v14, %s6627_s28 }
0x1463   :  { %3442 = vrot.lane.b32.xlu0 %v7632_v53, %s6627_s28 }
0x1467   :  { %3426 = vrot.lane.b32.xlu0 %v7612_v36, %s6628_s29 }
0x1469   :  { %v3052_v28 = vpop.xlane.xlu0 %3051 }
0x146a   :  { %v3057_v56 = vsub.f32 %v7752_v54, %v3052_v28 }
0x146b   :  { %3430 = vrot.lane.b32.xlu0 %v7622_v60, %s6628_s29 }
0x146c   :  { %v3066_v52 = vmul.f32 1.442695, %v3057_v56 }
0x146d   :  { %v2796_v2 = vpop.permute.xlu0 %2795 }
0x146e   :  { %6525 = vpow2.f32 %v3066_v52  ;;  %5718 = vmatpush3.msk.msra.mxu1 %vm580_vm8, %v2796_v2  ;;  %v4877_v2 = vld [vmem:[%s8309_s5 + $0x20] sm:$0xff] }
0x146f   :  { %6149 = vmatprep.subr.bf16.mxu1 %v6619_v0 }
0x1478   :  { %v7812_v3 = vpop.eup %6525 }
0x1479   :  { %v3080_v50 = vsel %vm507_vm7, %v7812_v3, 0.0 }
0x147a   :  { %3081 = vadd.xlane.f32.xlu1 %v3080_v50 }
0x148b   :  { %6338 = vrot.lane.b32.xlu1 %v7616_v14, %s6626_s27 }
0x148f   :  { %6353 = vrot.lane.b32.xlu1 %v7628_v35, %s6627_s28 }
0x1493   :  { %3424 = vrot.lane.b32.xlu1 %v7610_v44, %s6628_s29 }
0x1497   :  { %3428 = vrot.lane.b32.xlu1 %v7620_v55, %s6628_s29 }
0x149b   :  { %3432 = vrot.lane.b32.xlu1 %v7632_v53, %s6628_s29 }
0x14b6   :  { %v2764_v54 = vpop.xlane.xlu1 %2763 }
0x14b7   :  { %6527 = vrcp.f32 %v2764_v54 }
0x14ba   :  { %v2767_v13 = vpop.xlane.xlu0 %2766 }
0x14bb   :  { %6529 = vrcp.f32 %v2767_v13 }
0x14be   :  { %v2770_v40 = vpop.xlane.xlu1 %2769 }
0x14bf   :  { %6531 = vrcp.f32 %v2770_v40 }
0x14c1   :  { %v6528_v58 = vpop.eup %6527 }
0x14c2   :  { %v2782_v9 = vmul.f32 %v6528_v58, %v7758_v63  ;;  %v2773_v43 = vpop.xlane.xlu0 %2772 }
0x14c3   :  { %6533 = vrcp.f32 %v2773_v43 }
0x14c4   :  { %5720 = vmatmul.mubr.msk.f32.vlgmr.msra.gmra.mrb[92].mxu1 %vm494_vm6, %v2782_v9 }
0x14c5   :  { %v6530_v57 = vpop.eup %6529  ;;  %5722 = vmatprep.mubr.msk.f32.mxu1 %vm6620_vm0, %v6621_v4 }
0x14c6   :  { %v2776_v16 = vpop.xlane.xlu1 %2775  ;;  %v2783_v21 = vmul.f32 %v6530_v57, %v7762_v6 }
0x14c7   :  { %6535 = vrcp.f32 %v2776_v16 }
0x14c8   :  { %5723 = vmatmul.mubr.msk.f32.gmra.mrb[94].mxu1 %vm494_vm6, %v2783_v21 }
0x14c9   :  { %v6532_v26 = vpop.eup %6531  ;;  %5725 = vmatprep.mubr.msk.f32.mxu1 %vm6620_vm0, %v6621_v4 }
0x14ca   :  { %v2784_v63 = vmul.f32 %v6532_v26, %v7766_v41  ;;  %v3070_v41 = vpop.xlane.xlu1 %3069 }
0x14cb   :  { %6537 = vrcp.f32 %v3070_v41 }
0x14cc   :  { %5726 = vmatmul.mubr.msk.f32.gmra.mrb[96].mxu1 %vm494_vm6, %v2784_v63 }
0x14cd   :  { %v6534_v20 = vpop.eup %6533  ;;  %5728 = vmatprep.mubr.msk.f32.mxu1 %vm6620_vm0, %v6621_v4 }
0x14ce   :  { %v2785_v46 = vmul.f32 %v6534_v20, %v7770_v48  ;;  %v3073_v62 = vpop.xlane.xlu0 %3072 }
0x14cf   :  { %6539 = vrcp.f32 %v3073_v62 }
0x14d0   :  { %5729 = vmatmul.mubr.msk.f32.gmra.mrb[98].mxu1 %vm494_vm6, %v2785_v46 }
0x14d1   :  { %v6536_v6 = vpop.eup %6535  ;;  %5731 = vmatprep.mubr.msk.f32.mxu1 %vm6620_vm0, %v6621_v4 }
0x14d2   :  { %v2786_v31 = vmul.f32 %v6536_v6, %v7774_v29  ;;  %v3076_v34 = vpop.xlane.xlu1 %3075  ;;  %v6344_v48 = vpop.permute.xlu0 %6343 }
0x14d3   :  { %v6346_v24 = vunpack.i.h.bf16 %v6344_v48  ;;  %v6345_v42 = vunpack.i.l.bf16 %v6344_v48  ;;  %6541 = vrcp.f32 %v3076_v34 }
0x14d4   :  { %5732 = vmatmul.mubr.msk.f32.gmra.mrb[100].mxu1 %vm494_vm6, %v2786_v31 }
0x14d5   :  { %5769 = vmatprep.mubr.msk.f32.mxu1 %vm6620_vm0, %v6621_v4  ;;  %v6153_v29 = vpack.c.bf16 %v6346_v24, %v6345_v42  ;;  %v6538_v28 = vpop.eup %6537 }
0x14d6   :  { %v3079_v23 = vpop.xlane.xlu1 %3078  ;;  %v3088_v56 = vmul.f32 %v6538_v28, %v7779_v39  ;;  %v3102_v52 = vpop.permute.xlu0 %3101 }
0x14d7   :  { %6543 = vrcp.f32 %v3079_v23 }
0x14d9   :  { %v6540_v50 = vpop.eup %6539 }
0x14da   :  { %v3089_v54 = vmul.f32 %v6540_v50, %v7784_v33  ;;  %v6349_v6 = vpop.permute.xlu0 %6348 }
0x14db   :  { %v6351_v31 = vunpack.i.h.bf16 %v6349_v6  ;;  %v6350_v41 = vunpack.i.l.bf16 %v6349_v6 }
0x14dd   :  { %v6542_v39 = vpop.eup %6541  ;;  %v6156_v34 = vpack.c.bf16 %v6351_v31, %v6350_v41 }
0x14de   :  { %v3090_v13 = vmul.f32 %v6542_v39, %v7789_v1  ;;  %v4878_v1 = vld [vmem:[%s8309_s5 + $0x28] sm:$0xff] }
0x14df   :  { %5785 = vmatpush3.msra.mxu0 %v4878_v1 }
0x14e0   :  { %6155 = vmatprep.subr.bf16.mxu0 %v6619_v0 }
0x14e1   :  { %v6544_v40 = vpop.eup %6543 }
0x14e2   :  { %v3091_v58 = vmul.f32 %v6544_v40, %v7793_v5 }
0x1507   :  { %v3082_v32 = vpop.xlane.xlu1 %3081 }
0x1508   :  { %6545 = vrcp.f32 %v3082_v32 }
0x150b   :  { %v6339_v59 = vpop.permute.xlu1 %6338 }
0x150c   :  { %v6341_v49 = vunpack.i.h.bf16 %v6339_v59  ;;  %v6340_v10 = vunpack.i.l.bf16 %v6339_v59 }
0x150e   :  { %v6150_v12 = vpack.c.bf16 %v6341_v49, %v6340_v10 }
0x150f   :  { %v6354_v62 = vpop.permute.xlu1 %6353 }
0x1510   :  { %6151 = vmatpush3.bf16.msra.mxu1 %v6150_v12  ;;  %v6356_v48 = vunpack.i.h.bf16 %v6354_v62  ;;  %v6355_v59 = vunpack.i.l.bf16 %v6354_v62 }
0x1511   :  { %6152 = vmatprep.subr.bf16.mxu1 %v6619_v0 }
0x1512   :  { %v6546_v9 = vpop.eup %6545  ;;  %v6160_v24 = vpack.c.bf16 %v6356_v48, %v6355_v59 }
0x1513   :  { %v3092_v33 = vmul.f32 %v6546_v9, %v7812_v3  ;;  %v3425_v50 = vpop.permute.xlu1 %3424 }
0x1514   :  { %6154 = vmatpush3.bf16.msra.mxu1 %v6153_v29 }
0x1515   :  { %5767 = vmatprep.subr.mxu1 %v6621_v4 }
0x1517   :  { %v3429_v39 = vpop.permute.xlu1 %3428 }
0x1518   :  { %5768 = vmatpush3.msk.msra.mxu1 %vm580_vm8, %v3102_v52  ;;  %v3443_v52 = vpop.permute.xlu0 %3442 }
0x1519   :  { %5770 = vmatmul.mubr.msk.f32.vlgmr.msra.gmra.mrb[102].mxu1 %vm494_vm6, %v3088_v56  ;;  %5801 = vmatprep.subr.mxu1 %v6621_v4 }
0x151a   :  { %5772 = vmatprep.mubr.msk.f32.mxu1 %vm6620_vm0, %v6621_v4  ;;  %5802 = vmatpush3.msra.mxu1 %v4877_v2 }
0x151b   :  { %6163 = vmatprep.subr.bf16.mxu1 %v6619_v0  ;;  %v3433_v40 = vpop.permute.xlu1 %3432 }
0x151d   :  { %5773 = vmatmul.mubr.msk.f32.gmra.mrb[104].mxu1 %vm494_vm6, %v3089_v54  ;;  %v3427_v54 = vpop.permute.xlu0 %3426 }
0x151e   :  { %5775 = vmatprep.mubr.msk.f32.mxu1 %vm6620_vm0, %v6621_v4 }
0x1521   :  { %5776 = vmatmul.mubr.msk.f32.gmra.mrb[106].mxu1 %vm494_vm6, %v3090_v13  ;;  %v3431_v13 = vpop.permute.xlu0 %3430 }
0x1522   :  { %5778 = vmatprep.mubr.msk.f32.mxu1 %vm6620_vm0, %v6621_v4 }
0x1525   :  { %5779 = vmatmul.mubr.msk.f32.gmra.mrb[108].mxu1 %vm494_vm6, %v3091_v58 }
0x1526   :  { %5781 = vmatprep.mubr.msk.f32.mxu1 %vm6620_vm0, %v6621_v4 }
0x1529   :  { %5782 = vmatmul.mubr.msk.f32.gmra.mrb[110].mxu1 %vm494_vm6, %v3092_v33 }
0x152a   :  { %5803 = vmatprep.mubr.msk.f32.mxu1 %vm6620_vm0, %v6621_v4 }
0x1597   :  { %v2884_v5 = vpop.f32.mrb[92].mxu1 }
0x1598   :  { %v5721_v43 = vpop.f32.mrb[93].mxu1  ;;  %5804 = vmatmul.mubr.msk.f32.vlgmr.msra.gmra.mrb[112].mxu1 %vm383_vm4, %v2884_v5 }
0x1599   :  { %5806 = vmatprep.mubr.msk.f32.mxu1 %vm6620_vm0, %v6621_v4 }
0x159b   :  { %v2889_v3 = vpop.f32.mrb[94].mxu1 }
0x159c   :  { %v5724_v57 = vpop.f32.mrb[95].mxu1  ;;  %5807 = vmatmul.mubr.msk.f32.gmra.mrb[114].mxu1 %vm383_vm4, %v2889_v3 }
0x159d   :  { %5809 = vmatprep.mubr.msk.f32.mxu1 %vm6620_vm0, %v6621_v4 }
0x159f   :  { %v2894_v16 = vpop.f32.mrb[96].mxu1 }
0x15a0   :  { %v5727_v21 = vpop.f32.mrb[97].mxu1  ;;  %5810 = vmatmul.mubr.msk.f32.gmra.mrb[116].mxu1 %vm383_vm4, %v2894_v16 }
0x15a1   :  { %5812 = vmatprep.mubr.msk.f32.mxu1 %vm6620_vm0, %v6621_v4 }
0x15a3   :  { %v2899_v26 = vpop.f32.mrb[98].mxu1 }
0x15a4   :  { %v5730_v63 = vpop.f32.mrb[99].mxu1  ;;  %5813 = vmatmul.mubr.msk.f32.gmra.mrb[118].mxu1 %vm383_vm4, %v2899_v26 }
0x15a5   :  { %5815 = vmatprep.mubr.msk.f32.mxu1 %vm6620_vm0, %v6621_v4 }
0x15a7   :  { %v2904_v20 = vpop.f32.mrb[100].mxu1 }
0x15a8   :  { %v5733_v46 = vpop.f32.mrb[101].mxu1  ;;  %5816 = vmatmul.mubr.msk.f32.gmra.mrb[120].mxu1 %vm383_vm4, %v2904_v20 }
0x15a9   :  { %5853 = vmatprep.mubr.msk.f32.mxu1 %vm6620_vm0, %v6621_v4 }
0x15ec   :  { %v3190_v23 = vpop.f32.mrb[102].mxu1 }
0x15ed   :  { %v5771_v32 = vpop.f32.mrb[103].mxu1  ;;  %5787 = vmatmul.mubr.msk.f32.vlgmr.msra.gmra.mrb[98].mxu0 %vm383_vm4, %v3190_v23 }
0x15ee   :  { %6158 = vmatpush3.bf16.xpose.msk.msra.mxu0 %vm6907_vm5, %v6156_v34  ;;  %5789 = vmatprep.mubr.msk.f32.mxu0 %vm6620_vm0, %v6621_v4 }
0x15ef   :  { %6159 = vmatprep.subr.bf16.mxu0 %v6619_v0 }
0x15f0   :  { %v3195_v49 = vpop.f32.mrb[104].mxu1 }
0x15f1   :  { %v5774_v10 = vpop.f32.mrb[105].mxu1  ;;  %5790 = vmatmul.mubr.msk.f32.gmra.mrb[100].mxu0 %vm383_vm4, %v3195_v49 }
0x15f2   :  { %5792 = vmatprep.mubr.msk.f32.mxu0 %vm6620_vm0, %v6621_v4 }
0x15f4   :  { %v3200_v42 = vpop.f32.mrb[106].mxu1 }
0x15f5   :  { %v5777_v12 = vpop.f32.mrb[107].mxu1  ;;  %5793 = vmatmul.mubr.msk.f32.gmra.mrb[102].mxu0 %vm383_vm4, %v3200_v42 }
0x15f6   :  { %6162 = vmatpush3.bf16.xpose.msk.msra.mxu0 %vm6907_vm5, %v6160_v24  ;;  %5795 = vmatprep.mubr.msk.f32.mxu0 %vm6620_vm0, %v6621_v4 }
0x15f7   :  { %5826 = vmatprep.subr.mxu0 %v6621_v4 }
0x15f8   :  { %v3205_v29 = vpop.f32.mrb[108].mxu1 }
0x15f9   :  { %v5780_v28 = vpop.f32.mrb[109].mxu1  ;;  %5796 = vmatmul.mubr.msk.f32.gmra.mrb[104].mxu0 %vm383_vm4, %v3205_v29 }
0x15fa   :  { %5798 = vmatprep.mubr.msk.f32.mxu0 %vm6620_vm0, %v6621_v4 }
0x15fc   :  { %v3210_v56 = vpop.f32.mrb[110].mxu1 }
0x15fd   :  { %v5783_v2 = vpop.f32.mrb[111].mxu1  ;;  %5799 = vmatmul.mubr.msk.f32.gmra.mrb[106].mxu0 %vm383_vm4, %v3210_v56 }
0x15fe   :  { %5827 = vmatpush3.xpose.msk.msra.mxu0 %vm383_vm4, %v3443_v52  ;;  %5828 = vmatprep.mubr.msk.f32.mxu0 %vm6620_vm0, %v6621_v4 }
0x15ff   :  { %5868 = vmatprep.subr.mxu0 %v6621_v4 }
0x1601   :  { %5829 = vmatmul.mubr.msk.f32.vlgmr.msra.gmra.mrb[108].mxu0 %vm383_vm4, %v3425_v50 }
0x1602   :  { %5831 = vmatprep.mubr.msk.f32.mxu0 %vm6620_vm0, %v6621_v4 }
0x1605   :  { %5832 = vmatmul.mubr.msk.f32.gmra.mrb[110].mxu0 %vm383_vm4, %v3427_v54 }
0x1606   :  { %5834 = vmatprep.mubr.msk.f32.mxu0 %vm6620_vm0, %v6621_v4 }
0x1609   :  { %5835 = vmatmul.mubr.msk.f32.gmra.mrb[112].mxu0 %vm383_vm4, %v3429_v39 }
0x160a   :  { %5837 = vmatprep.mubr.msk.f32.mxu0 %vm6620_vm0, %v6621_v4 }
0x160d   :  { %5838 = vmatmul.mubr.msk.f32.gmra.mrb[114].mxu0 %vm383_vm4, %v3431_v13 }
0x160e   :  { %5840 = vmatprep.mubr.msk.f32.mxu0 %vm6620_vm0, %v6621_v4 }
0x1611   :  { %5841 = vmatmul.mubr.msk.f32.gmra.mrb[116].mxu0 %vm383_vm4, %v3433_v40 }
0x1612   :  { %5870 = vmatprep.mubr.msk.f32.mxu0 %vm6620_vm0, %v6621_v4 }
0x166b   :  { %v3400_v58 = vpop.f32.mrb[112].mxu1 }
0x166c   :  { %v5805_v9 = vpop.f32.mrb[113].mxu1 }
0x166f   :  { %v3405_v33 = vpop.f32.mrb[114].mxu1 }
0x1670   :  { %v5808_v1 = vpop.f32.mrb[115].mxu1 }
0x1673   :  { %v3410_v5 = vpop.f32.mrb[116].mxu1 }
0x1674   :  { %v5811_v43 = vpop.f32.mrb[117].mxu1 }
0x1677   :  { %v3415_v3 = vpop.f32.mrb[118].mxu1 }
0x1678   :  { %v5814_v57 = vpop.f32.mrb[119].mxu1 }
0x167b   :  { %v3420_v16 = vpop.f32.mrb[120].mxu1 }
0x167c   :  { %v5817_v21 = vpop.f32.mrb[121].mxu1 }
0x16c0   :  { %v3295_v26 = vpop.f32.mrb[98].mxu0 }
0x16c1   :  { %v7931_v63 = vadd.f32 %v3400_v58, %v3295_v26  ;;  %v5788_v20 = vpop.f32.mrb[99].mxu0 }
0x16c4   :  { %v3300_v46 = vpop.f32.mrb[100].mxu0 }
0x16c5   :  { %v7933_v6 = vadd.f32 %v3405_v33, %v3300_v46  ;;  %v5791_v31 = vpop.f32.mrb[101].mxu0 }
0x16c8   :  { %v3305_v41 = vpop.f32.mrb[102].mxu0 }
0x16c9   :  { %v7935_v34 = vadd.f32 %v3410_v5, %v3305_v41  ;;  %v5794_v23 = vpop.f32.mrb[103].mxu0 }
0x16cc   :  { %v3310_v62 = vpop.f32.mrb[104].mxu0 }
0x16cd   :  { %v7937_v32 = vadd.f32 %v3415_v3, %v3310_v62  ;;  %v5797_v48 = vpop.f32.mrb[105].mxu0 }
0x16d0   :  { %v3315_v59 = vpop.f32.mrb[106].mxu0 }
0x16d1   :  { %v7939_v49 = vadd.f32 %v3420_v16, %v3315_v59  ;;  %v5800_v10 = vpop.f32.mrb[107].mxu0 }
0x16d4   :  { %v3530_v24 = vpop.f32.mrb[108].mxu0 }
0x16d5   :  { %v3531_v42 = vadd.f32 %v7704_v17, %v3530_v24  ;;  %v5830_v12 = vpop.f32.mrb[109].mxu0 }
0x16d7   :  { %v3554_v29 = vsel %vm494_vm6, %v3531_v42, -inf }
0x16d8   :  { %3555 = vmax.xlane.f32.xlu0 %v3554_v29  ;;  %v3535_v28 = vpop.f32.mrb[110].mxu0 }
0x16d9   :  { %v3536_v56 = vadd.f32 %v7711_v8, %v3535_v28  ;;  %v5833_v52 = vpop.f32.mrb[111].mxu0 }
0x16db   :  { %v3557_v2 = vsel %vm494_vm6, %v3536_v56, -inf }
0x16dc   :  { %3558 = vmax.xlane.f32.xlu1 %v3557_v2  ;;  %v3540_v50 = vpop.f32.mrb[112].mxu0 }
0x16dd   :  { %v3541_v54 = vadd.f32 %v7718_v25, %v3540_v50  ;;  %v5836_v39 = vpop.f32.mrb[113].mxu0 }
0x16df   :  { %v3560_v13 = vsel %vm494_vm6, %v3541_v54, -inf }
0x16e0   :  { %3561 = vmax.xlane.f32.xlu0 %v3560_v13  ;;  %v3545_v40 = vpop.f32.mrb[114].mxu0 }
0x16e1   :  { %v3546_v58 = vadd.f32 %v7725_v45, %v3545_v40  ;;  %v5839_v9 = vpop.f32.mrb[115].mxu0 }
0x16e3   :  { %v3563_v33 = vsel %vm494_vm6, %v3546_v58, -inf }
0x16e4   :  { %3564 = vmax.xlane.f32.xlu0 %v3563_v33  ;;  %v3550_v1 = vpop.f32.mrb[116].mxu0 }
0x16e5   :  { %v3551_v5 = vadd.f32 %v7732_v37, %v3550_v1  ;;  %v5842_v43 = vpop.f32.mrb[117].mxu0 }
0x16e7   :  { %v3566_v3 = vsel %vm507_vm7, %v3551_v5, -inf }
0x16e8   :  { %3567 = vmax.xlane.f32.xlu1 %v3566_v3 }
0x1765   :  { %v3556_v57 = vpop.xlane.xlu0 %3555 }
0x1766   :  { %v3569_v16 = vsub.f32 %v3531_v42, %v3556_v57 }
0x1768   :  { %v3574_v21 = vmul.f32 1.442695, %v3569_v16 }
0x1769   :  { %v3559_v26 = vpop.xlane.xlu1 %3558 }
0x176a   :  { %6547 = vpow2.f32 %v3574_v21  ;;  %v3570_v20 = vsub.f32 %v3536_v56, %v3559_v26 }
0x176c   :  { %v3576_v46 = vmul.f32 1.442695, %v3570_v20 }
0x176d   :  { %v3562_v48 = vpop.xlane.xlu0 %3561 }
0x176e   :  { %6549 = vpow2.f32 %v3576_v46  ;;  %v3571_v59 = vsub.f32 %v3541_v54, %v3562_v48 }
0x1770   :  { %v3578_v12 = vmul.f32 1.442695, %v3571_v59 }
0x1771   :  { %v3565_v10 = vpop.xlane.xlu0 %3564 }
0x1772   :  { %v3572_v42 = vsub.f32 %v3546_v58, %v3565_v10  ;;  %6551 = vpow2.f32 %v3578_v12 }
0x1774   :  { %v6548_v31 = vpop.eup %6547  ;;  %v3580_v28 = vmul.f32 1.442695, %v3572_v42 }
0x1775   :  { %v3584_v41 = vsel %vm494_vm6, %v6548_v31, 0.0  ;;  %v3568_v24 = vpop.xlane.xlu1 %3567 }
0x1776   :  { %3585 = vadd.xlane.f32.xlu0 %v3584_v41  ;;  %v3573_v29 = vsub.f32 %v3551_v5, %v3568_v24  ;;  %6553 = vpow2.f32 %v3580_v28 }
0x1778   :  { %v7952_v23 = vpop.eup %6549  ;;  %v3582_v56 = vmul.f32 1.442695, %v3573_v29 }
0x1779   :  { %v3587_v62 = vsel %vm494_vm6, %v7952_v23, 0.0 }
0x177a   :  { %3588 = vadd.xlane.f32.xlu1 %v3587_v62  ;;  %6555 = vpow2.f32 %v3582_v56 }
0x177c   :  { %v6552_v52 = vpop.eup %6551 }
0x177d   :  { %v3590_v50 = vsel %vm494_vm6, %v6552_v52, 0.0 }
0x1780   :  { %v7960_v2 = vpop.eup %6553 }
0x1781   :  { %v3593_v54 = vsel %vm494_vm6, %v7960_v2, 0.0 }
0x1784   :  { %v7963_v39 = vpop.eup %6555 }
0x1785   :  { %v3596_v13 = vsel %vm507_vm7, %v7963_v39, 0.0 }
0x178b   :  { %6358 = vrot.lane.b32.xlu1 %v7616_v14, %s6629_s13 }
0x178c   :  { %6363 = vrot.lane.b32.xlu0 %v7628_v35, %s6629_s13 }
0x17ab   :  { %3591 = vadd.xlane.f32.xlu0 %v3590_v50 }
0x17af   :  { %3594 = vadd.xlane.f32.xlu0 %v3593_v54  ;;  %3597 = vadd.xlane.f32.xlu1 %v3596_v13 }
0x17c0   :  { %3846 = vrot.lane.b32.xlu1 %v7622_v60, %s6630_s14 }
0x17c5   :  { %3617 = vrot.lane.b32.xlu0 %v7632_v53, %s6629_s13 }
0x17c9   :  { %6368 = vrot.lane.b32.xlu0 %v7616_v14, %s6631_s18 }
0x17cd   :  { %6373 = vrot.lane.b32.xlu0 %v7628_v35, %s6631_s18 }
0x17d1   :  { %3858 = vrot.lane.b32.xlu0 %v7632_v53, %s6631_s18 }
0x17d5   :  { %3840 = vrot.lane.b32.xlu0 %v7610_v44, %s6630_s14 }
0x17d9   :  { %3842 = vrot.lane.b32.xlu0 %v7612_v36, %s6630_s14 }
0x17dd   :  { %3844 = vrot.lane.b32.xlu0 %v7620_v55, %s6630_s14 }
0x17e1   :  { %3848 = vrot.lane.b32.xlu0 %v7632_v53, %s6630_s14 }
0x1803   :  { %v3586_v60 = vpop.xlane.xlu0 %3585 }
0x1804   :  { %6557 = vrcp.f32 %v3586_v60  ;;  %v4879_v60 = vld [vmem:[%s8309_s5 + $0x30] sm:$0xff] }
0x1805   :  { %5869 = vmatpush3.msra.mxu0 %v4879_v60 }
0x1806   :  { %6177 = vmatprep.subr.bf16.mxu0 %v6619_v0 }
0x1807   :  { %v3589_v40 = vpop.xlane.xlu1 %3588  ;;  %v6364_v58 = vpop.permute.xlu0 %6363 }
0x1808   :  { %v6366_v5 = vunpack.i.h.bf16 %v6364_v58  ;;  %v6365_v43 = vunpack.i.l.bf16 %v6364_v58  ;;  %6559 = vrcp.f32 %v3589_v40 }
0x180a   :  { %v6167_v44 = vpack.c.bf16 %v6366_v5, %v6365_v43 }
0x180b   :  { %v6359_v9 = vpop.permute.xlu1 %6358 }
0x180c   :  { %v6361_v33 = vunpack.i.h.bf16 %v6359_v9  ;;  %v6360_v1 = vunpack.i.l.bf16 %v6359_v9 }
0x180e   :  { %v6164_v3 = vpack.c.bf16 %v6361_v33, %v6360_v1  ;;  %v6558_v57 = vpop.eup %6557 }
0x180f   :  { %v3604_v16 = vmul.f32 %v6558_v57, %v6548_v31 }
0x1810   :  { %6165 = vmatpush3.bf16.msra.mxu1 %v6164_v3 }
0x1811   :  { %6166 = vmatprep.subr.bf16.mxu1 %v6619_v0 }
0x1812   :  { %v6560_v20 = vpop.eup %6559 }
0x1813   :  { %v3605_v41 = vmul.f32 %v6560_v20, %v7952_v23 }
0x1814   :  { %6168 = vmatpush3.bf16.msra.mxu1 %v6167_v44 }
0x1815   :  { %5851 = vmatprep.subr.mxu1 %v6621_v4 }
0x1838   :  { %v3592_v36 = vpop.xlane.xlu0 %3591 }
0x1839   :  { %6561 = vrcp.f32 %v3592_v36 }
0x183c   :  { %v3595_v55 = vpop.xlane.xlu0 %3594  ;;  %v3598_v21 = vpop.xlane.xlu1 %3597 }
0x183d   :  { %6563 = vrcp.f32 %v3595_v55 }
0x183e   :  { %6565 = vrcp.f32 %v3598_v21 }
0x1840   :  { %v3618_v26 = vpop.permute.xlu0 %3617 }
0x1841   :  { %5852 = vmatpush3.msk.msra.mxu1 %vm580_vm8, %v3618_v26 }
0x1842   :  { %5854 = vmatmul.mubr.msk.f32.vlgmr.msra.gmra.mrb[122].mxu1 %vm494_vm6, %v3604_v16  ;;  %6169 = vmatprep.subr.bf16.mxu1 %v6619_v0 }
0x1843   :  { %5856 = vmatprep.mubr.msk.f32.mxu1 %vm6620_vm0, %v6621_v4  ;;  %v6562_v62 = vpop.eup %6561 }
0x1844   :  { %v6369_v46 = vpop.permute.xlu0 %6368  ;;  %v3606_v24 = vmul.f32 %v6562_v62, %v6552_v52 }
0x1845   :  { %v6371_v48 = vunpack.i.h.bf16 %v6369_v46  ;;  %v6370_v59 = vunpack.i.l.bf16 %v6369_v46 }
0x1846   :  { %5857 = vmatmul.mubr.msk.f32.gmra.mrb[124].mxu1 %vm494_vm6, %v3605_v41 }
0x1847   :  { %v6170_v31 = vpack.c.bf16 %v6371_v48, %v6370_v59  ;;  %5859 = vmatprep.mubr.msk.f32.mxu1 %vm6620_vm0, %v6621_v4  ;;  %v6564_v42 = vpop.eup %6563 }
0x1848   :  { %v6374_v10 = vpop.permute.xlu0 %6373  ;;  %v3607_v29 = vmul.f32 %v6564_v42, %v7960_v2  ;;  %v6566_v28 = vpop.eup %6565 }
0x1849   :  { %6172 = vmatpush3.bf16.xpose.msk.msra.mxu1 %vm6907_vm5, %v6170_v31  ;;  %v6376_v23 = vunpack.i.h.bf16 %v6374_v10  ;;  %v6375_v12 = vunpack.i.l.bf16 %v6374_v10  ;;  %v3608_v52 = vmul.f32 %v6566_v28, %v7963_v39  ;;  %v3847_v39 = vpop.permute.xlu1 %3846 }
0x184a   :  { %5860 = vmatmul.mubr.msk.f32.gmra.mrb[126].mxu1 %vm494_vm6, %v3606_v24  ;;  %6173 = vmatprep.subr.bf16.mxu1 %v6619_v0 }
0x184b   :  { %5862 = vmatprep.mubr.msk.f32.mxu1 %vm6620_vm0, %v6621_v4  ;;  %v6174_v56 = vpack.c.bf16 %v6376_v23, %v6375_v12 }
0x184c   :  { %v3859_v50 = vpop.permute.xlu0 %3858 }
0x184e   :  { %5863 = vmatmul.mubr.msk.f32.gmra.mrb[128].mxu1 %vm494_vm6, %v3607_v29 }
0x184f   :  { %5865 = vmatprep.mubr.msk.f32.mxu1 %vm6620_vm0, %v6621_v4 }
0x1850   :  { %v3841_v2 = vpop.permute.xlu0 %3840 }
0x1851   :  { %6176 = vmatpush3.bf16.xpose.msk.msra.mxu1 %vm6907_vm5, %v6174_v56 }
0x1852   :  { %5866 = vmatmul.mubr.msk.f32.gmra.mrb[130].mxu1 %vm494_vm6, %v3608_v52  ;;  %5893 = vmatprep.subr.mxu1 %v6621_v4 }
0x1853   :  { %5895 = vmatprep.mubr.msk.f32.mxu1 %vm6620_vm0, %v6621_v4 }
0x1854   :  { %v3843_v54 = vpop.permute.xlu0 %3842 }
0x1858   :  { %v3845_v22 = vpop.permute.xlu0 %3844 }
0x1859   :  { %5894 = vmatpush3.xpose.msk.msra.mxu1 %vm383_vm4, %v3859_v50 }
0x185a   :  { %5935 = vmatprep.subr.mxu1 %v6621_v4 }
0x185c   :  { %5896 = vmatmul.mubr.msk.f32.vlgmr.msra.gmra.mrb[132].mxu1 %vm383_vm4, %v3841_v2  ;;  %v3849_v13 = vpop.permute.xlu0 %3848 }
0x185d   :  { %5898 = vmatprep.mubr.msk.f32.mxu1 %vm6620_vm0, %v6621_v4 }
0x1860   :  { %5899 = vmatmul.mubr.msk.f32.gmra.mrb[134].mxu1 %vm383_vm4, %v3843_v54 }
0x1861   :  { %5901 = vmatprep.mubr.msk.f32.mxu1 %vm6620_vm0, %v6621_v4 }
0x1864   :  { %5902 = vmatmul.mubr.msk.f32.gmra.mrb[136].mxu1 %vm383_vm4, %v3845_v22 }
0x1865   :  { %5904 = vmatprep.mubr.msk.f32.mxu1 %vm6620_vm0, %v6621_v4 }
0x1868   :  { %5905 = vmatmul.mubr.msk.f32.gmra.mrb[138].mxu1 %vm383_vm4, %v3847_v39 }
0x1869   :  { %5907 = vmatprep.mubr.msk.f32.mxu1 %vm6620_vm0, %v6621_v4 }
0x186c   :  { %5908 = vmatmul.mubr.msk.f32.gmra.mrb[140].mxu1 %vm383_vm4, %v3849_v13 }
0x186d   :  { %5937 = vmatprep.mubr.msk.f32.mxu1 %vm6620_vm0, %v6621_v4 }
0x1915   :  { %v3706_v40 = vpop.f32.mrb[122].mxu1 }
0x1916   :  { %v5855_v58 = vpop.f32.mrb[123].mxu1  ;;  %5871 = vmatmul.mubr.msk.f32.vlgmr.msra.gmra.mrb[118].mxu0 %vm383_vm4, %v3706_v40 }
0x1917   :  { %5873 = vmatprep.mubr.msk.f32.mxu0 %vm6620_vm0, %v6621_v4 }
0x1919   :  { %v3711_v9 = vpop.f32.mrb[124].mxu1 }
0x191a   :  { %v5858_v33 = vpop.f32.mrb[125].mxu1  ;;  %5874 = vmatmul.mubr.msk.f32.gmra.mrb[120].mxu0 %vm383_vm4, %v3711_v9 }
0x191b   :  { %5876 = vmatprep.mubr.msk.f32.mxu0 %vm6620_vm0, %v6621_v4 }
0x191d   :  { %v3716_v1 = vpop.f32.mrb[126].mxu1 }
0x191e   :  { %v5861_v5 = vpop.f32.mrb[127].mxu1  ;;  %5877 = vmatmul.mubr.msk.f32.gmra.mrb[122].mxu0 %vm383_vm4, %v3716_v1 }
0x191f   :  { %5879 = vmatprep.mubr.msk.f32.mxu0 %vm6620_vm0, %v6621_v4 }
0x1921   :  { %v3721_v43 = vpop.f32.mrb[128].mxu1 }
0x1922   :  { %v5864_v3 = vpop.f32.mrb[129].mxu1  ;;  %5880 = vmatmul.mubr.msk.f32.gmra.mrb[124].mxu0 %vm383_vm4, %v3721_v43 }
0x1923   :  { %5882 = vmatprep.mubr.msk.f32.mxu0 %vm6620_vm0, %v6621_v4 }
0x1925   :  { %v3726_v44 = vpop.f32.mrb[130].mxu1 }
0x1926   :  { %v5867_v36 = vpop.f32.mrb[131].mxu1  ;;  %5883 = vmatmul.mubr.msk.f32.gmra.mrb[126].mxu0 %vm383_vm4, %v3726_v44 }
0x1927   :  { %5920 = vmatprep.mubr.msk.f32.mxu0 %vm6620_vm0, %v6621_v4 }
0x192f   :  { %v3946_v55 = vpop.f32.mrb[132].mxu1 }
0x1930   :  { %v3947_v57 = vadd.f32 %v7704_v17, %v3946_v55  ;;  %v5897_v16 = vpop.f32.mrb[133].mxu1 }
0x1932   :  { %v3970_v21 = vsel %vm494_vm6, %v3947_v57, -inf }
0x1933   :  { %3971 = vmax.xlane.f32.xlu0 %v3970_v21  ;;  %v3951_v26 = vpop.f32.mrb[134].mxu1 }
0x1934   :  { %v3952_v20 = vadd.f32 %v7711_v8, %v3951_v26  ;;  %v5900_v46 = vpop.f32.mrb[135].mxu1 }
0x1936   :  { %v3973_v41 = vsel %vm494_vm6, %v3952_v20, -inf }
0x1937   :  { %3974 = vmax.xlane.f32.xlu1 %v3973_v41  ;;  %v3956_v62 = vpop.f32.mrb[136].mxu1 }
0x1938   :  { %v3957_v48 = vadd.f32 %v7718_v25, %v3956_v62  ;;  %v5903_v59 = vpop.f32.mrb[137].mxu1 }
0x193a   :  { %v3976_v31 = vsel %vm494_vm6, %v3957_v48, -inf }
0x193b   :  { %3977 = vmax.xlane.f32.xlu0 %v3976_v31  ;;  %v3961_v10 = vpop.f32.mrb[138].mxu1 }
0x193c   :  { %v3962_v17 = vadd.f32 %v7725_v45, %v3961_v10  ;;  %v5906_v24 = vpop.f32.mrb[139].mxu1 }
0x193e   :  { %v3979_v42 = vsel %vm494_vm6, %v3962_v17, -inf }
0x193f   :  { %3980 = vmax.xlane.f32.xlu0 %v3979_v42  ;;  %v3966_v23 = vpop.f32.mrb[140].mxu1 }
0x1940   :  { %v3967_v8 = vadd.f32 %v7732_v37, %v3966_v23  ;;  %v5909_v12 = vpop.f32.mrb[141].mxu1 }
0x1942   :  { %v3982_v29 = vsel %vm507_vm7, %v3967_v8, -inf }
0x1943   :  { %3983 = vmax.xlane.f32.xlu0 %v3982_v29 }
0x1948   :  { %6378 = vrot.lane.b32.xlu1 %v7616_v14, %s6632_s3 }
0x19c0   :  { %v3972_v25 = vpop.xlane.xlu0 %3971 }
0x19c1   :  { %v3985_v28 = vsub.f32 %v3947_v57, %v3972_v25 }
0x19c3   :  { %v3990_v56 = vmul.f32 1.442695, %v3985_v28 }
0x19c4   :  { %v3975_v52 = vpop.xlane.xlu1 %3974 }
0x19c5   :  { %6567 = vpow2.f32 %v3990_v56  ;;  %v3986_v45 = vsub.f32 %v3952_v20, %v3975_v52 }
0x19c7   :  { %v3992_v50 = vmul.f32 1.442695, %v3986_v45 }
0x19c8   :  { %v6379_v2 = vpop.permute.xlu1 %6378  ;;  %v3978_v54 = vpop.xlane.xlu0 %3977 }
0x19c9   :  { %6569 = vpow2.f32 %v3992_v50  ;;  %v6381_v22 = vunpack.i.h.bf16 %v6379_v2  ;;  %v6380_v39 = vunpack.i.l.bf16 %v6379_v2  ;;  %v3987_v37 = vsub.f32 %v3957_v48, %v3978_v54 }
0x19cb   :  { %v6178_v13 = vpack.c.bf16 %v6381_v22, %v6380_v39  ;;  %v3994_v60 = vmul.f32 1.442695, %v3987_v37 }
0x19cc   :  { %v3981_v40 = vpop.xlane.xlu0 %3980 }
0x19cd   :  { %6571 = vpow2.f32 %v3994_v60  ;;  %v3988_v58 = vsub.f32 %v3962_v17, %v3981_v40  ;;  %6179 = vmatpush3.bf16.msra.mxu0 %v6178_v13 }
0x19ce   :  { %6180 = vmatprep.subr.bf16.mxu0 %v6619_v0 }
0x19cf   :  { %v6568_v14 = vpop.eup %6567  ;;  %v3996_v9 = vmul.f32 1.442695, %v3988_v58 }
0x19d0   :  { %v3984_v33 = vpop.xlane.xlu0 %3983  ;;  %v4000_v1 = vsel %vm494_vm6, %v6568_v14, 0.0 }
0x19d1   :  { %6573 = vpow2.f32 %v3996_v9  ;;  %v3989_v5 = vsub.f32 %v3967_v8, %v3984_v33  ;;  %4001 = vadd.xlane.f32.xlu0 %v4000_v1 }
0x19d3   :  { %v6570_v43 = vpop.eup %6569  ;;  %v3998_v3 = vmul.f32 1.442695, %v3989_v5 }
0x19d4   :  { %v4003_v44 = vsel %vm494_vm6, %v6570_v43, 0.0 }
0x19d5   :  { %6575 = vpow2.f32 %v3998_v3  ;;  %4004 = vadd.xlane.f32.xlu1 %v4003_v44 }
0x19d7   :  { %v6572_v36 = vpop.eup %6571 }
0x19d8   :  { %v4006_v55 = vsel %vm494_vm6, %v6572_v36, 0.0 }
0x19d9   :  { %4007 = vadd.xlane.f32.xlu0 %v4006_v55 }
0x19db   :  { %v6574_v57 = vpop.eup %6573 }
0x19dc   :  { %v4009_v16 = vsel %vm494_vm6, %v6574_v57, 0.0 }
0x19dd   :  { %4010 = vadd.xlane.f32.xlu1 %v4009_v16  ;;  %v8129_v16 = vld [vmem:[%s8307_s8 + $0x8] sm:$0xff] }
0x19df   :  { %v6576_v21 = vpop.eup %6575 }
0x19e0   :  { %v4012_v26 = vsel %vm507_vm7, %v6576_v21, 0.0 }
0x19e1   :  { %4013 = vadd.xlane.f32.xlu0 %v4012_v26 }
0x19e9   :  { %v3811_v20 = vpop.f32.mrb[118].mxu0 }
0x19ea   :  { %v8070_v46 = vadd.f32 %v3811_v20, %v7931_v63  ;;  %v5872_v41 = vpop.f32.mrb[119].mxu0 }
0x19ed   :  { %v3816_v62 = vpop.f32.mrb[120].mxu0 }
0x19ee   :  { %v8073_v48 = vadd.f32 %v3816_v62, %v7933_v6  ;;  %4033 = vrot.lane.b32.xlu1 %v7632_v53, %s6632_s3  ;;  %v5875_v59 = vpop.f32.mrb[121].mxu0  ;;  %v4880_v53 = vld [vmem:[%s8309_s5 + $0x38] sm:$0xff] }
0x19ef   :  { %5936 = vmatpush3.msra.mxu1 %v4880_v53 }
0x19f0   :  { %6189 = vmatprep.subr.bf16.mxu1 %v6619_v0 }
0x19f1   :  { %v3821_v31 = vpop.f32.mrb[122].mxu0 }
0x19f2   :  { %v8078_v10 = vadd.f32 %v3821_v31, %v7935_v34  ;;  %v5878_v17 = vpop.f32.mrb[123].mxu0 }
0x19f5   :  { %v3826_v24 = vpop.f32.mrb[124].mxu0 }
0x19f6   :  { %v8081_v42 = vadd.f32 %v3826_v24, %v7937_v32  ;;  %v5881_v63 = vpop.f32.mrb[125].mxu0 }
0x19f7   :  { %6383 = vrot.lane.b32.xlu0 %v7628_v35, %s6632_s3 }
0x19f9   :  { %v3831_v23 = vpop.f32.mrb[126].mxu0 }
0x19fa   :  { %v8086_v6 = vadd.f32 %v3831_v23, %v7939_v49  ;;  %v5884_v8 = vpop.f32.mrb[127].mxu0 }
0x1a5e   :  { %v4002_v34 = vpop.xlane.xlu0 %4001 }
0x1a5f   :  { %6577 = vrcp.f32 %v4002_v34 }
0x1a62   :  { %v4005_v32 = vpop.xlane.xlu1 %4004 }
0x1a63   :  { %6579 = vrcp.f32 %v4005_v32 }
0x1a66   :  { %v4008_v12 = vpop.xlane.xlu0 %4007 }
0x1a67   :  { %6581 = vrcp.f32 %v4008_v12 }
0x1a69   :  { %v6578_v52 = vpop.eup %6577 }
0x1a6a   :  { %v4011_v56 = vpop.xlane.xlu1 %4010  ;;  %v4020_v45 = vmul.f32 %v6578_v52, %v6568_v14 }
0x1a6b   :  { %6583 = vrcp.f32 %v4011_v56 }
0x1a6d   :  { %v6580_v2 = vpop.eup %6579 }
0x1a6e   :  { %v4014_v29 = vpop.xlane.xlu0 %4013  ;;  %v4034_v50 = vpop.permute.xlu1 %4033  ;;  %v4021_v54 = vmul.f32 %v6580_v2, %v6570_v43 }
0x1a6f   :  { %6585 = vrcp.f32 %v4014_v29 }
0x1a71   :  { %v6582_v22 = vpop.eup %6581 }
0x1a72   :  { %v6384_v25 = vpop.permute.xlu0 %6383  ;;  %v4022_v39 = vmul.f32 %v6582_v22, %v6572_v36 }
0x1a73   :  { %v6386_v35 = vunpack.i.h.bf16 %v6384_v25  ;;  %v6385_v28 = vunpack.i.l.bf16 %v6384_v25 }
0x1a75   :  { %v6181_v49 = vpack.c.bf16 %v6386_v35, %v6385_v28  ;;  %v6584_v37 = vpop.eup %6583 }
0x1a76   :  { %v4023_v13 = vmul.f32 %v6584_v37, %v6574_v57 }
0x1a77   :  { %6182 = vmatpush3.bf16.msra.mxu0 %v6181_v49 }
0x1a78   :  { %5918 = vmatprep.subr.mxu0 %v6621_v4 }
0x1a79   :  { %v6586_v60 = vpop.eup %6585 }
0x1a7a   :  { %v4024_v40 = vmul.f32 %v6586_v60, %v6576_v21  ;;  %v4264_v21 = vrot.slane %v8129_v16, %v2028_v27 }
0x1a7b   :  { %5919 = vmatpush3.msk.msra.mxu0 %vm580_vm8, %v4034_v50 }
0x1a7c   :  { %5921 = vmatmul.mubr.msk.f32.vlgmr.msra.gmra.mrb[128].mxu0 %vm494_vm6, %v4020_v45  ;;  %6183 = vmatprep.subr.bf16.mxu0 %v6619_v0 }
0x1a7d   :  { %5923 = vmatprep.mubr.msk.f32.mxu0 %vm6620_vm0, %v6621_v4 }
0x1a80   :  { %5924 = vmatmul.mubr.msk.f32.gmra.mrb[130].mxu0 %vm494_vm6, %v4021_v54 }
0x1a81   :  { %5926 = vmatprep.mubr.msk.f32.mxu0 %vm6620_vm0, %v6621_v4 }
0x1a84   :  { %5927 = vmatmul.mubr.msk.f32.gmra.mrb[132].mxu0 %vm494_vm6, %v4022_v39 }
0x1a85   :  { %5929 = vmatprep.mubr.msk.f32.mxu0 %vm6620_vm0, %v6621_v4 }
0x1a88   :  { %5930 = vmatmul.mubr.msk.f32.gmra.mrb[134].mxu0 %vm494_vm6, %v4023_v13 }
0x1a89   :  { %5932 = vmatprep.mubr.msk.f32.mxu0 %vm6620_vm0, %v6621_v4 }
0x1a8c   :  { %5933 = vmatmul.mubr.msk.f32.gmra.mrb[136].mxu0 %vm494_vm6, %v4024_v40 }
0x1a8d   :  { %5960 = vmatprep.mubr.msk.f32.mxu0 %vm6620_vm0, %v6621_v4 }
0x1b4f   :  { %v4122_v58 = vpop.f32.mrb[128].mxu0 }
0x1b50   :  { %v5922_v14 = vpop.f32.mrb[129].mxu0  ;;  %5938 = vmatmul.mubr.msk.f32.vlgmr.msra.gmra.mrb[142].mxu1 %vm383_vm4, %v4122_v58 }
0x1b51   :  { %5940 = vmatprep.mubr.msk.f32.mxu1 %vm6620_vm0, %v6621_v4 }
0x1b53   :  { %v4127_v9 = vpop.f32.mrb[130].mxu0 }
0x1b54   :  { %v5925_v33 = vpop.f32.mrb[131].mxu0  ;;  %5941 = vmatmul.mubr.msk.f32.gmra.mrb[144].mxu1 %vm383_vm4, %v4127_v9 }
0x1b55   :  { %5943 = vmatprep.mubr.msk.f32.mxu1 %vm6620_vm0, %v6621_v4 }
0x1b57   :  { %v4132_v1 = vpop.f32.mrb[132].mxu0 }
0x1b58   :  { %v5928_v5 = vpop.f32.mrb[133].mxu0  ;;  %5944 = vmatmul.mubr.msk.f32.gmra.mrb[146].mxu1 %vm383_vm4, %v4132_v1 }
0x1b59   :  { %5946 = vmatprep.mubr.msk.f32.mxu1 %vm6620_vm0, %v6621_v4 }
0x1b5b   :  { %v4137_v43 = vpop.f32.mrb[134].mxu0 }
0x1b5c   :  { %v5931_v3 = vpop.f32.mrb[135].mxu0  ;;  %5947 = vmatmul.mubr.msk.f32.gmra.mrb[148].mxu1 %vm383_vm4, %v4137_v43 }
0x1b5d   :  { %5949 = vmatprep.mubr.msk.f32.mxu1 %vm6620_vm0, %v6621_v4 }
0x1b5f   :  { %v4142_v44 = vpop.f32.mrb[136].mxu0 }
0x1b60   :  { %v5934_v36 = vpop.f32.mrb[137].mxu0  ;;  %5950 = vmatmul.mubr.msk.f32.gmra.mrb[150].mxu1 %vm383_vm4, %v4142_v44 }
0x1b61   :  { %5991 = vmatprep.mubr.msk.f32.mxu1 %vm6620_vm0, %v6621_v4 }
0x1c23   :  { %v4227_v55 = vpop.f32.mrb[142].mxu1 }
0x1c24   :  { %v4251_v57 = vadd.f32 %v4227_v55, %v8070_v46  ;;  %v5939_v26 = vpop.f32.mrb[143].mxu1  ;;  %v4965_v55 = vld [vmem:[%s8310_s6 + $0x20] sm:$0xff] }
0x1c25   :  { %v4967_v26 = vld [vmem:[%s8310_s6 + $0x30] sm:$0xff] }
0x1c26   :  { %v4256_v20 = vadd.f32 %v4251_v57, %v7538_v51  ;;  %v4966_v57 = vld [vmem:[%s8310_s6 + $0x28] sm:$0xff] }
0x1c27   :  { %v4232_v41 = vpop.f32.mrb[144].mxu1 }
0x1c28   :  { %v8135_v62 = vadd.f32 %v4264_v21, %v4256_v20  ;;  %v4252_v59 = vadd.f32 %v4232_v41, %v8073_v48  ;;  %v5942_v31 = vpop.f32.mrb[145].mxu1  ;;  %v4968_v20 = vld [vmem:[%s8310_s6 + $0x38] sm:$0xff] }
0x1c29   :  { %v6187_v41 = vpack.c.bf16 %v4968_v20, %v4967_v26  ;;  %v4641_v26 = vld [vmem:[%s8312_s9 + $0x8] sm:$0xff] }
0x1c2a   :  { %v4257_v46 = vadd.f32 %v4252_v59, %v7543_v47  ;;  %v4270_v17 = vsel %vm165_vm2, %v8135_v62, 0.0 }
0x1c2b   :  { %4271 = vadd.xlane.f32.xlu1 %v4270_v17  ;;  %v4237_v24 = vpop.f32.mrb[146].mxu1 }
0x1c2c   :  { %v8141_v63 = vadd.f32 %v4264_v21, %v4257_v46  ;;  %v4253_v27 = vadd.f32 %v4237_v24, %v8078_v10  ;;  %v5945_v23 = vpop.f32.mrb[147].mxu1 }
0x1c2e   :  { %v4258_v51 = vadd.f32 %v4253_v27, %v7548_v61  ;;  %v4273_v8 = vsel %vm165_vm2, %v8141_v63, 0.0 }
0x1c2f   :  { %4274 = vadd.xlane.f32.xlu0 %v4273_v8  ;;  %v4242_v48 = vpop.f32.mrb[148].mxu1 }
0x1c30   :  { %v8147_v53 = vadd.f32 %v4264_v21, %v4258_v51  ;;  %v4254_v47 = vadd.f32 %v4242_v48, %v8081_v42  ;;  %v5948_v34 = vpop.f32.mrb[149].mxu1 }
0x1c31   :  { %v4338_v34 = vrot.slane %v8129_v16, %v2102_v30 }
0x1c32   :  { %v4259_v12 = vadd.f32 %v4254_v47, %v7553_v7  ;;  %v4276_v32 = vsel %vm165_vm2, %v8147_v53, 0.0 }
0x1c33   :  { %4277 = vadd.xlane.f32.xlu0 %v4276_v32  ;;  %v4247_v10 = vpop.f32.mrb[150].mxu1 }
0x1c34   :  { %v8153_v29 = vadd.f32 %v4264_v21, %v4259_v12  ;;  %v4255_v61 = vadd.f32 %v4247_v10, %v8086_v6  ;;  %v5951_v25 = vpop.f32.mrb[151].mxu1  ;;  %v4347_v10 = vrot.slane %v8129_v16, %v2111_v18 }
0x1c36   :  { %v4260_v35 = vadd.f32 %v4255_v61, %v7558_v15  ;;  %v4279_v28 = vsel %vm165_vm2, %v8153_v29, 0.0 }
0x1c37   :  { %4280 = vadd.xlane.f32.xlu1 %v4279_v28 }
0x1c38   :  { %v8159_v42 = vadd.f32 %v4264_v21, %v4260_v35  ;;  %v6184_v21 = vpack.c.bf16 %v4966_v57, %v4965_v55  ;;  %v4981_v55 = vld [vmem:[%s8311_s7 + $0x78] sm:$0xff] }
0x1c3a   :  { %v4282_v7 = vsel %vm178_vm3, %v8159_v42, 0.0  ;;  %6185 = vmatpush3.bf16.msra.mxu0 %v6184_v21  ;;  %v4640_v21 = vld [vmem:[%s8312_s9] sm:$0xff] }
0x1c3b   :  { %4283 = vadd.xlane.f32.xlu0 %v4282_v7  ;;  %6186 = vmatprep.subr.bf16.mxu0 %v6619_v0  ;;  %v6202_v20 = vpack.c.bf16 %v4641_v26, %v4640_v21 }
0x1c3e   :  { %6188 = vmatpush3.bf16.msra.mxu0 %v6187_v41  ;;  %v4361_v41 = vrot.slane %v8129_v16, %v2124_v11 }
0x1c3f   :  { %6201 = vmatprep.subr.bf16.mxu0 %v6619_v0 }
0x1cb8   :  { %v4272_v56 = vpop.xlane.xlu1 %4271 }
0x1cb9   :  { %v4285_v49 = vmul.f32 0.03125, %v4272_v56 }
0x1cbb   :  { %v4290_v52 = vsub.f32 %v8135_v62, %v4285_v49 }
0x1cbc   :  { %v4275_v45 = vpop.xlane.xlu0 %4274 }
0x1cbd   :  { %v4286_v50 = vmul.f32 0.03125, %v4275_v45  ;;  %v4295_v6 = vmul.f32 %v4290_v52, %v4290_v52 }
0x1cbf   :  { %v4291_v2 = vsub.f32 %v8141_v63, %v4286_v50  ;;  %v4300_v15 = vsel %vm165_vm2, %v4295_v6, 0.0 }
0x1cc0   :  { %v4278_v54 = vpop.xlane.xlu0 %4277  ;;  %4301 = vadd.xlane.f32.xlu1 %v4300_v15 }
0x1cc1   :  { %v4287_v22 = vmul.f32 0.03125, %v4278_v54  ;;  %v4296_v39 = vmul.f32 %v4291_v2, %v4291_v2 }
0x1cc3   :  { %v4292_v37 = vsub.f32 %v8147_v53, %v4287_v22  ;;  %v4303_v13 = vsel %vm165_vm2, %v4296_v39, 0.0 }
0x1cc4   :  { %v4281_v60 = vpop.xlane.xlu1 %4280  ;;  %4304 = vadd.xlane.f32.xlu0 %v4303_v13 }
0x1cc5   :  { %v4288_v40 = vmul.f32 0.03125, %v4281_v60  ;;  %v4297_v58 = vmul.f32 %v4292_v37, %v4292_v37 }
0x1cc7   :  { %v4293_v14 = vsub.f32 %v8153_v29, %v4288_v40  ;;  %v4306_v9 = vsel %vm165_vm2, %v4297_v58, 0.0  ;;  %v4974_v58 = vld [vmem:[%s8311_s7 + $0x40] sm:$0xff] }
0x1cc8   :  { %4307 = vadd.xlane.f32.xlu1 %v4306_v9  ;;  %v4284_v33 = vpop.xlane.xlu0 %4283 }
0x1cc9   :  { %v4289_v1 = vmul.f32 0.03125, %v4284_v33  ;;  %v4298_v5 = vmul.f32 %v4293_v14, %v4293_v14  ;;  %v4976_v33 = vld [vmem:[%s8311_s7 + $0x50] sm:$0xff] }
0x1ccb   :  { %v4294_v43 = vsub.f32 %v8159_v42, %v4289_v1  ;;  %v4309_v3 = vsel %vm165_vm2, %v4298_v5, 0.0  ;;  %v4977_v1 = vld [vmem:[%s8311_s7 + $0x58] sm:$0xff] }
0x1ccc   :  { %4310 = vadd.xlane.f32.xlu0 %v4309_v3  ;;  %v6193_v5 = vpack.c.bf16 %v4977_v1, %v4976_v33  ;;  %v4979_v3 = vld [vmem:[%s8311_s7 + $0x68] sm:$0xff] }
0x1ccd   :  { %v4299_v44 = vmul.f32 %v4294_v43, %v4294_v43 }
0x1ccf   :  { %v4312_v36 = vsel %vm178_vm3, %v4299_v44, 0.0 }
0x1cd0   :  { %4313 = vadd.xlane.f32.xlu1 %v4312_v36  ;;  %v4980_v36 = vld [vmem:[%s8311_s7 + $0x70] sm:$0xff] }
0x1cd1   :  { %v6199_v57 = vpack.c.bf16 %v4981_v55, %v4980_v36 }
0x1d4d   :  { %v4302_v59 = vpop.xlane.xlu1 %4301 }
0x1d4e   :  { %v4315_v31 = vmul.f32 0.03125, %v4302_v59 }
0x1d50   :  { %v4320_v46 = vadd.f32 1e-05, %v4315_v31 }
0x1d51   :  { %v4305_v17 = vpop.xlane.xlu0 %4304 }
0x1d52   :  { %6587 = vrsqrt.f32 %v4320_v46  ;;  %v4316_v24 = vmul.f32 0.03125, %v4305_v17 }
0x1d54   :  { %v4321_v27 = vadd.f32 1e-05, %v4316_v24 }
0x1d55   :  { %v4308_v23 = vpop.xlane.xlu1 %4307 }
0x1d56   :  { %6589 = vrsqrt.f32 %v4321_v27  ;;  %v4317_v51 = vmul.f32 0.03125, %v4308_v23 }
0x1d58   :  { %v4322_v8 = vadd.f32 1e-05, %v4317_v51 }
0x1d59   :  { %v4311_v48 = vpop.xlane.xlu0 %4310 }
0x1d5a   :  { %6591 = vrsqrt.f32 %v4322_v8  ;;  %v4318_v47 = vmul.f32 0.03125, %v4311_v48 }
0x1d5c   :  { %v6588_v12 = vpop.eup %6587  ;;  %v4323_v32 = vadd.f32 1e-05, %v4318_v47 }
0x1d5d   :  { %v4330_v61 = vmul.f32 %v6588_v12, %v4290_v52  ;;  %v4314_v25 = vpop.xlane.xlu1 %4313 }
0x1d5e   :  { %6593 = vrsqrt.f32 %v4323_v32  ;;  %v4319_v35 = vmul.f32 0.03125, %v4314_v25 }
0x1d5f   :  { %v4339_v28 = vmul.f32 %v4338_v34, %v4330_v61 }
0x1d60   :  { %v6590_v7 = vpop.eup %6589  ;;  %v4324_v56 = vadd.f32 1e-05, %v4319_v35 }
0x1d61   :  { %v4348_v49 = vadd.f32 %v4347_v10, %v4339_v28  ;;  %v4331_v45 = vmul.f32 %v6590_v7, %v4291_v2 }
0x1d62   :  { %6595 = vrsqrt.f32 %v4324_v56 }
0x1d63   :  { %5961 = vmatmul.mubr.msk.f32.vlgmr.msra.gmra.mrb[138].mxu0 %vm165_vm2, %v4348_v49  ;;  %v4340_v50 = vmul.f32 %v4338_v34, %v4331_v45 }
0x1d64   :  { %v6592_v30 = vpop.eup %6591  ;;  %5963 = vmatprep.mubr.msk.f32.mxu0 %vm6620_vm0, %v6621_v4  ;;  %6203 = vmatpush3.bf16.msra.mxu0 %v6202_v20 }
0x1d65   :  { %v4349_v6 = vadd.f32 %v4347_v10, %v4340_v50  ;;  %v4332_v15 = vmul.f32 %v6592_v30, %v4292_v37  ;;  %6204 = vmatprep.subr.bf16.mxu0 %v6619_v0 }
0x1d67   :  { %5964 = vmatmul.mubr.msk.f32.gmra.mrb[140].mxu0 %vm165_vm2, %v4349_v6  ;;  %v4341_v18 = vmul.f32 %v4338_v34, %v4332_v15 }
0x1d68   :  { %v6594_v52 = vpop.eup %6593  ;;  %5966 = vmatprep.mubr.msk.f32.mxu0 %vm6620_vm0, %v6621_v4 }
0x1d69   :  { %v4350_v54 = vadd.f32 %v4347_v10, %v4341_v18  ;;  %v4333_v22 = vmul.f32 %v6594_v52, %v4293_v14  ;;  %v4975_v14 = vld [vmem:[%s8311_s7 + $0x48] sm:$0xff] }
0x1d6a   :  { %v6190_v9 = vpack.c.bf16 %v4975_v14, %v4974_v58 }
0x1d6b   :  { %5967 = vmatmul.mubr.msk.f32.gmra.mrb[142].mxu0 %vm165_vm2, %v4350_v54  ;;  %v4342_v2 = vmul.f32 %v4338_v34, %v4333_v22 }
0x1d6c   :  { %v6596_v39 = vpop.eup %6595  ;;  %5969 = vmatprep.mubr.msk.f32.mxu0 %vm6620_vm0, %v6621_v4  ;;  %6191 = vmatpush3.bf16.msra.mxu1 %v6190_v9 }
0x1d6d   :  { %v4351_v13 = vadd.f32 %v4347_v10, %v4342_v2  ;;  %v4334_v60 = vmul.f32 %v6596_v39, %v4294_v43  ;;  %6192 = vmatprep.subr.bf16.mxu1 %v6619_v0  ;;  %v4978_v43 = vld [vmem:[%s8311_s7 + $0x60] sm:$0xff] }
0x1d6e   :  { %v6196_v44 = vpack.c.bf16 %v4979_v3, %v4978_v43 }
0x1d6f   :  { %5970 = vmatmul.mubr.msk.f32.gmra.mrb[144].mxu0 %vm165_vm2, %v4351_v13  ;;  %v4343_v37 = vmul.f32 %v4338_v34, %v4334_v60 }
0x1d70   :  { %5972 = vmatprep.mubr.msk.f32.mxu0 %vm6620_vm0, %v6621_v4  ;;  %6194 = vmatpush3.bf16.msra.mxu1 %v6193_v5 }
0x1d71   :  { %v4352_v40 = vadd.f32 %v4347_v10, %v4343_v37  ;;  %6195 = vmatprep.subr.bf16.mxu1 %v6619_v0 }
0x1d73   :  { %5973 = vmatmul.mubr.msk.f32.gmra.mrb[146].mxu0 %vm165_vm2, %v4352_v40 }
0x1d74   :  { %6014 = vmatprep.mubr.msk.f32.mxu0 %vm6620_vm0, %v6621_v4  ;;  %6197 = vmatpush3.bf16.msra.mxu1 %v6196_v44 }
0x1d75   :  { %6198 = vmatprep.subr.bf16.mxu1 %v6619_v0 }
0x1d78   :  { %6200 = vmatpush3.bf16.msra.mxu1 %v6199_v57 }
0x1e36   :  { %v4443_v59 = vpop.f32.mrb[138].mxu0 }
0x1e37   :  { %v4444_v31 = vadd.f32 %v4443_v59, %v4361_v41  ;;  %v5962_v46 = vpop.f32.mrb[139].mxu0 }
0x1e39   :  { %v4472_v17 = vmul.f32 %v4444_v31, %v4444_v31  ;;  %v4467_v58 = vmul.f32 0.5, %v4444_v31 }
0x1e3a   :  { %v4448_v24 = vpop.f32.mrb[140].mxu0 }
0x1e3b   :  { %v4477_v27 = vmul.f32 %v4472_v17, %v4444_v31  ;;  %v4449_v23 = vadd.f32 %v4448_v24, %v4361_v41  ;;  %v5965_v51 = vpop.f32.mrb[141].mxu0 }
0x1e3d   :  { %v4482_v8 = vmul.f32 0.044715, %v4477_v27  ;;  %v4473_v48 = vmul.f32 %v4449_v23, %v4449_v23  ;;  %v4468_v43 = vmul.f32 0.5, %v4449_v23  ;;  %v4642_v27 = vld [vmem:[%s8312_s9 + $0x10] sm:$0xff] }
0x1e3e   :  { %v4453_v47 = vpop.f32.mrb[142].mxu0 }
0x1e3f   :  { %v4487_v34 = vadd.f32 %v4482_v8, %v4444_v31  ;;  %v4478_v12 = vmul.f32 %v4473_v48, %v4449_v23  ;;  %v4454_v32 = vadd.f32 %v4453_v47, %v4361_v41  ;;  %v5968_v10 = vpop.f32.mrb[143].mxu0  ;;  %v4634_v8 = vrot.slane %v8129_v16, %v2396_v38 }
0x1e41   :  { %v4492_v0 = vmul.f32 0.7978846, %v4487_v34  ;;  %v4483_v61 = vmul.f32 0.044715, %v4478_v12  ;;  %v4474_v25 = vmul.f32 %v4454_v32, %v4454_v32  ;;  %v4469_v55 = vmul.f32 0.5, %v4454_v32 }
0x1e42   :  { %v4458_v35 = vpop.f32.mrb[144].mxu0 }
0x1e43   :  { %6597 = vtanh.f32 %v4492_v0  ;;  %v4488_v11 = vadd.f32 %v4483_v61, %v4449_v23  ;;  %v4479_v28 = vmul.f32 %v4474_v25, %v4454_v32  ;;  %v4459_v7 = vadd.f32 %v4458_v35, %v4361_v41  ;;  %v5971_v56 = vpop.f32.mrb[145].mxu0  ;;  %v4643_v23 = vld [vmem:[%s8312_s9 + $0x18] sm:$0xff] }
0x1e44   :  { %v6205_v51 = vpack.c.bf16 %v4643_v23, %v4642_v27 }
0x1e45   :  { %v4493_v49 = vmul.f32 0.7978846, %v4488_v11  ;;  %v4484_v45 = vmul.f32 0.044715, %v4479_v28  ;;  %v4475_v50 = vmul.f32 %v4459_v7, %v4459_v7  ;;  %v4470_v20 = vmul.f32 0.5, %v4459_v7 }
0x1e46   :  { %v4463_v30 = vpop.f32.mrb[146].mxu0  ;;  %6206 = vmatpush3.bf16.msra.mxu0 %v6205_v51 }
0x1e47   :  { %6599 = vtanh.f32 %v4493_v49  ;;  %v4489_v6 = vadd.f32 %v4484_v45, %v4454_v32  ;;  %v4480_v15 = vmul.f32 %v4475_v50, %v4459_v7  ;;  %v4464_v18 = vadd.f32 %v4463_v30, %v4361_v41  ;;  %v5974_v52 = vpop.f32.mrb[147].mxu0 }
0x1e49   :  { %v4494_v54 = vmul.f32 0.7978846, %v4489_v6  ;;  %v4485_v22 = vmul.f32 0.044715, %v4480_v15  ;;  %v4476_v2 = vmul.f32 %v4464_v18, %v4464_v18  ;;  %v4471_v46 = vmul.f32 0.5, %v4464_v18 }
0x1e4b   :  { %6601 = vtanh.f32 %v4494_v54  ;;  %v4490_v39 = vadd.f32 %v4485_v22, %v4459_v7  ;;  %v4481_v13 = vmul.f32 %v4476_v2, %v4464_v18 }
0x1e4d   :  { %v6598_v60 = vpop.eup %6597  ;;  %v4495_v37 = vmul.f32 0.7978846, %v4490_v39  ;;  %v4486_v40 = vmul.f32 0.044715, %v4481_v13 }
0x1e4e   :  { %v4502_v14 = vadd.f32 1.0, %v6598_v60 }
0x1e4f   :  { %6603 = vtanh.f32 %v4495_v37  ;;  %v4491_v9 = vadd.f32 %v4486_v40, %v4464_v18 }
0x1e50   :  { %v4507_v33 = vmul.f32 %v4502_v14, %v4467_v58 }
0x1e51   :  { %v6600_v1 = vpop.eup %6599  ;;  %v4496_v5 = vmul.f32 0.7978846, %v4491_v9 }
0x1e52   :  { %5992 = vmatmul.mubr.msk.f32.vlgmr.msra.gmra.mrb[152].mxu1 %vm53_vm1, %v4507_v33  ;;  %v4503_v3 = vadd.f32 1.0, %v6600_v1 }
0x1e53   :  { %6605 = vtanh.f32 %v4496_v5  ;;  %5994 = vmatprep.mubr.msk.f32.mxu1 %vm6620_vm0, %v6621_v4 }
0x1e54   :  { %v4508_v44 = vmul.f32 %v4503_v3, %v4468_v43 }
0x1e55   :  { %v6602_v36 = vpop.eup %6601 }
0x1e56   :  { %5995 = vmatmul.mubr.msk.f32.gmra.mrb[154].mxu1 %vm53_vm1, %v4508_v44  ;;  %v4504_v57 = vadd.f32 1.0, %v6602_v36 }
0x1e57   :  { %5997 = vmatprep.mubr.msk.f32.mxu1 %vm6620_vm0, %v6621_v4 }
0x1e58   :  { %v4509_v21 = vmul.f32 %v4504_v57, %v4469_v55 }
0x1e59   :  { %v6604_v26 = vpop.eup %6603 }
0x1e5a   :  { %5998 = vmatmul.mubr.msk.f32.gmra.mrb[156].mxu1 %vm53_vm1, %v4509_v21  ;;  %v4505_v41 = vadd.f32 1.0, %v6604_v26 }
0x1e5b   :  { %6000 = vmatprep.mubr.msk.f32.mxu1 %vm6620_vm0, %v6621_v4 }
0x1e5c   :  { %v4510_v59 = vmul.f32 %v4505_v41, %v4470_v20 }
0x1e5d   :  { %v6606_v31 = vpop.eup %6605 }
0x1e5e   :  { %6001 = vmatmul.mubr.msk.f32.gmra.mrb[158].mxu1 %vm53_vm1, %v4510_v59  ;;  %v4506_v17 = vadd.f32 1.0, %v6606_v31 }
0x1e5f   :  { %6003 = vmatprep.mubr.msk.f32.mxu1 %vm6620_vm0, %v6621_v4 }
0x1e60   :  { %v4511_v24 = vmul.f32 %v4506_v17, %v4471_v46 }
0x1e62   :  { %6004 = vmatmul.mubr.msk.f32.gmra.mrb[160].mxu1 %vm53_vm1, %v4511_v24 }
0x1f25   :  { %v4602_v48 = vpop.f32.mrb[152].mxu1 }
0x1f26   :  { %v4626_v47 = vadd.f32 %v4602_v48, %v8135_v62  ;;  %v5993_v34 = vpop.f32.mrb[153].mxu1 }
0x1f28   :  { %v4635_v12 = vadd.f32 %v4634_v8, %v4626_v47 }
0x1f29   :  { %v4607_v32 = vpop.f32.mrb[154].mxu1 }
0x1f2a   :  { %v4627_v10 = vadd.f32 %v4607_v32, %v8141_v63  ;;  %v5996_v0 = vpop.f32.mrb[155].mxu1  ;;  %6015 = vmatmul.mubr.msk.f32.vlgmr.msra.gmra.mrb[148].mxu0 %vm165_vm2, %v4635_v12 }
0x1f2b   :  { %6017 = vmatprep.mubr.msk.f32.mxu0 %vm6620_vm0, %v6621_v4 }
0x1f2c   :  { %v4636_v61 = vadd.f32 %v4634_v8, %v4627_v10 }
0x1f2d   :  { %v4612_v25 = vpop.f32.mrb[156].mxu1 }
0x1f2e   :  { %v4628_v19 = vadd.f32 %v4612_v25, %v8147_v53  ;;  %v5999_v35 = vpop.f32.mrb[157].mxu1  ;;  %6018 = vmatmul.mubr.msk.f32.gmra.mrb[150].mxu0 %vm165_vm2, %v4636_v61 }
0x1f2f   :  { %6020 = vmatprep.mubr.msk.f32.mxu0 %vm6620_vm0, %v6621_v4 }
0x1f30   :  { %v4637_v38 = vadd.f32 %v4634_v8, %v4628_v19 }
0x1f31   :  { %v4617_v16 = vpop.f32.mrb[158].mxu1 }
0x1f32   :  { %v4629_v62 = vadd.f32 %v4617_v16, %v8153_v29  ;;  %v6002_v63 = vpop.f32.mrb[159].mxu1  ;;  %6021 = vmatmul.mubr.msk.f32.gmra.mrb[152].mxu0 %vm165_vm2, %v4637_v38  ;;  %v4987_v29 = vld [vmem:[%s8312_s9 + $0x20] ss:$0 sm:$0xff] }
0x1f33   :  { %6023 = vmatprep.mubr.msk.f32.mxu0 %vm6620_vm0, %v6621_v4 }
0x1f34   :  { %v4638_v11 = vadd.f32 %v4634_v8, %v4629_v62 }
0x1f35   :  { %v4622_v28 = vpop.f32.mrb[160].mxu1 }
0x1f36   :  { %v4630_v53 = vadd.f32 %v4622_v28, %v8159_v42  ;;  %v6005_v7 = vpop.f32.mrb[161].mxu1  ;;  %6024 = vmatmul.mubr.msk.f32.gmra.mrb[154].mxu0 %vm165_vm2, %v4638_v11 }
0x1f37   :  { %6026 = vmatprep.mubr.msk.f32.mxu0 %vm6620_vm0, %v6621_v4 }
0x1f38   :  { %v4639_v56 = vadd.f32 %v4634_v8, %v4630_v53 }
0x1f3a   :  { %6027 = vmatmul.mubr.msk.f32.gmra.mrb[156].mxu0 %vm165_vm2, %v4639_v56 }
0x1ffd   :  { %v4730_v49 = vpop.f32.mrb[148].mxu0 }
0x1ffe   :  { %v4731_v45 = vadd.f32 %v4987_v29, %v4730_v49  ;;  %v6016_v50 = vpop.f32.mrb[149].mxu0 }
0x2000   :  { %4754 = vst [vmem:[%s8313_s10] sm:$0xff] %v4731_v45 }
0x2001   :  { %v4735_v42 = vpop.f32.mrb[150].mxu0 }
0x2002   :  { %v4736_v30 = vadd.f32 %v4987_v29, %v4735_v42  ;;  %v6019_v6 = vpop.f32.mrb[151].mxu0 }
0x2004   :  { %4755 = vst [vmem:[%s8313_s10 + $0x8] sm:$0xff] %v4736_v30 }
0x2005   :  { %v4740_v4 = vpop.f32.mrb[152].mxu0 }
0x2006   :  { %v4741_v15 = vadd.f32 %v4987_v29, %v4740_v4  ;;  %v6022_v18 = vpop.f32.mrb[153].mxu0 }
0x2008   :  { %4756 = vst [vmem:[%s8313_s10 + $0x10] sm:$0xff] %v4741_v15 }
0x2009   :  { %v4745_v52 = vpop.f32.mrb[154].mxu0 }
0x200a   :  { %v4746_v54 = vadd.f32 %v4987_v29, %v4745_v52  ;;  %v6025_v22 = vpop.f32.mrb[155].mxu0 }
0x200c   :  { %4757 = vst [vmem:[%s8313_s10 + $0x18] sm:$0xff] %v4746_v54 }
0x200d   :  { %v4750_v2 = vpop.f32.mrb[156].mxu0 }
0x200e   :  { %v4751_v39 = vadd.f32 %v4987_v29, %v4750_v2  ;;  %v6028_v13 = vpop.f32.mrb[157].mxu0 }
0x2010   :  { %4758 = vst [vmem:[%s8313_s10 + $0x20] sm:$0x3] %v4751_v39 }

</bundles_post_ra>
